<compile_context>
chip_gen: v6e
topology: v6e:2x2x1
jax: 0.10.0
libtpu: 0.0.40
codegen_flags: <defaults>
</compile_context>

<pallas_src>
import math
import jax
import jax.numpy as jnp
from jax import lax
from jax.experimental import pallas as pl
from jax.experimental.pallas import tpu as pltpu

LN_EPS = 1e-5


# ----------------------------------------------------------------------------
# Fused kernel: one grid step = a slab of the batch, all layers unrolled inside.
# ----------------------------------------------------------------------------

def _layer_norm(y, g, b):
    # Two-pass (torch-matching) variance: E[(x - mean)^2].
    mu = jnp.mean(y, axis=-1, keepdims=True)
    var = jnp.mean(jnp.square(y - mu), axis=-1, keepdims=True)
    return (y - mu) * lax.rsqrt(var + LN_EPS) * g + b


def make_transformer_kernel(depth, heads, dim_head, mode, has_skip, mxu_dtype,
                            approx_softmax):
    scale = dim_head ** (-0.5)
    inv_sqrt2 = 1.0 / math.sqrt(2.0)
    H, dh = heads, dim_head
    hd = H * dh

    def kernel(*refs):
        if has_skip:
            (x_ref, ln1_g, ln1_b, wqkv, wo, bo,
             ln2_g, ln2_b, w1, b1, w2, b2,
             sk_w0, sk_w1, sk_b, o_ref) = refs
        else:
            (x_ref, ln1_g, ln1_b, wqkv, wo, bo,
             ln2_g, ln2_b, w1, b1, w2, b2, o_ref) = refs

        Bb, N, D = x_ref.shape
        x = x_ref[...].astype(jnp.float32)          # (Bb, N, D) residual stream, f32

        def bcast(w):                               # 2-D weight -> leading-batch operand
            return jnp.broadcast_to(w, (Bb,) + w.shape)

        prev1 = None   # layer-entry activations of layer l-1
        prev2 = None   # layer-entry activations of layer l-2
        for l in range(depth):                      # static, unrolled (depth is small)
            if mode == "CAF":
                entry = x
                if l > 1:
                    # skipcat: Conv2d(N, N, [1,2]) over cat(x, prev) == token mixing
                    #   out[b,o,:] = sum_i W0[o,i]*x[b,i,:] + W1[o,i]*prev[b,i,:] + bias[o]
                    xb = x.astype(mxu_dtype)
                    pb = prev2.astype(mxu_dtype)
                    x = (jnp.einsum('boi,bid->bod', bcast(sk_w0[l - 2]), xb,
                                    preferred_element_type=jnp.float32)
                         + jnp.einsum('boi,bid->bod', bcast(sk_w1[l - 2]), pb,
                                      preferred_element_type=jnp.float32)
                         + sk_b[l - 2])
                prev2 = prev1
                prev1 = entry

            # ------------------ Residual(PreNorm(Attention)) ------------------
            xn = _layer_norm(x, ln1_g[l], ln1_b[l]).astype(mxu_dtype)    # (Bb,N,D)
            # Fused QKV projection: one matmul per batch element instead of 3*H
            # tiny per-head matmuls.
            qkv = jnp.einsum('bnd,bde->bne', xn, bcast(wqkv[l]),
                             preferred_element_type=jnp.float32)         # (Bb,N,3*H*dh)
            outs = []
            for h in range(H):                      # heads via static lane slices
                qh = qkv[:, :, h * dh:(h + 1) * dh].astype(mxu_dtype)
                kh = qkv[:, :, hd + h * dh:hd + (h + 1) * dh].astype(mxu_dtype)
                vh = qkv[:, :, 2 * hd + h * dh:2 * hd + (h + 1) * dh].astype(mxu_dtype)
                dots = jnp.einsum('bnd,bmd->bnm', qh, kh,
                                  preferred_element_type=jnp.float32) * scale
                dots = dots - jnp.max(dots, axis=-1, keepdims=True)
                e = jnp.exp(dots)
                denom = jnp.sum(e, axis=-1, keepdims=True)
                if approx_softmax:
                    attn = e * pl.reciprocal(denom, approx=True)         # EUP slot
                else:
                    attn = e / denom
                outs.append(jnp.einsum('bnm,bmd->bnd', attn.astype(mxu_dtype), vh,
                                       preferred_element_type=jnp.float32))
            # Collapsed output projection: concat heads along lanes, single matmul.
            oall = jnp.concatenate(outs, axis=-1).astype(mxu_dtype)      # (Bb,N,H*dh)
            y = jnp.einsum('bnk,bkd->bnd', oall, bcast(wo[l]),
                           preferred_element_type=jnp.float32) + bo[l]
            x = x + y

            # ------------------ Residual(PreNorm(FeedForward)) ----------------
            xn2 = _layer_norm(x, ln2_g[l], ln2_b[l]).astype(mxu_dtype)
            hmid = jnp.einsum('bnd,bdk->bnk', xn2, bcast(w1[l]),
                              preferred_element_type=jnp.float32) + b1[l]
            hmid = 0.5 * hmid * (1.0 + lax.erf(hmid * inv_sqrt2))        # exact GELU (erf)
            y2 = jnp.einsum('bnk,bkd->bnd', hmid.astype(mxu_dtype), bcast(w2[l]),
                            preferred_element_type=jnp.float32) + b2[l]
            x = x + y2

        o_ref[...] = x.astype(o_ref.dtype)           # single whole-block store

    return kernel


# ----------------------------------------------------------------------------
# Wrapper: single pallas_call for the whole forward pass.
# ----------------------------------------------------------------------------

def _const_spec(arr):
    nd = arr.ndim
    return pl.BlockSpec(arr.shape, lambda b, _nd=nd: (0,) * _nd)


def transformer_forward(x, params, *, heads, dim_head, mode="CAF", mask=None,
                        mxu_dtype=jnp.bfloat16, batch_blocks=1,
                        approx_softmax=True):
    # TODO(synk): attention mask path not implemented (forward requires mask=None).
    assert mask is None
    if mode not in ("CAF", "ViT"):
        raise ValueError(mode)
    B, N, D = x.shape
    assert B % batch_blocks == 0, "batch_blocks must divide batch"
    Bb = B // batch_blocks
    depth = params["wqkv"].shape[0]
    H, dh = heads, dim_head
    hd = H * dh
    mlp = params["w1"].shape[-1]
    has_skip = (mode == "CAF") and depth > 2

    def mx(w):                                   # matmul weights -> bf16 MXU inputs
        return w.astype(mxu_dtype)

    inputs = [x,
              params["ln1_g"], params["ln1_b"],
              mx(params["wqkv"]), mx(params["wo"]), params["bo"],
              params["ln2_g"], params["ln2_b"],
              mx(params["w1"]), params["b1"], mx(params["w2"]), params["b2"]]
    if has_skip:
        inputs += [mx(params["sk_w0"]), mx(params["sk_w1"]), params["sk_b"]]

    in_specs = [pl.BlockSpec((Bb, N, D), lambda b: (b, 0, 0))]
    in_specs += [_const_spec(a) for a in inputs[1:]]

    kernel = make_transformer_kernel(depth, heads, dim_head, mode, has_skip,
                                     mxu_dtype, approx_softmax)

    # Advisory cost estimate so XLA schedules around this latency-bound call.
    flops = depth * (2 * B * N * D * 3 * hd          # fused QKV projection
                     + 2 * 2 * B * H * N * N * dh    # q@k^T and attn@v
                     + 2 * B * N * hd * D            # output projection
                     + 2 * 2 * B * N * D * mlp)      # feed-forward
    if has_skip:
        flops += (depth - 2) * 2 * 2 * B * N * N * D
    transcendentals = depth * (B * H * N * N + B * N * mlp + 4 * B * N)
    bytes_accessed = sum(math.prod(a.shape) * a.dtype.itemsize for a in inputs)
    bytes_accessed += math.prod(x.shape) * x.dtype.itemsize

    return pl.pallas_call(
        kernel,
        out_shape=jax.ShapeDtypeStruct((B, N, D), x.dtype),
        grid=(batch_blocks,),
        in_specs=in_specs,
        out_specs=pl.BlockSpec((Bb, N, D), lambda b: (b, 0, 0)),
        compiler_params=pltpu.CompilerParams(
            dimension_semantics=("parallel",),
            vmem_limit_bytes=32 * 1024 * 1024),
        cost_estimate=pl.CostEstimate(flops=int(flops),
                                      transcendentals=int(transcendentals),
                                      bytes_accessed=int(bytes_accessed)),
    )(*inputs)


# ----------------------------------------------------------------------------
# Pure-JAX reference (same math, standard XLA) for a correctness check.
# ----------------------------------------------------------------------------

def transformer_reference(x, params, *, heads, dim_head, mode="CAF"):
    depth = params["wqkv"].shape[0]
    H, dh = heads, dim_head
    hd = H * dh
    scale = dh ** (-0.5)

    def ln(y, g, b):
        mu = jnp.mean(y, axis=-1, keepdims=True)
        var = jnp.mean(jnp.square(y - mu), axis=-1, keepdims=True)
        return (y - mu) / jnp.sqrt(var + LN_EPS) * g + b

    B, N, D = x.shape
    last = []
    for l in range(depth):
        if mode == "CAF":
            last.append(x)
            if l > 1:
                x = (jnp.einsum('oi,bid->bod', params["sk_w0"][l - 2], x)
                     + jnp.einsum('oi,bid->bod', params["sk_w1"][l - 2], last[l - 2])
                     + params["sk_b"][l - 2][None])
        xn = ln(x, params["ln1_g"][l], params["ln1_b"][l])
        qkv = xn @ params["wqkv"][l]                                  # (B,N,3*H*dh)
        q, k, v = jnp.split(qkv, 3, axis=-1)

        def split_heads(t):
            return t.reshape(B, N, H, dh).transpose(0, 2, 1, 3)       # (B,H,N,dh)

        q, k, v = map(split_heads, (q, k, v))
        dots = jnp.einsum('bhid,bhjd->bhij', q, k) * scale
        attn = jax.nn.softmax(dots, axis=-1)
        oh = jnp.einsum('bhij,bhjd->bhid', attn, v)
        oh = oh.transpose(0, 2, 1, 3).reshape(B, N, hd)
        x = x + oh @ params["wo"][l] + params["bo"][l]
        xn2 = ln(x, params["ln2_g"][l], params["ln2_b"][l])
        hmid = xn2 @ params["w1"][l] + params["b1"][l]
        hmid = 0.5 * hmid * (1.0 + lax.erf(hmid / jnp.sqrt(2.0)))
        x = x + hmid @ params["w2"][l] + params["b2"][l]
    return x


# ----------------------------------------------------------------------------
# Deterministic parameter init (stacked along depth; fused QKV / merged-head out)
# ----------------------------------------------------------------------------

def init_params(key, dim, depth, heads, dim_head, mlp_head, num_channel, mode):
    N = num_channel + 1
    hd = heads * dim_head
    ks = jax.random.split(key, 12)

    def nrm(k, shape, s=0.05):
        return s * jax.random.normal(k, shape, jnp.float32)

    # torch layout mapping:
    #   to_qkv.weight.T (D, 3*H*dh)          -> wqkv (q | k | v blocks, head-major)
    #   to_out[0].weight.T (H*dh, D)         -> wo
    #   Conv2d weight (N, N, 1, 2)           -> sk_w0 = W[:,:,0,0], sk_w1 = W[:,:,0,1]
    params = dict(
        ln1_g=jnp.ones((depth, 1, dim), jnp.float32),
        ln1_b=jnp.zeros((depth, 1, dim), jnp.float32),
        wqkv=nrm(ks[0], (depth, dim, 3 * hd)),
        wo=nrm(ks[1], (depth, hd, dim)),
        bo=nrm(ks[2], (depth, 1, dim)),
        ln2_g=jnp.ones((depth, 1, dim), jnp.float32),
        ln2_b=jnp.zeros((depth, 1, dim), jnp.float32),
        w1=nrm(ks[3], (depth, dim, mlp_head)),
        b1=nrm(ks[4], (depth, 1, mlp_head)),
        w2=nrm(ks[5], (depth, mlp_head, dim)),
        b2=jnp.zeros((depth, 1, dim), jnp.float32),
    )
    if mode == "CAF" and depth > 2:
        params["sk_w0"] = nrm(ks[6], (depth - 2, N, N), 0.1)
        params["sk_w1"] = nrm(ks[7], (depth - 2, N, N), 0.1)
        params["sk_b"] = nrm(ks[8], (depth - 2, N, 1), 0.1)
    return params


# ----------------------------------------------------------------------------

if __name__ == "__main__":
    # small, module-consistent shapes
    B = 2
    dim = 32
    depth = 3
    heads = 4
    dim_head = 8
    mlp_head = 64
    num_channel = 4
    N = num_channel + 1            # tokens = num_channel + 1 (CLS-style token)
    mode = "CAF"

    key = jax.random.PRNGKey(0)
    key, kx, kp = jax.random.split(key, 3)
    x = jax.random.normal(kx, (B, N, dim), jnp.float32)
    params = init_params(kp, dim, depth, heads, dim_head, mlp_head, num_channel, mode)

    fwd = jax.jit(lambda xx, pp: transformer_forward(
        xx, pp, heads=heads, dim_head=dim_head, mode=mode))
    out = jax.block_until_ready(fwd(x, params))

    assert out.shape == (B, N, dim)
    assert bool(jnp.all(jnp.isfinite(out)))

    # correctness check vs. pure-JAX reference (loose tol: bf16 MXU inputs +
    # approximate EUP reciprocal in the kernel — intentional inference contract)
    ref = transformer_reference(x, params, heads=heads, dim_head=dim_head, mode=mode)
    err = float(jnp.max(jnp.abs(out - ref)))
    assert err < 3e-2, f"kernel/reference mismatch: max abs err = {err}"

    print("KERNEL_OK")
</pallas_src>

<mosaic_0001>
module attributes {stable_mosaic.version = 11 : i64} {
  func.func @kernel(%arg0: i32, %arg1: memref<2x5x32xf32, #tpu.memory_space<vmem>>, %arg2: memref<3x1x32xf32, #tpu.memory_space<vmem>>, %arg3: memref<3x1x32xf32, #tpu.memory_space<vmem>>, %arg4: memref<3x32x96xbf16, #tpu.memory_space<vmem>>, %arg5: memref<3x32x32xbf16, #tpu.memory_space<vmem>>, %arg6: memref<3x1x32xf32, #tpu.memory_space<vmem>>, %arg7: memref<3x1x32xf32, #tpu.memory_space<vmem>>, %arg8: memref<3x1x32xf32, #tpu.memory_space<vmem>>, %arg9: memref<3x32x64xbf16, #tpu.memory_space<vmem>>, %arg10: memref<3x1x64xf32, #tpu.memory_space<vmem>>, %arg11: memref<3x64x32xbf16, #tpu.memory_space<vmem>>, %arg12: memref<3x1x32xf32, #tpu.memory_space<vmem>>, %arg13: memref<1x5x5xbf16, #tpu.memory_space<vmem>>, %arg14: memref<1x5x5xbf16, #tpu.memory_space<vmem>>, %arg15: memref<1x5x1xf32, #tpu.memory_space<vmem>>, %arg16: memref<2x5x32xf32, #tpu.memory_space<vmem>>) attributes {dimension_semantics = [#tpu.dimension_semantics<parallel>], iteration_bounds = array<i64: 1>, scalar_prefetch = 0 : i64, scratch_operands = 0 : i64, tpu.core_type = #tpu.core_type<tc>, window_params = [{transform_indices = @transform_0, window_bounds = array<i64: 2, 5, 32>}, {pipeline_mode = #tpu.pipeline_mode<synchronous>, transform_indices = @transform_1, window_bounds = array<i64: 3, 1, 32>}, {pipeline_mode = #tpu.pipeline_mode<synchronous>, transform_indices = @transform_2, window_bounds = array<i64: 3, 1, 32>}, {pipeline_mode = #tpu.pipeline_mode<synchronous>, transform_indices = @transform_3, window_bounds = array<i64: 3, 32, 96>}, {pipeline_mode = #tpu.pipeline_mode<synchronous>, transform_indices = @transform_4, window_bounds = array<i64: 3, 32, 32>}, {pipeline_mode = #tpu.pipeline_mode<synchronous>, transform_indices = @transform_5, window_bounds = array<i64: 3, 1, 32>}, {pipeline_mode = #tpu.pipeline_mode<synchronous>, transform_indices = @transform_6, window_bounds = array<i64: 3, 1, 32>}, {pipeline_mode = #tpu.pipeline_mode<synchronous>, transform_indices = @transform_7, window_bounds = array<i64: 3, 1, 32>}, {pipeline_mode = #tpu.pipeline_mode<synchronous>, transform_indices = @transform_8, window_bounds = array<i64: 3, 32, 64>}, {pipeline_mode = #tpu.pipeline_mode<synchronous>, transform_indices = @transform_9, window_bounds = array<i64: 3, 1, 64>}, {pipeline_mode = #tpu.pipeline_mode<synchronous>, transform_indices = @transform_10, window_bounds = array<i64: 3, 64, 32>}, {pipeline_mode = #tpu.pipeline_mode<synchronous>, transform_indices = @transform_11, window_bounds = array<i64: 3, 1, 32>}, {pipeline_mode = #tpu.pipeline_mode<synchronous>, transform_indices = @transform_12, window_bounds = array<i64: 1, 5, 5>}, {pipeline_mode = #tpu.pipeline_mode<synchronous>, transform_indices = @transform_13, window_bounds = array<i64: 1, 5, 5>}, {pipeline_mode = #tpu.pipeline_mode<synchronous>, transform_indices = @transform_14, window_bounds = array<i64: 1, 5, 1>}, {transform_indices = @transform_15, window_bounds = array<i64: 2, 5, 32>}]} {
    %c0 = arith.constant 0 : index
    %c0_0 = arith.constant 0 : index
    %c0_1 = arith.constant 0 : index
    %0 = vector.load %arg1[%c0, %c0_0, %c0_1] : memref<2x5x32xf32, #tpu.memory_space<vmem>>, vector<2x5x32xf32>
    %c0_2 = arith.constant 0 : index
    %c0_3 = arith.constant 0 : index
    %c0_4 = arith.constant 0 : index
    %1 = vector.load %arg2[%c0_2, %c0_3, %c0_4] : memref<3x1x32xf32, #tpu.memory_space<vmem>>, vector<1x1x32xf32>
    %2 = vector.shape_cast %1 : vector<1x1x32xf32> to vector<1x32xf32>
    %c0_5 = arith.constant 0 : index
    %c0_6 = arith.constant 0 : index
    %c0_7 = arith.constant 0 : index
    %3 = vector.load %arg3[%c0_5, %c0_6, %c0_7] : memref<3x1x32xf32, #tpu.memory_space<vmem>>, vector<1x1x32xf32>
    %4 = vector.shape_cast %3 : vector<1x1x32xf32> to vector<1x32xf32>
    %cst = arith.constant dense<0.000000e+00> : vector<2x5xf32>
    %5 = vector.multi_reduction <add>, %0, %cst [2] : vector<2x5x32xf32> to vector<2x5xf32>
    %6 = vector.shape_cast %5 : vector<2x5xf32> to vector<2x5x1xf32>
    %cst_8 = arith.constant 3.200000e+01 : f32
    %7 = vector.broadcast %cst_8 : f32 to vector<2x5x1xf32>
    %8 = arith.divf %6, %7 : vector<2x5x1xf32>
    %9 = vector.broadcast %8 : vector<2x5x1xf32> to vector<2x5x32xf32>
    %10 = arith.subf %0, %9 : vector<2x5x32xf32>
    %11 = arith.mulf %10, %10 : vector<2x5x32xf32>
    %cst_9 = arith.constant dense<0.000000e+00> : vector<2x5xf32>
    %12 = vector.multi_reduction <add>, %11, %cst_9 [2] : vector<2x5x32xf32> to vector<2x5xf32>
    %13 = vector.shape_cast %12 : vector<2x5xf32> to vector<2x5x1xf32>
    %cst_10 = arith.constant 3.200000e+01 : f32
    %14 = vector.broadcast %cst_10 : f32 to vector<2x5x1xf32>
    %15 = arith.divf %13, %14 : vector<2x5x1xf32>
    %16 = vector.broadcast %8 : vector<2x5x1xf32> to vector<2x5x32xf32>
    %17 = arith.subf %0, %16 : vector<2x5x32xf32>
    %cst_11 = arith.constant 9.99999974E-6 : f32
    %18 = vector.broadcast %cst_11 : f32 to vector<2x5x1xf32>
    %19 = arith.addf %15, %18 : vector<2x5x1xf32>
    %20 = math.rsqrt %19 : vector<2x5x1xf32>
    %21 = vector.broadcast %20 : vector<2x5x1xf32> to vector<2x5x32xf32>
    %22 = arith.mulf %17, %21 : vector<2x5x32xf32>
    %23 = vector.shape_cast %2 : vector<1x32xf32> to vector<1x1x32xf32>
    %24 = vector.broadcast %23 : vector<1x1x32xf32> to vector<2x5x32xf32>
    %25 = arith.mulf %22, %24 : vector<2x5x32xf32>
    %26 = vector.shape_cast %4 : vector<1x32xf32> to vector<1x1x32xf32>
    %27 = vector.broadcast %26 : vector<1x1x32xf32> to vector<2x5x32xf32>
    %28 = arith.addf %25, %27 : vector<2x5x32xf32>
    %29 = arith.truncf %28 : vector<2x5x32xf32> to vector<2x5x32xbf16>
    %c0_12 = arith.constant 0 : index
    %c0_13 = arith.constant 0 : index
    %c0_14 = arith.constant 0 : index
    %30 = vector.load %arg4[%c0_12, %c0_13, %c0_14] : memref<3x32x96xbf16, #tpu.memory_space<vmem>>, vector<1x32x96xbf16>
    %31 = vector.shape_cast %30 : vector<1x32x96xbf16> to vector<32x96xbf16>
    %32 = vector.shape_cast %31 : vector<32x96xbf16> to vector<1x32x96xbf16>
    %33 = vector.broadcast %32 : vector<1x32x96xbf16> to vector<2x32x96xbf16>
    "tpu.trace_start"() <{level = 10 : i32, message = "bnd,bde->bne"}> : () -> ()
    %cst_15 = arith.constant dense<0.000000e+00> : vector<2x5x96xf32>
    %34 = tpu.matmul %29, %33, %cst_15 {dimension_numbers = #tpu.dot_dimension_numbers<[2], [1], [1], [2], [0, 0, 0, 1, 1, 2], [0], [0]>} : vector<2x5x32xbf16>, vector<2x32x96xbf16>, vector<2x5x96xf32> -> vector<2x5x96xf32>
    "tpu.trace_stop"() : () -> ()
    %35 = vector.extract_strided_slice %34 {offsets = [0, 0, 0], sizes = [2, 5, 8], strides = [1, 1, 1]} : vector<2x5x96xf32> to vector<2x5x8xf32>
    %36 = arith.truncf %35 : vector<2x5x8xf32> to vector<2x5x8xbf16>
    %37 = vector.extract_strided_slice %34 {offsets = [0, 0, 32], sizes = [2, 5, 8], strides = [1, 1, 1]} : vector<2x5x96xf32> to vector<2x5x8xf32>
    %38 = arith.truncf %37 : vector<2x5x8xf32> to vector<2x5x8xbf16>
    %39 = vector.extract_strided_slice %34 {offsets = [0, 0, 64], sizes = [2, 5, 8], strides = [1, 1, 1]} : vector<2x5x96xf32> to vector<2x5x8xf32>
    %40 = arith.truncf %39 : vector<2x5x8xf32> to vector<2x5x8xbf16>
    "tpu.trace_start"() <{level = 10 : i32, message = "bnd,bmd->bnm"}> : () -> ()
    %cst_16 = arith.constant dense<0.000000e+00> : vector<2x5x5xf32>
    %41 = tpu.matmul %36, %38, %cst_16 {dimension_numbers = #tpu.dot_dimension_numbers<[2], [2], [1], [1], [0, 0, 0, 1, 1, 1], [0], [0]>} : vector<2x5x8xbf16>, vector<2x5x8xbf16>, vector<2x5x5xf32> -> vector<2x5x5xf32>
    "tpu.trace_stop"() : () -> ()
    %cst_17 = arith.constant 0.353553385 : f32
    %42 = vector.broadcast %cst_17 : f32 to vector<2x5x5xf32>
    %43 = arith.mulf %41, %42 : vector<2x5x5xf32>
    %cst_18 = arith.constant dense<0xFF800000> : vector<2x5xf32>
    %44 = vector.multi_reduction <maximumf>, %43, %cst_18 [2] : vector<2x5x5xf32> to vector<2x5xf32>
    %45 = vector.shape_cast %44 : vector<2x5xf32> to vector<2x5x1xf32>
    %46 = vector.broadcast %45 : vector<2x5x1xf32> to vector<2x5x5xf32>
    %47 = arith.subf %43, %46 : vector<2x5x5xf32>
    %48 = math.exp %47 : vector<2x5x5xf32>
    %cst_19 = arith.constant dense<0.000000e+00> : vector<2x5xf32>
    %49 = vector.multi_reduction <add>, %48, %cst_19 [2] : vector<2x5x5xf32> to vector<2x5xf32>
    %50 = vector.shape_cast %49 : vector<2x5xf32> to vector<2x5x1xf32>
    %51 = tpu.reciprocal %50 {approx = true} : vector<2x5x1xf32> -> vector<2x5x1xf32>
    %52 = vector.broadcast %51 : vector<2x5x1xf32> to vector<2x5x5xf32>
    %53 = arith.mulf %48, %52 : vector<2x5x5xf32>
    %54 = arith.truncf %53 : vector<2x5x5xf32> to vector<2x5x5xbf16>
    "tpu.trace_start"() <{level = 10 : i32, message = "bnm,bmd->bnd"}> : () -> ()
    %cst_20 = arith.constant dense<0.000000e+00> : vector<2x5x8xf32>
    %55 = tpu.matmul %54, %40, %cst_20 {dimension_numbers = #tpu.dot_dimension_numbers<[2], [1], [1], [2], [0, 0, 0, 1, 1, 2], [0], [0]>} : vector<2x5x5xbf16>, vector<2x5x8xbf16>, vector<2x5x8xf32> -> vector<2x5x8xf32>
    "tpu.trace_stop"() : () -> ()
    %56 = vector.extract_strided_slice %34 {offsets = [0, 0, 8], sizes = [2, 5, 8], strides = [1, 1, 1]} : vector<2x5x96xf32> to vector<2x5x8xf32>
    %57 = arith.truncf %56 : vector<2x5x8xf32> to vector<2x5x8xbf16>
    %58 = vector.extract_strided_slice %34 {offsets = [0, 0, 40], sizes = [2, 5, 8], strides = [1, 1, 1]} : vector<2x5x96xf32> to vector<2x5x8xf32>
    %59 = arith.truncf %58 : vector<2x5x8xf32> to vector<2x5x8xbf16>
    %60 = vector.extract_strided_slice %34 {offsets = [0, 0, 72], sizes = [2, 5, 8], strides = [1, 1, 1]} : vector<2x5x96xf32> to vector<2x5x8xf32>
    %61 = arith.truncf %60 : vector<2x5x8xf32> to vector<2x5x8xbf16>
    "tpu.trace_start"() <{level = 10 : i32, message = "bnd,bmd->bnm"}> : () -> ()
    %cst_21 = arith.constant dense<0.000000e+00> : vector<2x5x5xf32>
    %62 = tpu.matmul %57, %59, %cst_21 {dimension_numbers = #tpu.dot_dimension_numbers<[2], [2], [1], [1], [0, 0, 0, 1, 1, 1], [0], [0]>} : vector<2x5x8xbf16>, vector<2x5x8xbf16>, vector<2x5x5xf32> -> vector<2x5x5xf32>
    "tpu.trace_stop"() : () -> ()
    %cst_22 = arith.constant 0.353553385 : f32
    %63 = vector.broadcast %cst_22 : f32 to vector<2x5x5xf32>
    %64 = arith.mulf %62, %63 : vector<2x5x5xf32>
    %cst_23 = arith.constant dense<0xFF800000> : vector<2x5xf32>
    %65 = vector.multi_reduction <maximumf>, %64, %cst_23 [2] : vector<2x5x5xf32> to vector<2x5xf32>
    %66 = vector.shape_cast %65 : vector<2x5xf32> to vector<2x5x1xf32>
    %67 = vector.broadcast %66 : vector<2x5x1xf32> to vector<2x5x5xf32>
    %68 = arith.subf %64, %67 : vector<2x5x5xf32>
    %69 = math.exp %68 : vector<2x5x5xf32>
    %cst_24 = arith.constant dense<0.000000e+00> : vector<2x5xf32>
    %70 = vector.multi_reduction <add>, %69, %cst_24 [2] : vector<2x5x5xf32> to vector<2x5xf32>
    %71 = vector.shape_cast %70 : vector<2x5xf32> to vector<2x5x1xf32>
    %72 = tpu.reciprocal %71 {approx = true} : vector<2x5x1xf32> -> vector<2x5x1xf32>
    %73 = vector.broadcast %72 : vector<2x5x1xf32> to vector<2x5x5xf32>
    %74 = arith.mulf %69, %73 : vector<2x5x5xf32>
    %75 = arith.truncf %74 : vector<2x5x5xf32> to vector<2x5x5xbf16>
    "tpu.trace_start"() <{level = 10 : i32, message = "bnm,bmd->bnd"}> : () -> ()
    %cst_25 = arith.constant dense<0.000000e+00> : vector<2x5x8xf32>
    %76 = tpu.matmul %75, %61, %cst_25 {dimension_numbers = #tpu.dot_dimension_numbers<[2], [1], [1], [2], [0, 0, 0, 1, 1, 2], [0], [0]>} : vector<2x5x5xbf16>, vector<2x5x8xbf16>, vector<2x5x8xf32> -> vector<2x5x8xf32>
    "tpu.trace_stop"() : () -> ()
    %77 = vector.extract_strided_slice %34 {offsets = [0, 0, 16], sizes = [2, 5, 8], strides = [1, 1, 1]} : vector<2x5x96xf32> to vector<2x5x8xf32>
    %78 = arith.truncf %77 : vector<2x5x8xf32> to vector<2x5x8xbf16>
    %79 = vector.extract_strided_slice %34 {offsets = [0, 0, 48], sizes = [2, 5, 8], strides = [1, 1, 1]} : vector<2x5x96xf32> to vector<2x5x8xf32>
    %80 = arith.truncf %79 : vector<2x5x8xf32> to vector<2x5x8xbf16>
    %81 = vector.extract_strided_slice %34 {offsets = [0, 0, 80], sizes = [2, 5, 8], strides = [1, 1, 1]} : vector<2x5x96xf32> to vector<2x5x8xf32>
    %82 = arith.truncf %81 : vector<2x5x8xf32> to vector<2x5x8xbf16>
    "tpu.trace_start"() <{level = 10 : i32, message = "bnd,bmd->bnm"}> : () -> ()
    %cst_26 = arith.constant dense<0.000000e+00> : vector<2x5x5xf32>
    %83 = tpu.matmul %78, %80, %cst_26 {dimension_numbers = #tpu.dot_dimension_numbers<[2], [2], [1], [1], [0, 0, 0, 1, 1, 1], [0], [0]>} : vector<2x5x8xbf16>, vector<2x5x8xbf16>, vector<2x5x5xf32> -> vector<2x5x5xf32>
    "tpu.trace_stop"() : () -> ()
    %cst_27 = arith.constant 0.353553385 : f32
    %84 = vector.broadcast %cst_27 : f32 to vector<2x5x5xf32>
    %85 = arith.mulf %83, %84 : vector<2x5x5xf32>
    %cst_28 = arith.constant dense<0xFF800000> : vector<2x5xf32>
    %86 = vector.multi_reduction <maximumf>, %85, %cst_28 [2] : vector<2x5x5xf32> to vector<2x5xf32>
    %87 = vector.shape_cast %86 : vector<2x5xf32> to vector<2x5x1xf32>
    %88 = vector.broadcast %87 : vector<2x5x1xf32> to vector<2x5x5xf32>
    %89 = arith.subf %85, %88 : vector<2x5x5xf32>
    %90 = math.exp %89 : vector<2x5x5xf32>
    %cst_29 = arith.constant dense<0.000000e+00> : vector<2x5xf32>
    %91 = vector.multi_reduction <add>, %90, %cst_29 [2] : vector<2x5x5xf32> to vector<2x5xf32>
    %92 = vector.shape_cast %91 : vector<2x5xf32> to vector<2x5x1xf32>
    %93 = tpu.reciprocal %92 {approx = true} : vector<2x5x1xf32> -> vector<2x5x1xf32>
    %94 = vector.broadcast %93 : vector<2x5x1xf32> to vector<2x5x5xf32>
    %95 = arith.mulf %90, %94 : vector<2x5x5xf32>
    %96 = arith.truncf %95 : vector<2x5x5xf32> to vector<2x5x5xbf16>
    "tpu.trace_start"() <{level = 10 : i32, message = "bnm,bmd->bnd"}> : () -> ()
    %cst_30 = arith.constant dense<0.000000e+00> : vector<2x5x8xf32>
    %97 = tpu.matmul %96, %82, %cst_30 {dimension_numbers = #tpu.dot_dimension_numbers<[2], [1], [1], [2], [0, 0, 0, 1, 1, 2], [0], [0]>} : vector<2x5x5xbf16>, vector<2x5x8xbf16>, vector<2x5x8xf32> -> vector<2x5x8xf32>
    "tpu.trace_stop"() : () -> ()
    %98 = vector.extract_strided_slice %34 {offsets = [0, 0, 24], sizes = [2, 5, 8], strides = [1, 1, 1]} : vector<2x5x96xf32> to vector<2x5x8xf32>
    %99 = arith.truncf %98 : vector<2x5x8xf32> to vector<2x5x8xbf16>
    %100 = vector.extract_strided_slice %34 {offsets = [0, 0, 56], sizes = [2, 5, 8], strides = [1, 1, 1]} : vector<2x5x96xf32> to vector<2x5x8xf32>
    %101 = arith.truncf %100 : vector<2x5x8xf32> to vector<2x5x8xbf16>
    %102 = vector.extract_strided_slice %34 {offsets = [0, 0, 88], sizes = [2, 5, 8], strides = [1, 1, 1]} : vector<2x5x96xf32> to vector<2x5x8xf32>
    %103 = arith.truncf %102 : vector<2x5x8xf32> to vector<2x5x8xbf16>
    "tpu.trace_start"() <{level = 10 : i32, message = "bnd,bmd->bnm"}> : () -> ()
    %cst_31 = arith.constant dense<0.000000e+00> : vector<2x5x5xf32>
    %104 = tpu.matmul %99, %101, %cst_31 {dimension_numbers = #tpu.dot_dimension_numbers<[2], [2], [1], [1], [0, 0, 0, 1, 1, 1], [0], [0]>} : vector<2x5x8xbf16>, vector<2x5x8xbf16>, vector<2x5x5xf32> -> vector<2x5x5xf32>
    "tpu.trace_stop"() : () -> ()
    %cst_32 = arith.constant 0.353553385 : f32
    %105 = vector.broadcast %cst_32 : f32 to vector<2x5x5xf32>
    %106 = arith.mulf %104, %105 : vector<2x5x5xf32>
    %cst_33 = arith.constant dense<0xFF800000> : vector<2x5xf32>
    %107 = vector.multi_reduction <maximumf>, %106, %cst_33 [2] : vector<2x5x5xf32> to vector<2x5xf32>
    %108 = vector.shape_cast %107 : vector<2x5xf32> to vector<2x5x1xf32>
    %109 = vector.broadcast %108 : vector<2x5x1xf32> to vector<2x5x5xf32>
    %110 = arith.subf %106, %109 : vector<2x5x5xf32>
    %111 = math.exp %110 : vector<2x5x5xf32>
    %cst_34 = arith.constant dense<0.000000e+00> : vector<2x5xf32>
    %112 = vector.multi_reduction <add>, %111, %cst_34 [2] : vector<2x5x5xf32> to vector<2x5xf32>
    %113 = vector.shape_cast %112 : vector<2x5xf32> to vector<2x5x1xf32>
    %114 = tpu.reciprocal %113 {approx = true} : vector<2x5x1xf32> -> vector<2x5x1xf32>
    %115 = vector.broadcast %114 : vector<2x5x1xf32> to vector<2x5x5xf32>
    %116 = arith.mulf %111, %115 : vector<2x5x5xf32>
    %117 = arith.truncf %116 : vector<2x5x5xf32> to vector<2x5x5xbf16>
    "tpu.trace_start"() <{level = 10 : i32, message = "bnm,bmd->bnd"}> : () -> ()
    %cst_35 = arith.constant dense<0.000000e+00> : vector<2x5x8xf32>
    %118 = tpu.matmul %117, %103, %cst_35 {dimension_numbers = #tpu.dot_dimension_numbers<[2], [1], [1], [2], [0, 0, 0, 1, 1, 2], [0], [0]>} : vector<2x5x5xbf16>, vector<2x5x8xbf16>, vector<2x5x8xf32> -> vector<2x5x8xf32>
    "tpu.trace_stop"() : () -> ()
    %119 = tpu.concatenate %55, %76, %97, %118 in 2 : vector<2x5x8xf32>, vector<2x5x8xf32>, vector<2x5x8xf32>, vector<2x5x8xf32> -> vector<2x5x32xf32>
    %120 = arith.truncf %119 : vector<2x5x32xf32> to vector<2x5x32xbf16>
    %c0_36 = arith.constant 0 : index
    %c0_37 = arith.constant 0 : index
    %c0_38 = arith.constant 0 : index
    %121 = vector.load %arg5[%c0_36, %c0_37, %c0_38] : memref<3x32x32xbf16, #tpu.memory_space<vmem>>, vector<1x32x32xbf16>
    %122 = vector.shape_cast %121 : vector<1x32x32xbf16> to vector<32x32xbf16>
    %123 = vector.shape_cast %122 : vector<32x32xbf16> to vector<1x32x32xbf16>
    %124 = vector.broadcast %123 : vector<1x32x32xbf16> to vector<2x32x32xbf16>
    "tpu.trace_start"() <{level = 10 : i32, message = "bnk,bkd->bnd"}> : () -> ()
    %cst_39 = arith.constant dense<0.000000e+00> : vector<2x5x32xf32>
    %125 = tpu.matmul %120, %124, %cst_39 {dimension_numbers = #tpu.dot_dimension_numbers<[2], [1], [1], [2], [0, 0, 0, 1, 1, 2], [0], [0]>} : vector<2x5x32xbf16>, vector<2x32x32xbf16>, vector<2x5x32xf32> -> vector<2x5x32xf32>
    "tpu.trace_stop"() : () -> ()
    %c0_40 = arith.constant 0 : index
    %c0_41 = arith.constant 0 : index
    %c0_42 = arith.constant 0 : index
    %126 = vector.load %arg6[%c0_40, %c0_41, %c0_42] : memref<3x1x32xf32, #tpu.memory_space<vmem>>, vector<1x1x32xf32>
    %127 = vector.shape_cast %126 : vector<1x1x32xf32> to vector<1x32xf32>
    %128 = vector.shape_cast %127 : vector<1x32xf32> to vector<1x1x32xf32>
    %129 = vector.broadcast %128 : vector<1x1x32xf32> to vector<2x5x32xf32>
    %130 = arith.addf %125, %129 : vector<2x5x32xf32>
    %131 = arith.addf %0, %130 : vector<2x5x32xf32>
    %c0_43 = arith.constant 0 : index
    %c0_44 = arith.constant 0 : index
    %c0_45 = arith.constant 0 : index
    %132 = vector.load %arg7[%c0_43, %c0_44, %c0_45] : memref<3x1x32xf32, #tpu.memory_space<vmem>>, vector<1x1x32xf32>
    %133 = vector.shape_cast %132 : vector<1x1x32xf32> to vector<1x32xf32>
    %c0_46 = arith.constant 0 : index
    %c0_47 = arith.constant 0 : index
    %c0_48 = arith.constant 0 : index
    %134 = vector.load %arg8[%c0_46, %c0_47, %c0_48] : memref<3x1x32xf32, #tpu.memory_space<vmem>>, vector<1x1x32xf32>
    %135 = vector.shape_cast %134 : vector<1x1x32xf32> to vector<1x32xf32>
    %cst_49 = arith.constant dense<0.000000e+00> : vector<2x5xf32>
    %136 = vector.multi_reduction <add>, %131, %cst_49 [2] : vector<2x5x32xf32> to vector<2x5xf32>
    %137 = vector.shape_cast %136 : vector<2x5xf32> to vector<2x5x1xf32>
    %cst_50 = arith.constant 3.200000e+01 : f32
    %138 = vector.broadcast %cst_50 : f32 to vector<2x5x1xf32>
    %139 = arith.divf %137, %138 : vector<2x5x1xf32>
    %140 = vector.broadcast %139 : vector<2x5x1xf32> to vector<2x5x32xf32>
    %141 = arith.subf %131, %140 : vector<2x5x32xf32>
    %142 = arith.mulf %141, %141 : vector<2x5x32xf32>
    %cst_51 = arith.constant dense<0.000000e+00> : vector<2x5xf32>
    %143 = vector.multi_reduction <add>, %142, %cst_51 [2] : vector<2x5x32xf32> to vector<2x5xf32>
    %144 = vector.shape_cast %143 : vector<2x5xf32> to vector<2x5x1xf32>
    %cst_52 = arith.constant 3.200000e+01 : f32
    %145 = vector.broadcast %cst_52 : f32 to vector<2x5x1xf32>
    %146 = arith.divf %144, %145 : vector<2x5x1xf32>
    %147 = vector.broadcast %139 : vector<2x5x1xf32> to vector<2x5x32xf32>
    %148 = arith.subf %131, %147 : vector<2x5x32xf32>
    %cst_53 = arith.constant 9.99999974E-6 : f32
    %149 = vector.broadcast %cst_53 : f32 to vector<2x5x1xf32>
    %150 = arith.addf %146, %149 : vector<2x5x1xf32>
    %151 = math.rsqrt %150 : vector<2x5x1xf32>
    %152 = vector.broadcast %151 : vector<2x5x1xf32> to vector<2x5x32xf32>
    %153 = arith.mulf %148, %152 : vector<2x5x32xf32>
    %154 = vector.shape_cast %133 : vector<1x32xf32> to vector<1x1x32xf32>
    %155 = vector.broadcast %154 : vector<1x1x32xf32> to vector<2x5x32xf32>
    %156 = arith.mulf %153, %155 : vector<2x5x32xf32>
    %157 = vector.shape_cast %135 : vector<1x32xf32> to vector<1x1x32xf32>
    %158 = vector.broadcast %157 : vector<1x1x32xf32> to vector<2x5x32xf32>
    %159 = arith.addf %156, %158 : vector<2x5x32xf32>
    %160 = arith.truncf %159 : vector<2x5x32xf32> to vector<2x5x32xbf16>
    %c0_54 = arith.constant 0 : index
    %c0_55 = arith.constant 0 : index
    %c0_56 = arith.constant 0 : index
    %161 = vector.load %arg9[%c0_54, %c0_55, %c0_56] : memref<3x32x64xbf16, #tpu.memory_space<vmem>>, vector<1x32x64xbf16>
    %162 = vector.shape_cast %161 : vector<1x32x64xbf16> to vector<32x64xbf16>
    %163 = vector.shape_cast %162 : vector<32x64xbf16> to vector<1x32x64xbf16>
    %164 = vector.broadcast %163 : vector<1x32x64xbf16> to vector<2x32x64xbf16>
    "tpu.trace_start"() <{level = 10 : i32, message = "bnd,bdk->bnk"}> : () -> ()
    %cst_57 = arith.constant dense<0.000000e+00> : vector<2x5x64xf32>
    %165 = tpu.matmul %160, %164, %cst_57 {dimension_numbers = #tpu.dot_dimension_numbers<[2], [1], [1], [2], [0, 0, 0, 1, 1, 2], [0], [0]>} : vector<2x5x32xbf16>, vector<2x32x64xbf16>, vector<2x5x64xf32> -> vector<2x5x64xf32>
    "tpu.trace_stop"() : () -> ()
    %c0_58 = arith.constant 0 : index
    %c0_59 = arith.constant 0 : index
    %c0_60 = arith.constant 0 : index
    %166 = vector.load %arg10[%c0_58, %c0_59, %c0_60] : memref<3x1x64xf32, #tpu.memory_space<vmem>>, vector<1x1x64xf32>
    %167 = vector.shape_cast %166 : vector<1x1x64xf32> to vector<1x64xf32>
    %168 = vector.shape_cast %167 : vector<1x64xf32> to vector<1x1x64xf32>
    %169 = vector.broadcast %168 : vector<1x1x64xf32> to vector<2x5x64xf32>
    %170 = arith.addf %165, %169 : vector<2x5x64xf32>
    %cst_61 = arith.constant 5.000000e-01 : f32
    %171 = vector.broadcast %cst_61 : f32 to vector<2x5x64xf32>
    %172 = arith.mulf %171, %170 : vector<2x5x64xf32>
    %cst_62 = arith.constant 0.707106769 : f32
    %173 = vector.broadcast %cst_62 : f32 to vector<2x5x64xf32>
    %174 = arith.mulf %170, %173 : vector<2x5x64xf32>
    %175 = math.erf %174 : vector<2x5x64xf32>
    %cst_63 = arith.constant 1.000000e+00 : f32
    %176 = vector.broadcast %cst_63 : f32 to vector<2x5x64xf32>
    %177 = arith.addf %176, %175 : vector<2x5x64xf32>
    %178 = arith.mulf %172, %177 : vector<2x5x64xf32>
    %179 = arith.truncf %178 : vector<2x5x64xf32> to vector<2x5x64xbf16>
    %c0_64 = arith.constant 0 : index
    %c0_65 = arith.constant 0 : index
    %c0_66 = arith.constant 0 : index
    %180 = vector.load %arg11[%c0_64, %c0_65, %c0_66] : memref<3x64x32xbf16, #tpu.memory_space<vmem>>, vector<1x64x32xbf16>
    %181 = vector.shape_cast %180 : vector<1x64x32xbf16> to vector<64x32xbf16>
    %182 = vector.shape_cast %181 : vector<64x32xbf16> to vector<1x64x32xbf16>
    %183 = vector.broadcast %182 : vector<1x64x32xbf16> to vector<2x64x32xbf16>
    "tpu.trace_start"() <{level = 10 : i32, message = "bnk,bkd->bnd"}> : () -> ()
    %cst_67 = arith.constant dense<0.000000e+00> : vector<2x5x32xf32>
    %184 = tpu.matmul %179, %183, %cst_67 {dimension_numbers = #tpu.dot_dimension_numbers<[2], [1], [1], [2], [0, 0, 0, 1, 1, 2], [0], [0]>} : vector<2x5x64xbf16>, vector<2x64x32xbf16>, vector<2x5x32xf32> -> vector<2x5x32xf32>
    "tpu.trace_stop"() : () -> ()
    %c0_68 = arith.constant 0 : index
    %c0_69 = arith.constant 0 : index
    %c0_70 = arith.constant 0 : index
    %185 = vector.load %arg12[%c0_68, %c0_69, %c0_70] : memref<3x1x32xf32, #tpu.memory_space<vmem>>, vector<1x1x32xf32>
    %186 = vector.shape_cast %185 : vector<1x1x32xf32> to vector<1x32xf32>
    %187 = vector.shape_cast %186 : vector<1x32xf32> to vector<1x1x32xf32>
    %188 = vector.broadcast %187 : vector<1x1x32xf32> to vector<2x5x32xf32>
    %189 = arith.addf %184, %188 : vector<2x5x32xf32>
    %190 = arith.addf %131, %189 : vector<2x5x32xf32>
    %c1 = arith.constant 1 : index
    %c0_71 = arith.constant 0 : index
    %c0_72 = arith.constant 0 : index
    %191 = vector.load %arg2[%c1, %c0_71, %c0_72] : memref<3x1x32xf32, #tpu.memory_space<vmem>>, vector<1x1x32xf32>
    %192 = vector.shape_cast %191 : vector<1x1x32xf32> to vector<1x32xf32>
    %c1_73 = arith.constant 1 : index
    %c0_74 = arith.constant 0 : index
    %c0_75 = arith.constant 0 : index
    %193 = vector.load %arg3[%c1_73, %c0_74, %c0_75] : memref<3x1x32xf32, #tpu.memory_space<vmem>>, vector<1x1x32xf32>
    %194 = vector.shape_cast %193 : vector<1x1x32xf32> to vector<1x32xf32>
    %cst_76 = arith.constant dense<0.000000e+00> : vector<2x5xf32>
    %195 = vector.multi_reduction <add>, %190, %cst_76 [2] : vector<2x5x32xf32> to vector<2x5xf32>
    %196 = vector.shape_cast %195 : vector<2x5xf32> to vector<2x5x1xf32>
    %cst_77 = arith.constant 3.200000e+01 : f32
    %197 = vector.broadcast %cst_77 : f32 to vector<2x5x1xf32>
    %198 = arith.divf %196, %197 : vector<2x5x1xf32>
    %199 = vector.broadcast %198 : vector<2x5x1xf32> to vector<2x5x32xf32>
    %200 = arith.subf %190, %199 : vector<2x5x32xf32>
    %201 = arith.mulf %200, %200 : vector<2x5x32xf32>
    %cst_78 = arith.constant dense<0.000000e+00> : vector<2x5xf32>
    %202 = vector.multi_reduction <add>, %201, %cst_78 [2] : vector<2x5x32xf32> to vector<2x5xf32>
    %203 = vector.shape_cast %202 : vector<2x5xf32> to vector<2x5x1xf32>
    %cst_79 = arith.constant 3.200000e+01 : f32
    %204 = vector.broadcast %cst_79 : f32 to vector<2x5x1xf32>
    %205 = arith.divf %203, %204 : vector<2x5x1xf32>
    %206 = vector.broadcast %198 : vector<2x5x1xf32> to vector<2x5x32xf32>
    %207 = arith.subf %190, %206 : vector<2x5x32xf32>
    %cst_80 = arith.constant 9.99999974E-6 : f32
    %208 = vector.broadcast %cst_80 : f32 to vector<2x5x1xf32>
    %209 = arith.addf %205, %208 : vector<2x5x1xf32>
    %210 = math.rsqrt %209 : vector<2x5x1xf32>
    %211 = vector.broadcast %210 : vector<2x5x1xf32> to vector<2x5x32xf32>
    %212 = arith.mulf %207, %211 : vector<2x5x32xf32>
    %213 = vector.shape_cast %192 : vector<1x32xf32> to vector<1x1x32xf32>
    %214 = vector.broadcast %213 : vector<1x1x32xf32> to vector<2x5x32xf32>
    %215 = arith.mulf %212, %214 : vector<2x5x32xf32>
    %216 = vector.shape_cast %194 : vector<1x32xf32> to vector<1x1x32xf32>
    %217 = vector.broadcast %216 : vector<1x1x32xf32> to vector<2x5x32xf32>
    %218 = arith.addf %215, %217 : vector<2x5x32xf32>
    %219 = arith.truncf %218 : vector<2x5x32xf32> to vector<2x5x32xbf16>
    %c1_81 = arith.constant 1 : index
    %c0_82 = arith.constant 0 : index
    %c0_83 = arith.constant 0 : index
    %220 = vector.load %arg4[%c1_81, %c0_82, %c0_83] : memref<3x32x96xbf16, #tpu.memory_space<vmem>>, vector<1x32x96xbf16>
    %221 = vector.shape_cast %220 : vector<1x32x96xbf16> to vector<32x96xbf16>
    %222 = vector.shape_cast %221 : vector<32x96xbf16> to vector<1x32x96xbf16>
    %223 = vector.broadcast %222 : vector<1x32x96xbf16> to vector<2x32x96xbf16>
    "tpu.trace_start"() <{level = 10 : i32, message = "bnd,bde->bne"}> : () -> ()
    %cst_84 = arith.constant dense<0.000000e+00> : vector<2x5x96xf32>
    %224 = tpu.matmul %219, %223, %cst_84 {dimension_numbers = #tpu.dot_dimension_numbers<[2], [1], [1], [2], [0, 0, 0, 1, 1, 2], [0], [0]>} : vector<2x5x32xbf16>, vector<2x32x96xbf16>, vector<2x5x96xf32> -> vector<2x5x96xf32>
    "tpu.trace_stop"() : () -> ()
    %225 = vector.extract_strided_slice %224 {offsets = [0, 0, 0], sizes = [2, 5, 8], strides = [1, 1, 1]} : vector<2x5x96xf32> to vector<2x5x8xf32>
    %226 = arith.truncf %225 : vector<2x5x8xf32> to vector<2x5x8xbf16>
    %227 = vector.extract_strided_slice %224 {offsets = [0, 0, 32], sizes = [2, 5, 8], strides = [1, 1, 1]} : vector<2x5x96xf32> to vector<2x5x8xf32>
    %228 = arith.truncf %227 : vector<2x5x8xf32> to vector<2x5x8xbf16>
    %229 = vector.extract_strided_slice %224 {offsets = [0, 0, 64], sizes = [2, 5, 8], strides = [1, 1, 1]} : vector<2x5x96xf32> to vector<2x5x8xf32>
    %230 = arith.truncf %229 : vector<2x5x8xf32> to vector<2x5x8xbf16>
    "tpu.trace_start"() <{level = 10 : i32, message = "bnd,bmd->bnm"}> : () -> ()
    %cst_85 = arith.constant dense<0.000000e+00> : vector<2x5x5xf32>
    %231 = tpu.matmul %226, %228, %cst_85 {dimension_numbers = #tpu.dot_dimension_numbers<[2], [2], [1], [1], [0, 0, 0, 1, 1, 1], [0], [0]>} : vector<2x5x8xbf16>, vector<2x5x8xbf16>, vector<2x5x5xf32> -> vector<2x5x5xf32>
    "tpu.trace_stop"() : () -> ()
    %cst_86 = arith.constant 0.353553385 : f32
    %232 = vector.broadcast %cst_86 : f32 to vector<2x5x5xf32>
    %233 = arith.mulf %231, %232 : vector<2x5x5xf32>
    %cst_87 = arith.constant dense<0xFF800000> : vector<2x5xf32>
    %234 = vector.multi_reduction <maximumf>, %233, %cst_87 [2] : vector<2x5x5xf32> to vector<2x5xf32>
    %235 = vector.shape_cast %234 : vector<2x5xf32> to vector<2x5x1xf32>
    %236 = vector.broadcast %235 : vector<2x5x1xf32> to vector<2x5x5xf32>
    %237 = arith.subf %233, %236 : vector<2x5x5xf32>
    %238 = math.exp %237 : vector<2x5x5xf32>
    %cst_88 = arith.constant dense<0.000000e+00> : vector<2x5xf32>
    %239 = vector.multi_reduction <add>, %238, %cst_88 [2] : vector<2x5x5xf32> to vector<2x5xf32>
    %240 = vector.shape_cast %239 : vector<2x5xf32> to vector<2x5x1xf32>
    %241 = tpu.reciprocal %240 {approx = true} : vector<2x5x1xf32> -> vector<2x5x1xf32>
    %242 = vector.broadcast %241 : vector<2x5x1xf32> to vector<2x5x5xf32>
    %243 = arith.mulf %238, %242 : vector<2x5x5xf32>
    %244 = arith.truncf %243 : vector<2x5x5xf32> to vector<2x5x5xbf16>
    "tpu.trace_start"() <{level = 10 : i32, message = "bnm,bmd->bnd"}> : () -> ()
    %cst_89 = arith.constant dense<0.000000e+00> : vector<2x5x8xf32>
    %245 = tpu.matmul %244, %230, %cst_89 {dimension_numbers = #tpu.dot_dimension_numbers<[2], [1], [1], [2], [0, 0, 0, 1, 1, 2], [0], [0]>} : vector<2x5x5xbf16>, vector<2x5x8xbf16>, vector<2x5x8xf32> -> vector<2x5x8xf32>
    "tpu.trace_stop"() : () -> ()
    %246 = vector.extract_strided_slice %224 {offsets = [0, 0, 8], sizes = [2, 5, 8], strides = [1, 1, 1]} : vector<2x5x96xf32> to vector<2x5x8xf32>
    %247 = arith.truncf %246 : vector<2x5x8xf32> to vector<2x5x8xbf16>
    %248 = vector.extract_strided_slice %224 {offsets = [0, 0, 40], sizes = [2, 5, 8], strides = [1, 1, 1]} : vector<2x5x96xf32> to vector<2x5x8xf32>
    %249 = arith.truncf %248 : vector<2x5x8xf32> to vector<2x5x8xbf16>
    %250 = vector.extract_strided_slice %224 {offsets = [0, 0, 72], sizes = [2, 5, 8], strides = [1, 1, 1]} : vector<2x5x96xf32> to vector<2x5x8xf32>
    %251 = arith.truncf %250 : vector<2x5x8xf32> to vector<2x5x8xbf16>
    "tpu.trace_start"() <{level = 10 : i32, message = "bnd,bmd->bnm"}> : () -> ()
    %cst_90 = arith.constant dense<0.000000e+00> : vector<2x5x5xf32>
    %252 = tpu.matmul %247, %249, %cst_90 {dimension_numbers = #tpu.dot_dimension_numbers<[2], [2], [1], [1], [0, 0, 0, 1, 1, 1], [0], [0]>} : vector<2x5x8xbf16>, vector<2x5x8xbf16>, vector<2x5x5xf32> -> vector<2x5x5xf32>
    "tpu.trace_stop"() : () -> ()
    %cst_91 = arith.constant 0.353553385 : f32
    %253 = vector.broadcast %cst_91 : f32 to vector<2x5x5xf32>
    %254 = arith.mulf %252, %253 : vector<2x5x5xf32>
    %cst_92 = arith.constant dense<0xFF800000> : vector<2x5xf32>
    %255 = vector.multi_reduction <maximumf>, %254, %cst_92 [2] : vector<2x5x5xf32> to vector<2x5xf32>
    %256 = vector.shape_cast %255 : vector<2x5xf32> to vector<2x5x1xf32>
    %257 = vector.broadcast %256 : vector<2x5x1xf32> to vector<2x5x5xf32>
    %258 = arith.subf %254, %257 : vector<2x5x5xf32>
    %259 = math.exp %258 : vector<2x5x5xf32>
    %cst_93 = arith.constant dense<0.000000e+00> : vector<2x5xf32>
    %260 = vector.multi_reduction <add>, %259, %cst_93 [2] : vector<2x5x5xf32> to vector<2x5xf32>
    %261 = vector.shape_cast %260 : vector<2x5xf32> to vector<2x5x1xf32>
    %262 = tpu.reciprocal %261 {approx = true} : vector<2x5x1xf32> -> vector<2x5x1xf32>
    %263 = vector.broadcast %262 : vector<2x5x1xf32> to vector<2x5x5xf32>
    %264 = arith.mulf %259, %263 : vector<2x5x5xf32>
    %265 = arith.truncf %264 : vector<2x5x5xf32> to vector<2x5x5xbf16>
    "tpu.trace_start"() <{level = 10 : i32, message = "bnm,bmd->bnd"}> : () -> ()
    %cst_94 = arith.constant dense<0.000000e+00> : vector<2x5x8xf32>
    %266 = tpu.matmul %265, %251, %cst_94 {dimension_numbers = #tpu.dot_dimension_numbers<[2], [1], [1], [2], [0, 0, 0, 1, 1, 2], [0], [0]>} : vector<2x5x5xbf16>, vector<2x5x8xbf16>, vector<2x5x8xf32> -> vector<2x5x8xf32>
    "tpu.trace_stop"() : () -> ()
    %267 = vector.extract_strided_slice %224 {offsets = [0, 0, 16], sizes = [2, 5, 8], strides = [1, 1, 1]} : vector<2x5x96xf32> to vector<2x5x8xf32>
    %268 = arith.truncf %267 : vector<2x5x8xf32> to vector<2x5x8xbf16>
    %269 = vector.extract_strided_slice %224 {offsets = [0, 0, 48], sizes = [2, 5, 8], strides = [1, 1, 1]} : vector<2x5x96xf32> to vector<2x5x8xf32>
    %270 = arith.truncf %269 : vector<2x5x8xf32> to vector<2x5x8xbf16>
    %271 = vector.extract_strided_slice %224 {offsets = [0, 0, 80], sizes = [2, 5, 8], strides = [1, 1, 1]} : vector<2x5x96xf32> to vector<2x5x8xf32>
    %272 = arith.truncf %271 : vector<2x5x8xf32> to vector<2x5x8xbf16>
    "tpu.trace_start"() <{level = 10 : i32, message = "bnd,bmd->bnm"}> : () -> ()
    %cst_95 = arith.constant dense<0.000000e+00> : vector<2x5x5xf32>
    %273 = tpu.matmul %268, %270, %cst_95 {dimension_numbers = #tpu.dot_dimension_numbers<[2], [2], [1], [1], [0, 0, 0, 1, 1, 1], [0], [0]>} : vector<2x5x8xbf16>, vector<2x5x8xbf16>, vector<2x5x5xf32> -> vector<2x5x5xf32>
    "tpu.trace_stop"() : () -> ()
    %cst_96 = arith.constant 0.353553385 : f32
    %274 = vector.broadcast %cst_96 : f32 to vector<2x5x5xf32>
    %275 = arith.mulf %273, %274 : vector<2x5x5xf32>
    %cst_97 = arith.constant dense<0xFF800000> : vector<2x5xf32>
    %276 = vector.multi_reduction <maximumf>, %275, %cst_97 [2] : vector<2x5x5xf32> to vector<2x5xf32>
    %277 = vector.shape_cast %276 : vector<2x5xf32> to vector<2x5x1xf32>
    %278 = vector.broadcast %277 : vector<2x5x1xf32> to vector<2x5x5xf32>
    %279 = arith.subf %275, %278 : vector<2x5x5xf32>
    %280 = math.exp %279 : vector<2x5x5xf32>
    %cst_98 = arith.constant dense<0.000000e+00> : vector<2x5xf32>
    %281 = vector.multi_reduction <add>, %280, %cst_98 [2] : vector<2x5x5xf32> to vector<2x5xf32>
    %282 = vector.shape_cast %281 : vector<2x5xf32> to vector<2x5x1xf32>
    %283 = tpu.reciprocal %282 {approx = true} : vector<2x5x1xf32> -> vector<2x5x1xf32>
    %284 = vector.broadcast %283 : vector<2x5x1xf32> to vector<2x5x5xf32>
    %285 = arith.mulf %280, %284 : vector<2x5x5xf32>
    %286 = arith.truncf %285 : vector<2x5x5xf32> to vector<2x5x5xbf16>
    "tpu.trace_start"() <{level = 10 : i32, message = "bnm,bmd->bnd"}> : () -> ()
    %cst_99 = arith.constant dense<0.000000e+00> : vector<2x5x8xf32>
    %287 = tpu.matmul %286, %272, %cst_99 {dimension_numbers = #tpu.dot_dimension_numbers<[2], [1], [1], [2], [0, 0, 0, 1, 1, 2], [0], [0]>} : vector<2x5x5xbf16>, vector<2x5x8xbf16>, vector<2x5x8xf32> -> vector<2x5x8xf32>
    "tpu.trace_stop"() : () -> ()
    %288 = vector.extract_strided_slice %224 {offsets = [0, 0, 24], sizes = [2, 5, 8], strides = [1, 1, 1]} : vector<2x5x96xf32> to vector<2x5x8xf32>
    %289 = arith.truncf %288 : vector<2x5x8xf32> to vector<2x5x8xbf16>
    %290 = vector.extract_strided_slice %224 {offsets = [0, 0, 56], sizes = [2, 5, 8], strides = [1, 1, 1]} : vector<2x5x96xf32> to vector<2x5x8xf32>
    %291 = arith.truncf %290 : vector<2x5x8xf32> to vector<2x5x8xbf16>
    %292 = vector.extract_strided_slice %224 {offsets = [0, 0, 88], sizes = [2, 5, 8], strides = [1, 1, 1]} : vector<2x5x96xf32> to vector<2x5x8xf32>
    %293 = arith.truncf %292 : vector<2x5x8xf32> to vector<2x5x8xbf16>
    "tpu.trace_start"() <{level = 10 : i32, message = "bnd,bmd->bnm"}> : () -> ()
    %cst_100 = arith.constant dense<0.000000e+00> : vector<2x5x5xf32>
    %294 = tpu.matmul %289, %291, %cst_100 {dimension_numbers = #tpu.dot_dimension_numbers<[2], [2], [1], [1], [0, 0, 0, 1, 1, 1], [0], [0]>} : vector<2x5x8xbf16>, vector<2x5x8xbf16>, vector<2x5x5xf32> -> vector<2x5x5xf32>
    "tpu.trace_stop"() : () -> ()
    %cst_101 = arith.constant 0.353553385 : f32
    %295 = vector.broadcast %cst_101 : f32 to vector<2x5x5xf32>
    %296 = arith.mulf %294, %295 : vector<2x5x5xf32>
    %cst_102 = arith.constant dense<0xFF800000> : vector<2x5xf32>
    %297 = vector.multi_reduction <maximumf>, %296, %cst_102 [2] : vector<2x5x5xf32> to vector<2x5xf32>
    %298 = vector.shape_cast %297 : vector<2x5xf32> to vector<2x5x1xf32>
    %299 = vector.broadcast %298 : vector<2x5x1xf32> to vector<2x5x5xf32>
    %300 = arith.subf %296, %299 : vector<2x5x5xf32>
    %301 = math.exp %300 : vector<2x5x5xf32>
    %cst_103 = arith.constant dense<0.000000e+00> : vector<2x5xf32>
    %302 = vector.multi_reduction <add>, %301, %cst_103 [2] : vector<2x5x5xf32> to vector<2x5xf32>
    %303 = vector.shape_cast %302 : vector<2x5xf32> to vector<2x5x1xf32>
    %304 = tpu.reciprocal %303 {approx = true} : vector<2x5x1xf32> -> vector<2x5x1xf32>
    %305 = vector.broadcast %304 : vector<2x5x1xf32> to vector<2x5x5xf32>
    %306 = arith.mulf %301, %305 : vector<2x5x5xf32>
    %307 = arith.truncf %306 : vector<2x5x5xf32> to vector<2x5x5xbf16>
    "tpu.trace_start"() <{level = 10 : i32, message = "bnm,bmd->bnd"}> : () -> ()
    %cst_104 = arith.constant dense<0.000000e+00> : vector<2x5x8xf32>
    %308 = tpu.matmul %307, %293, %cst_104 {dimension_numbers = #tpu.dot_dimension_numbers<[2], [1], [1], [2], [0, 0, 0, 1, 1, 2], [0], [0]>} : vector<2x5x5xbf16>, vector<2x5x8xbf16>, vector<2x5x8xf32> -> vector<2x5x8xf32>
    "tpu.trace_stop"() : () -> ()
    %309 = tpu.concatenate %245, %266, %287, %308 in 2 : vector<2x5x8xf32>, vector<2x5x8xf32>, vector<2x5x8xf32>, vector<2x5x8xf32> -> vector<2x5x32xf32>
    %310 = arith.truncf %309 : vector<2x5x32xf32> to vector<2x5x32xbf16>
    %c1_105 = arith.constant 1 : index
    %c0_106 = arith.constant 0 : index
    %c0_107 = arith.constant 0 : index
    %311 = vector.load %arg5[%c1_105, %c0_106, %c0_107] : memref<3x32x32xbf16, #tpu.memory_space<vmem>>, vector<1x32x32xbf16>
    %312 = vector.shape_cast %311 : vector<1x32x32xbf16> to vector<32x32xbf16>
    %313 = vector.shape_cast %312 : vector<32x32xbf16> to vector<1x32x32xbf16>
    %314 = vector.broadcast %313 : vector<1x32x32xbf16> to vector<2x32x32xbf16>
    "tpu.trace_start"() <{level = 10 : i32, message = "bnk,bkd->bnd"}> : () -> ()
    %cst_108 = arith.constant dense<0.000000e+00> : vector<2x5x32xf32>
    %315 = tpu.matmul %310, %314, %cst_108 {dimension_numbers = #tpu.dot_dimension_numbers<[2], [1], [1], [2], [0, 0, 0, 1, 1, 2], [0], [0]>} : vector<2x5x32xbf16>, vector<2x32x32xbf16>, vector<2x5x32xf32> -> vector<2x5x32xf32>
    "tpu.trace_stop"() : () -> ()
    %c1_109 = arith.constant 1 : index
    %c0_110 = arith.constant 0 : index
    %c0_111 = arith.constant 0 : index
    %316 = vector.load %arg6[%c1_109, %c0_110, %c0_111] : memref<3x1x32xf32, #tpu.memory_space<vmem>>, vector<1x1x32xf32>
    %317 = vector.shape_cast %316 : vector<1x1x32xf32> to vector<1x32xf32>
    %318 = vector.shape_cast %317 : vector<1x32xf32> to vector<1x1x32xf32>
    %319 = vector.broadcast %318 : vector<1x1x32xf32> to vector<2x5x32xf32>
    %320 = arith.addf %315, %319 : vector<2x5x32xf32>
    %321 = arith.addf %190, %320 : vector<2x5x32xf32>
    %c1_112 = arith.constant 1 : index
    %c0_113 = arith.constant 0 : index
    %c0_114 = arith.constant 0 : index
    %322 = vector.load %arg7[%c1_112, %c0_113, %c0_114] : memref<3x1x32xf32, #tpu.memory_space<vmem>>, vector<1x1x32xf32>
    %323 = vector.shape_cast %322 : vector<1x1x32xf32> to vector<1x32xf32>
    %c1_115 = arith.constant 1 : index
    %c0_116 = arith.constant 0 : index
    %c0_117 = arith.constant 0 : index
    %324 = vector.load %arg8[%c1_115, %c0_116, %c0_117] : memref<3x1x32xf32, #tpu.memory_space<vmem>>, vector<1x1x32xf32>
    %325 = vector.shape_cast %324 : vector<1x1x32xf32> to vector<1x32xf32>
    %cst_118 = arith.constant dense<0.000000e+00> : vector<2x5xf32>
    %326 = vector.multi_reduction <add>, %321, %cst_118 [2] : vector<2x5x32xf32> to vector<2x5xf32>
    %327 = vector.shape_cast %326 : vector<2x5xf32> to vector<2x5x1xf32>
    %cst_119 = arith.constant 3.200000e+01 : f32
    %328 = vector.broadcast %cst_119 : f32 to vector<2x5x1xf32>
    %329 = arith.divf %327, %328 : vector<2x5x1xf32>
    %330 = vector.broadcast %329 : vector<2x5x1xf32> to vector<2x5x32xf32>
    %331 = arith.subf %321, %330 : vector<2x5x32xf32>
    %332 = arith.mulf %331, %331 : vector<2x5x32xf32>
    %cst_120 = arith.constant dense<0.000000e+00> : vector<2x5xf32>
    %333 = vector.multi_reduction <add>, %332, %cst_120 [2] : vector<2x5x32xf32> to vector<2x5xf32>
    %334 = vector.shape_cast %333 : vector<2x5xf32> to vector<2x5x1xf32>
    %cst_121 = arith.constant 3.200000e+01 : f32
    %335 = vector.broadcast %cst_121 : f32 to vector<2x5x1xf32>
    %336 = arith.divf %334, %335 : vector<2x5x1xf32>
    %337 = vector.broadcast %329 : vector<2x5x1xf32> to vector<2x5x32xf32>
    %338 = arith.subf %321, %337 : vector<2x5x32xf32>
    %cst_122 = arith.constant 9.99999974E-6 : f32
    %339 = vector.broadcast %cst_122 : f32 to vector<2x5x1xf32>
    %340 = arith.addf %336, %339 : vector<2x5x1xf32>
    %341 = math.rsqrt %340 : vector<2x5x1xf32>
    %342 = vector.broadcast %341 : vector<2x5x1xf32> to vector<2x5x32xf32>
    %343 = arith.mulf %338, %342 : vector<2x5x32xf32>
    %344 = vector.shape_cast %323 : vector<1x32xf32> to vector<1x1x32xf32>
    %345 = vector.broadcast %344 : vector<1x1x32xf32> to vector<2x5x32xf32>
    %346 = arith.mulf %343, %345 : vector<2x5x32xf32>
    %347 = vector.shape_cast %325 : vector<1x32xf32> to vector<1x1x32xf32>
    %348 = vector.broadcast %347 : vector<1x1x32xf32> to vector<2x5x32xf32>
    %349 = arith.addf %346, %348 : vector<2x5x32xf32>
    %350 = arith.truncf %349 : vector<2x5x32xf32> to vector<2x5x32xbf16>
    %c1_123 = arith.constant 1 : index
    %c0_124 = arith.constant 0 : index
    %c0_125 = arith.constant 0 : index
    %351 = vector.load %arg9[%c1_123, %c0_124, %c0_125] : memref<3x32x64xbf16, #tpu.memory_space<vmem>>, vector<1x32x64xbf16>
    %352 = vector.shape_cast %351 : vector<1x32x64xbf16> to vector<32x64xbf16>
    %353 = vector.shape_cast %352 : vector<32x64xbf16> to vector<1x32x64xbf16>
    %354 = vector.broadcast %353 : vector<1x32x64xbf16> to vector<2x32x64xbf16>
    "tpu.trace_start"() <{level = 10 : i32, message = "bnd,bdk->bnk"}> : () -> ()
    %cst_126 = arith.constant dense<0.000000e+00> : vector<2x5x64xf32>
    %355 = tpu.matmul %350, %354, %cst_126 {dimension_numbers = #tpu.dot_dimension_numbers<[2], [1], [1], [2], [0, 0, 0, 1, 1, 2], [0], [0]>} : vector<2x5x32xbf16>, vector<2x32x64xbf16>, vector<2x5x64xf32> -> vector<2x5x64xf32>
    "tpu.trace_stop"() : () -> ()
    %c1_127 = arith.constant 1 : index
    %c0_128 = arith.constant 0 : index
    %c0_129 = arith.constant 0 : index
    %356 = vector.load %arg10[%c1_127, %c0_128, %c0_129] : memref<3x1x64xf32, #tpu.memory_space<vmem>>, vector<1x1x64xf32>
    %357 = vector.shape_cast %356 : vector<1x1x64xf32> to vector<1x64xf32>
    %358 = vector.shape_cast %357 : vector<1x64xf32> to vector<1x1x64xf32>
    %359 = vector.broadcast %358 : vector<1x1x64xf32> to vector<2x5x64xf32>
    %360 = arith.addf %355, %359 : vector<2x5x64xf32>
    %cst_130 = arith.constant 5.000000e-01 : f32
    %361 = vector.broadcast %cst_130 : f32 to vector<2x5x64xf32>
    %362 = arith.mulf %361, %360 : vector<2x5x64xf32>
    %cst_131 = arith.constant 0.707106769 : f32
    %363 = vector.broadcast %cst_131 : f32 to vector<2x5x64xf32>
    %364 = arith.mulf %360, %363 : vector<2x5x64xf32>
    %365 = math.erf %364 : vector<2x5x64xf32>
    %cst_132 = arith.constant 1.000000e+00 : f32
    %366 = vector.broadcast %cst_132 : f32 to vector<2x5x64xf32>
    %367 = arith.addf %366, %365 : vector<2x5x64xf32>
    %368 = arith.mulf %362, %367 : vector<2x5x64xf32>
    %369 = arith.truncf %368 : vector<2x5x64xf32> to vector<2x5x64xbf16>
    %c1_133 = arith.constant 1 : index
    %c0_134 = arith.constant 0 : index
    %c0_135 = arith.constant 0 : index
    %370 = vector.load %arg11[%c1_133, %c0_134, %c0_135] : memref<3x64x32xbf16, #tpu.memory_space<vmem>>, vector<1x64x32xbf16>
    %371 = vector.shape_cast %370 : vector<1x64x32xbf16> to vector<64x32xbf16>
    %372 = vector.shape_cast %371 : vector<64x32xbf16> to vector<1x64x32xbf16>
    %373 = vector.broadcast %372 : vector<1x64x32xbf16> to vector<2x64x32xbf16>
    "tpu.trace_start"() <{level = 10 : i32, message = "bnk,bkd->bnd"}> : () -> ()
    %cst_136 = arith.constant dense<0.000000e+00> : vector<2x5x32xf32>
    %374 = tpu.matmul %369, %373, %cst_136 {dimension_numbers = #tpu.dot_dimension_numbers<[2], [1], [1], [2], [0, 0, 0, 1, 1, 2], [0], [0]>} : vector<2x5x64xbf16>, vector<2x64x32xbf16>, vector<2x5x32xf32> -> vector<2x5x32xf32>
    "tpu.trace_stop"() : () -> ()
    %c1_137 = arith.constant 1 : index
    %c0_138 = arith.constant 0 : index
    %c0_139 = arith.constant 0 : index
    %375 = vector.load %arg12[%c1_137, %c0_138, %c0_139] : memref<3x1x32xf32, #tpu.memory_space<vmem>>, vector<1x1x32xf32>
    %376 = vector.shape_cast %375 : vector<1x1x32xf32> to vector<1x32xf32>
    %377 = vector.shape_cast %376 : vector<1x32xf32> to vector<1x1x32xf32>
    %378 = vector.broadcast %377 : vector<1x1x32xf32> to vector<2x5x32xf32>
    %379 = arith.addf %374, %378 : vector<2x5x32xf32>
    %380 = arith.addf %321, %379 : vector<2x5x32xf32>
    %381 = arith.truncf %380 : vector<2x5x32xf32> to vector<2x5x32xbf16>
    %382 = arith.truncf %0 : vector<2x5x32xf32> to vector<2x5x32xbf16>
    %c0_140 = arith.constant 0 : index
    %c0_141 = arith.constant 0 : index
    %c0_142 = arith.constant 0 : index
    %383 = vector.load %arg13[%c0_140, %c0_141, %c0_142] : memref<1x5x5xbf16, #tpu.memory_space<vmem>>, vector<1x5x5xbf16>
    %384 = vector.shape_cast %383 : vector<1x5x5xbf16> to vector<5x5xbf16>
    %385 = vector.shape_cast %384 : vector<5x5xbf16> to vector<1x5x5xbf16>
    %386 = vector.broadcast %385 : vector<1x5x5xbf16> to vector<2x5x5xbf16>
    "tpu.trace_start"() <{level = 10 : i32, message = "boi,bid->bod"}> : () -> ()
    %cst_143 = arith.constant dense<0.000000e+00> : vector<2x5x32xf32>
    %387 = tpu.matmul %386, %381, %cst_143 {dimension_numbers = #tpu.dot_dimension_numbers<[2], [1], [1], [2], [0, 0, 0, 1, 1, 2], [0], [0]>} : vector<2x5x5xbf16>, vector<2x5x32xbf16>, vector<2x5x32xf32> -> vector<2x5x32xf32>
    "tpu.trace_stop"() : () -> ()
    %c0_144 = arith.constant 0 : index
    %c0_145 = arith.constant 0 : index
    %c0_146 = arith.constant 0 : index
    %388 = vector.load %arg14[%c0_144, %c0_145, %c0_146] : memref<1x5x5xbf16, #tpu.memory_space<vmem>>, vector<1x5x5xbf16>
    %389 = vector.shape_cast %388 : vector<1x5x5xbf16> to vector<5x5xbf16>
    %390 = vector.shape_cast %389 : vector<5x5xbf16> to vector<1x5x5xbf16>
    %391 = vector.broadcast %390 : vector<1x5x5xbf16> to vector<2x5x5xbf16>
    "tpu.trace_start"() <{level = 10 : i32, message = "boi,bid->bod"}> : () -> ()
    %cst_147 = arith.constant dense<0.000000e+00> : vector<2x5x32xf32>
    %392 = tpu.matmul %391, %382, %cst_147 {dimension_numbers = #tpu.dot_dimension_numbers<[2], [1], [1], [2], [0, 0, 0, 1, 1, 2], [0], [0]>} : vector<2x5x5xbf16>, vector<2x5x32xbf16>, vector<2x5x32xf32> -> vector<2x5x32xf32>
    "tpu.trace_stop"() : () -> ()
    %393 = arith.addf %387, %392 : vector<2x5x32xf32>
    %c0_148 = arith.constant 0 : index
    %c0_149 = arith.constant 0 : index
    %c0_150 = arith.constant 0 : index
    %394 = vector.load %arg15[%c0_148, %c0_149, %c0_150] : memref<1x5x1xf32, #tpu.memory_space<vmem>>, vector<1x5x1xf32>
    %395 = vector.shape_cast %394 : vector<1x5x1xf32> to vector<5x1xf32>
    %396 = vector.shape_cast %395 : vector<5x1xf32> to vector<1x5x1xf32>
    %397 = vector.broadcast %396 : vector<1x5x1xf32> to vector<2x5x32xf32>
    %398 = arith.addf %393, %397 : vector<2x5x32xf32>
    %c2 = arith.constant 2 : index
    %c0_151 = arith.constant 0 : index
    %c0_152 = arith.constant 0 : index
    %399 = vector.load %arg2[%c2, %c0_151, %c0_152] : memref<3x1x32xf32, #tpu.memory_space<vmem>>, vector<1x1x32xf32>
    %400 = vector.shape_cast %399 : vector<1x1x32xf32> to vector<1x32xf32>
    %c2_153 = arith.constant 2 : index
    %c0_154 = arith.constant 0 : index
    %c0_155 = arith.constant 0 : index
    %401 = vector.load %arg3[%c2_153, %c0_154, %c0_155] : memref<3x1x32xf32, #tpu.memory_space<vmem>>, vector<1x1x32xf32>
    %402 = vector.shape_cast %401 : vector<1x1x32xf32> to vector<1x32xf32>
    %cst_156 = arith.constant dense<0.000000e+00> : vector<2x5xf32>
    %403 = vector.multi_reduction <add>, %398, %cst_156 [2] : vector<2x5x32xf32> to vector<2x5xf32>
    %404 = vector.shape_cast %403 : vector<2x5xf32> to vector<2x5x1xf32>
    %cst_157 = arith.constant 3.200000e+01 : f32
    %405 = vector.broadcast %cst_157 : f32 to vector<2x5x1xf32>
    %406 = arith.divf %404, %405 : vector<2x5x1xf32>
    %407 = vector.broadcast %406 : vector<2x5x1xf32> to vector<2x5x32xf32>
    %408 = arith.subf %398, %407 : vector<2x5x32xf32>
    %409 = arith.mulf %408, %408 : vector<2x5x32xf32>
    %cst_158 = arith.constant dense<0.000000e+00> : vector<2x5xf32>
    %410 = vector.multi_reduction <add>, %409, %cst_158 [2] : vector<2x5x32xf32> to vector<2x5xf32>
    %411 = vector.shape_cast %410 : vector<2x5xf32> to vector<2x5x1xf32>
    %cst_159 = arith.constant 3.200000e+01 : f32
    %412 = vector.broadcast %cst_159 : f32 to vector<2x5x1xf32>
    %413 = arith.divf %411, %412 : vector<2x5x1xf32>
    %414 = vector.broadcast %406 : vector<2x5x1xf32> to vector<2x5x32xf32>
    %415 = arith.subf %398, %414 : vector<2x5x32xf32>
    %cst_160 = arith.constant 9.99999974E-6 : f32
    %416 = vector.broadcast %cst_160 : f32 to vector<2x5x1xf32>
    %417 = arith.addf %413, %416 : vector<2x5x1xf32>
    %418 = math.rsqrt %417 : vector<2x5x1xf32>
    %419 = vector.broadcast %418 : vector<2x5x1xf32> to vector<2x5x32xf32>
    %420 = arith.mulf %415, %419 : vector<2x5x32xf32>
    %421 = vector.shape_cast %400 : vector<1x32xf32> to vector<1x1x32xf32>
    %422 = vector.broadcast %421 : vector<1x1x32xf32> to vector<2x5x32xf32>
    %423 = arith.mulf %420, %422 : vector<2x5x32xf32>
    %424 = vector.shape_cast %402 : vector<1x32xf32> to vector<1x1x32xf32>
    %425 = vector.broadcast %424 : vector<1x1x32xf32> to vector<2x5x32xf32>
    %426 = arith.addf %423, %425 : vector<2x5x32xf32>
    %427 = arith.truncf %426 : vector<2x5x32xf32> to vector<2x5x32xbf16>
    %c2_161 = arith.constant 2 : index
    %c0_162 = arith.constant 0 : index
    %c0_163 = arith.constant 0 : index
    %428 = vector.load %arg4[%c2_161, %c0_162, %c0_163] : memref<3x32x96xbf16, #tpu.memory_space<vmem>>, vector<1x32x96xbf16>
    %429 = vector.shape_cast %428 : vector<1x32x96xbf16> to vector<32x96xbf16>
    %430 = vector.shape_cast %429 : vector<32x96xbf16> to vector<1x32x96xbf16>
    %431 = vector.broadcast %430 : vector<1x32x96xbf16> to vector<2x32x96xbf16>
    "tpu.trace_start"() <{level = 10 : i32, message = "bnd,bde->bne"}> : () -> ()
    %cst_164 = arith.constant dense<0.000000e+00> : vector<2x5x96xf32>
    %432 = tpu.matmul %427, %431, %cst_164 {dimension_numbers = #tpu.dot_dimension_numbers<[2], [1], [1], [2], [0, 0, 0, 1, 1, 2], [0], [0]>} : vector<2x5x32xbf16>, vector<2x32x96xbf16>, vector<2x5x96xf32> -> vector<2x5x96xf32>
    "tpu.trace_stop"() : () -> ()
    %433 = vector.extract_strided_slice %432 {offsets = [0, 0, 0], sizes = [2, 5, 8], strides = [1, 1, 1]} : vector<2x5x96xf32> to vector<2x5x8xf32>
    %434 = arith.truncf %433 : vector<2x5x8xf32> to vector<2x5x8xbf16>
    %435 = vector.extract_strided_slice %432 {offsets = [0, 0, 32], sizes = [2, 5, 8], strides = [1, 1, 1]} : vector<2x5x96xf32> to vector<2x5x8xf32>
    %436 = arith.truncf %435 : vector<2x5x8xf32> to vector<2x5x8xbf16>
    %437 = vector.extract_strided_slice %432 {offsets = [0, 0, 64], sizes = [2, 5, 8], strides = [1, 1, 1]} : vector<2x5x96xf32> to vector<2x5x8xf32>
    %438 = arith.truncf %437 : vector<2x5x8xf32> to vector<2x5x8xbf16>
    "tpu.trace_start"() <{level = 10 : i32, message = "bnd,bmd->bnm"}> : () -> ()
    %cst_165 = arith.constant dense<0.000000e+00> : vector<2x5x5xf32>
    %439 = tpu.matmul %434, %436, %cst_165 {dimension_numbers = #tpu.dot_dimension_numbers<[2], [2], [1], [1], [0, 0, 0, 1, 1, 1], [0], [0]>} : vector<2x5x8xbf16>, vector<2x5x8xbf16>, vector<2x5x5xf32> -> vector<2x5x5xf32>
    "tpu.trace_stop"() : () -> ()
    %cst_166 = arith.constant 0.353553385 : f32
    %440 = vector.broadcast %cst_166 : f32 to vector<2x5x5xf32>
    %441 = arith.mulf %439, %440 : vector<2x5x5xf32>
    %cst_167 = arith.constant dense<0xFF800000> : vector<2x5xf32>
    %442 = vector.multi_reduction <maximumf>, %441, %cst_167 [2] : vector<2x5x5xf32> to vector<2x5xf32>
    %443 = vector.shape_cast %442 : vector<2x5xf32> to vector<2x5x1xf32>
    %444 = vector.broadcast %443 : vector<2x5x1xf32> to vector<2x5x5xf32>
    %445 = arith.subf %441, %444 : vector<2x5x5xf32>
    %446 = math.exp %445 : vector<2x5x5xf32>
    %cst_168 = arith.constant dense<0.000000e+00> : vector<2x5xf32>
    %447 = vector.multi_reduction <add>, %446, %cst_168 [2] : vector<2x5x5xf32> to vector<2x5xf32>
    %448 = vector.shape_cast %447 : vector<2x5xf32> to vector<2x5x1xf32>
    %449 = tpu.reciprocal %448 {approx = true} : vector<2x5x1xf32> -> vector<2x5x1xf32>
    %450 = vector.broadcast %449 : vector<2x5x1xf32> to vector<2x5x5xf32>
    %451 = arith.mulf %446, %450 : vector<2x5x5xf32>
    %452 = arith.truncf %451 : vector<2x5x5xf32> to vector<2x5x5xbf16>
    "tpu.trace_start"() <{level = 10 : i32, message = "bnm,bmd->bnd"}> : () -> ()
    %cst_169 = arith.constant dense<0.000000e+00> : vector<2x5x8xf32>
    %453 = tpu.matmul %452, %438, %cst_169 {dimension_numbers = #tpu.dot_dimension_numbers<[2], [1], [1], [2], [0, 0, 0, 1, 1, 2], [0], [0]>} : vector<2x5x5xbf16>, vector<2x5x8xbf16>, vector<2x5x8xf32> -> vector<2x5x8xf32>
    "tpu.trace_stop"() : () -> ()
    %454 = vector.extract_strided_slice %432 {offsets = [0, 0, 8], sizes = [2, 5, 8], strides = [1, 1, 1]} : vector<2x5x96xf32> to vector<2x5x8xf32>
    %455 = arith.truncf %454 : vector<2x5x8xf32> to vector<2x5x8xbf16>
    %456 = vector.extract_strided_slice %432 {offsets = [0, 0, 40], sizes = [2, 5, 8], strides = [1, 1, 1]} : vector<2x5x96xf32> to vector<2x5x8xf32>
    %457 = arith.truncf %456 : vector<2x5x8xf32> to vector<2x5x8xbf16>
    %458 = vector.extract_strided_slice %432 {offsets = [0, 0, 72], sizes = [2, 5, 8], strides = [1, 1, 1]} : vector<2x5x96xf32> to vector<2x5x8xf32>
    %459 = arith.truncf %458 : vector<2x5x8xf32> to vector<2x5x8xbf16>
    "tpu.trace_start"() <{level = 10 : i32, message = "bnd,bmd->bnm"}> : () -> ()
    %cst_170 = arith.constant dense<0.000000e+00> : vector<2x5x5xf32>
    %460 = tpu.matmul %455, %457, %cst_170 {dimension_numbers = #tpu.dot_dimension_numbers<[2], [2], [1], [1], [0, 0, 0, 1, 1, 1], [0], [0]>} : vector<2x5x8xbf16>, vector<2x5x8xbf16>, vector<2x5x5xf32> -> vector<2x5x5xf32>
    "tpu.trace_stop"() : () -> ()
    %cst_171 = arith.constant 0.353553385 : f32
    %461 = vector.broadcast %cst_171 : f32 to vector<2x5x5xf32>
    %462 = arith.mulf %460, %461 : vector<2x5x5xf32>
    %cst_172 = arith.constant dense<0xFF800000> : vector<2x5xf32>
    %463 = vector.multi_reduction <maximumf>, %462, %cst_172 [2] : vector<2x5x5xf32> to vector<2x5xf32>
    %464 = vector.shape_cast %463 : vector<2x5xf32> to vector<2x5x1xf32>
    %465 = vector.broadcast %464 : vector<2x5x1xf32> to vector<2x5x5xf32>
    %466 = arith.subf %462, %465 : vector<2x5x5xf32>
    %467 = math.exp %466 : vector<2x5x5xf32>
    %cst_173 = arith.constant dense<0.000000e+00> : vector<2x5xf32>
    %468 = vector.multi_reduction <add>, %467, %cst_173 [2] : vector<2x5x5xf32> to vector<2x5xf32>
    %469 = vector.shape_cast %468 : vector<2x5xf32> to vector<2x5x1xf32>
    %470 = tpu.reciprocal %469 {approx = true} : vector<2x5x1xf32> -> vector<2x5x1xf32>
    %471 = vector.broadcast %470 : vector<2x5x1xf32> to vector<2x5x5xf32>
    %472 = arith.mulf %467, %471 : vector<2x5x5xf32>
    %473 = arith.truncf %472 : vector<2x5x5xf32> to vector<2x5x5xbf16>
    "tpu.trace_start"() <{level = 10 : i32, message = "bnm,bmd->bnd"}> : () -> ()
    %cst_174 = arith.constant dense<0.000000e+00> : vector<2x5x8xf32>
    %474 = tpu.matmul %473, %459, %cst_174 {dimension_numbers = #tpu.dot_dimension_numbers<[2], [1], [1], [2], [0, 0, 0, 1, 1, 2], [0], [0]>} : vector<2x5x5xbf16>, vector<2x5x8xbf16>, vector<2x5x8xf32> -> vector<2x5x8xf32>
    "tpu.trace_stop"() : () -> ()
    %475 = vector.extract_strided_slice %432 {offsets = [0, 0, 16], sizes = [2, 5, 8], strides = [1, 1, 1]} : vector<2x5x96xf32> to vector<2x5x8xf32>
    %476 = arith.truncf %475 : vector<2x5x8xf32> to vector<2x5x8xbf16>
    %477 = vector.extract_strided_slice %432 {offsets = [0, 0, 48], sizes = [2, 5, 8], strides = [1, 1, 1]} : vector<2x5x96xf32> to vector<2x5x8xf32>
    %478 = arith.truncf %477 : vector<2x5x8xf32> to vector<2x5x8xbf16>
    %479 = vector.extract_strided_slice %432 {offsets = [0, 0, 80], sizes = [2, 5, 8], strides = [1, 1, 1]} : vector<2x5x96xf32> to vector<2x5x8xf32>
    %480 = arith.truncf %479 : vector<2x5x8xf32> to vector<2x5x8xbf16>
    "tpu.trace_start"() <{level = 10 : i32, message = "bnd,bmd->bnm"}> : () -> ()
    %cst_175 = arith.constant dense<0.000000e+00> : vector<2x5x5xf32>
    %481 = tpu.matmul %476, %478, %cst_175 {dimension_numbers = #tpu.dot_dimension_numbers<[2], [2], [1], [1], [0, 0, 0, 1, 1, 1], [0], [0]>} : vector<2x5x8xbf16>, vector<2x5x8xbf16>, vector<2x5x5xf32> -> vector<2x5x5xf32>
    "tpu.trace_stop"() : () -> ()
    %cst_176 = arith.constant 0.353553385 : f32
    %482 = vector.broadcast %cst_176 : f32 to vector<2x5x5xf32>
    %483 = arith.mulf %481, %482 : vector<2x5x5xf32>
    %cst_177 = arith.constant dense<0xFF800000> : vector<2x5xf32>
    %484 = vector.multi_reduction <maximumf>, %483, %cst_177 [2] : vector<2x5x5xf32> to vector<2x5xf32>
    %485 = vector.shape_cast %484 : vector<2x5xf32> to vector<2x5x1xf32>
    %486 = vector.broadcast %485 : vector<2x5x1xf32> to vector<2x5x5xf32>
    %487 = arith.subf %483, %486 : vector<2x5x5xf32>
    %488 = math.exp %487 : vector<2x5x5xf32>
    %cst_178 = arith.constant dense<0.000000e+00> : vector<2x5xf32>
    %489 = vector.multi_reduction <add>, %488, %cst_178 [2] : vector<2x5x5xf32> to vector<2x5xf32>
    %490 = vector.shape_cast %489 : vector<2x5xf32> to vector<2x5x1xf32>
    %491 = tpu.reciprocal %490 {approx = true} : vector<2x5x1xf32> -> vector<2x5x1xf32>
    %492 = vector.broadcast %491 : vector<2x5x1xf32> to vector<2x5x5xf32>
    %493 = arith.mulf %488, %492 : vector<2x5x5xf32>
    %494 = arith.truncf %493 : vector<2x5x5xf32> to vector<2x5x5xbf16>
    "tpu.trace_start"() <{level = 10 : i32, message = "bnm,bmd->bnd"}> : () -> ()
    %cst_179 = arith.constant dense<0.000000e+00> : vector<2x5x8xf32>
    %495 = tpu.matmul %494, %480, %cst_179 {dimension_numbers = #tpu.dot_dimension_numbers<[2], [1], [1], [2], [0, 0, 0, 1, 1, 2], [0], [0]>} : vector<2x5x5xbf16>, vector<2x5x8xbf16>, vector<2x5x8xf32> -> vector<2x5x8xf32>
    "tpu.trace_stop"() : () -> ()
    %496 = vector.extract_strided_slice %432 {offsets = [0, 0, 24], sizes = [2, 5, 8], strides = [1, 1, 1]} : vector<2x5x96xf32> to vector<2x5x8xf32>
    %497 = arith.truncf %496 : vector<2x5x8xf32> to vector<2x5x8xbf16>
    %498 = vector.extract_strided_slice %432 {offsets = [0, 0, 56], sizes = [2, 5, 8], strides = [1, 1, 1]} : vector<2x5x96xf32> to vector<2x5x8xf32>
    %499 = arith.truncf %498 : vector<2x5x8xf32> to vector<2x5x8xbf16>
    %500 = vector.extract_strided_slice %432 {offsets = [0, 0, 88], sizes = [2, 5, 8], strides = [1, 1, 1]} : vector<2x5x96xf32> to vector<2x5x8xf32>
    %501 = arith.truncf %500 : vector<2x5x8xf32> to vector<2x5x8xbf16>
    "tpu.trace_start"() <{level = 10 : i32, message = "bnd,bmd->bnm"}> : () -> ()
    %cst_180 = arith.constant dense<0.000000e+00> : vector<2x5x5xf32>
    %502 = tpu.matmul %497, %499, %cst_180 {dimension_numbers = #tpu.dot_dimension_numbers<[2], [2], [1], [1], [0, 0, 0, 1, 1, 1], [0], [0]>} : vector<2x5x8xbf16>, vector<2x5x8xbf16>, vector<2x5x5xf32> -> vector<2x5x5xf32>
    "tpu.trace_stop"() : () -> ()
    %cst_181 = arith.constant 0.353553385 : f32
    %503 = vector.broadcast %cst_181 : f32 to vector<2x5x5xf32>
    %504 = arith.mulf %502, %503 : vector<2x5x5xf32>
    %cst_182 = arith.constant dense<0xFF800000> : vector<2x5xf32>
    %505 = vector.multi_reduction <maximumf>, %504, %cst_182 [2] : vector<2x5x5xf32> to vector<2x5xf32>
    %506 = vector.shape_cast %505 : vector<2x5xf32> to vector<2x5x1xf32>
    %507 = vector.broadcast %506 : vector<2x5x1xf32> to vector<2x5x5xf32>
    %508 = arith.subf %504, %507 : vector<2x5x5xf32>
    %509 = math.exp %508 : vector<2x5x5xf32>
    %cst_183 = arith.constant dense<0.000000e+00> : vector<2x5xf32>
    %510 = vector.multi_reduction <add>, %509, %cst_183 [2] : vector<2x5x5xf32> to vector<2x5xf32>
    %511 = vector.shape_cast %510 : vector<2x5xf32> to vector<2x5x1xf32>
    %512 = tpu.reciprocal %511 {approx = true} : vector<2x5x1xf32> -> vector<2x5x1xf32>
    %513 = vector.broadcast %512 : vector<2x5x1xf32> to vector<2x5x5xf32>
    %514 = arith.mulf %509, %513 : vector<2x5x5xf32>
    %515 = arith.truncf %514 : vector<2x5x5xf32> to vector<2x5x5xbf16>
    "tpu.trace_start"() <{level = 10 : i32, message = "bnm,bmd->bnd"}> : () -> ()
    %cst_184 = arith.constant dense<0.000000e+00> : vector<2x5x8xf32>
    %516 = tpu.matmul %515, %501, %cst_184 {dimension_numbers = #tpu.dot_dimension_numbers<[2], [1], [1], [2], [0, 0, 0, 1, 1, 2], [0], [0]>} : vector<2x5x5xbf16>, vector<2x5x8xbf16>, vector<2x5x8xf32> -> vector<2x5x8xf32>
    "tpu.trace_stop"() : () -> ()
    %517 = tpu.concatenate %453, %474, %495, %516 in 2 : vector<2x5x8xf32>, vector<2x5x8xf32>, vector<2x5x8xf32>, vector<2x5x8xf32> -> vector<2x5x32xf32>
    %518 = arith.truncf %517 : vector<2x5x32xf32> to vector<2x5x32xbf16>
    %c2_185 = arith.constant 2 : index
    %c0_186 = arith.constant 0 : index
    %c0_187 = arith.constant 0 : index
    %519 = vector.load %arg5[%c2_185, %c0_186, %c0_187] : memref<3x32x32xbf16, #tpu.memory_space<vmem>>, vector<1x32x32xbf16>
    %520 = vector.shape_cast %519 : vector<1x32x32xbf16> to vector<32x32xbf16>
    %521 = vector.shape_cast %520 : vector<32x32xbf16> to vector<1x32x32xbf16>
    %522 = vector.broadcast %521 : vector<1x32x32xbf16> to vector<2x32x32xbf16>
    "tpu.trace_start"() <{level = 10 : i32, message = "bnk,bkd->bnd"}> : () -> ()
    %cst_188 = arith.constant dense<0.000000e+00> : vector<2x5x32xf32>
    %523 = tpu.matmul %518, %522, %cst_188 {dimension_numbers = #tpu.dot_dimension_numbers<[2], [1], [1], [2], [0, 0, 0, 1, 1, 2], [0], [0]>} : vector<2x5x32xbf16>, vector<2x32x32xbf16>, vector<2x5x32xf32> -> vector<2x5x32xf32>
    "tpu.trace_stop"() : () -> ()
    %c2_189 = arith.constant 2 : index
    %c0_190 = arith.constant 0 : index
    %c0_191 = arith.constant 0 : index
    %524 = vector.load %arg6[%c2_189, %c0_190, %c0_191] : memref<3x1x32xf32, #tpu.memory_space<vmem>>, vector<1x1x32xf32>
    %525 = vector.shape_cast %524 : vector<1x1x32xf32> to vector<1x32xf32>
    %526 = vector.shape_cast %525 : vector<1x32xf32> to vector<1x1x32xf32>
    %527 = vector.broadcast %526 : vector<1x1x32xf32> to vector<2x5x32xf32>
    %528 = arith.addf %523, %527 : vector<2x5x32xf32>
    %529 = arith.addf %398, %528 : vector<2x5x32xf32>
    %c2_192 = arith.constant 2 : index
    %c0_193 = arith.constant 0 : index
    %c0_194 = arith.constant 0 : index
    %530 = vector.load %arg7[%c2_192, %c0_193, %c0_194] : memref<3x1x32xf32, #tpu.memory_space<vmem>>, vector<1x1x32xf32>
    %531 = vector.shape_cast %530 : vector<1x1x32xf32> to vector<1x32xf32>
    %c2_195 = arith.constant 2 : index
    %c0_196 = arith.constant 0 : index
    %c0_197 = arith.constant 0 : index
    %532 = vector.load %arg8[%c2_195, %c0_196, %c0_197] : memref<3x1x32xf32, #tpu.memory_space<vmem>>, vector<1x1x32xf32>
    %533 = vector.shape_cast %532 : vector<1x1x32xf32> to vector<1x32xf32>
    %cst_198 = arith.constant dense<0.000000e+00> : vector<2x5xf32>
    %534 = vector.multi_reduction <add>, %529, %cst_198 [2] : vector<2x5x32xf32> to vector<2x5xf32>
    %535 = vector.shape_cast %534 : vector<2x5xf32> to vector<2x5x1xf32>
    %cst_199 = arith.constant 3.200000e+01 : f32
    %536 = vector.broadcast %cst_199 : f32 to vector<2x5x1xf32>
    %537 = arith.divf %535, %536 : vector<2x5x1xf32>
    %538 = vector.broadcast %537 : vector<2x5x1xf32> to vector<2x5x32xf32>
    %539 = arith.subf %529, %538 : vector<2x5x32xf32>
    %540 = arith.mulf %539, %539 : vector<2x5x32xf32>
    %cst_200 = arith.constant dense<0.000000e+00> : vector<2x5xf32>
    %541 = vector.multi_reduction <add>, %540, %cst_200 [2] : vector<2x5x32xf32> to vector<2x5xf32>
    %542 = vector.shape_cast %541 : vector<2x5xf32> to vector<2x5x1xf32>
    %cst_201 = arith.constant 3.200000e+01 : f32
    %543 = vector.broadcast %cst_201 : f32 to vector<2x5x1xf32>
    %544 = arith.divf %542, %543 : vector<2x5x1xf32>
    %545 = vector.broadcast %537 : vector<2x5x1xf32> to vector<2x5x32xf32>
    %546 = arith.subf %529, %545 : vector<2x5x32xf32>
    %cst_202 = arith.constant 9.99999974E-6 : f32
    %547 = vector.broadcast %cst_202 : f32 to vector<2x5x1xf32>
    %548 = arith.addf %544, %547 : vector<2x5x1xf32>
    %549 = math.rsqrt %548 : vector<2x5x1xf32>
    %550 = vector.broadcast %549 : vector<2x5x1xf32> to vector<2x5x32xf32>
    %551 = arith.mulf %546, %550 : vector<2x5x32xf32>
    %552 = vector.shape_cast %531 : vector<1x32xf32> to vector<1x1x32xf32>
    %553 = vector.broadcast %552 : vector<1x1x32xf32> to vector<2x5x32xf32>
    %554 = arith.mulf %551, %553 : vector<2x5x32xf32>
    %555 = vector.shape_cast %533 : vector<1x32xf32> to vector<1x1x32xf32>
    %556 = vector.broadcast %555 : vector<1x1x32xf32> to vector<2x5x32xf32>
    %557 = arith.addf %554, %556 : vector<2x5x32xf32>
    %558 = arith.truncf %557 : vector<2x5x32xf32> to vector<2x5x32xbf16>
    %c2_203 = arith.constant 2 : index
    %c0_204 = arith.constant 0 : index
    %c0_205 = arith.constant 0 : index
    %559 = vector.load %arg9[%c2_203, %c0_204, %c0_205] : memref<3x32x64xbf16, #tpu.memory_space<vmem>>, vector<1x32x64xbf16>
    %560 = vector.shape_cast %559 : vector<1x32x64xbf16> to vector<32x64xbf16>
    %561 = vector.shape_cast %560 : vector<32x64xbf16> to vector<1x32x64xbf16>
    %562 = vector.broadcast %561 : vector<1x32x64xbf16> to vector<2x32x64xbf16>
    "tpu.trace_start"() <{level = 10 : i32, message = "bnd,bdk->bnk"}> : () -> ()
    %cst_206 = arith.constant dense<0.000000e+00> : vector<2x5x64xf32>
    %563 = tpu.matmul %558, %562, %cst_206 {dimension_numbers = #tpu.dot_dimension_numbers<[2], [1], [1], [2], [0, 0, 0, 1, 1, 2], [0], [0]>} : vector<2x5x32xbf16>, vector<2x32x64xbf16>, vector<2x5x64xf32> -> vector<2x5x64xf32>
    "tpu.trace_stop"() : () -> ()
    %c2_207 = arith.constant 2 : index
    %c0_208 = arith.constant 0 : index
    %c0_209 = arith.constant 0 : index
    %564 = vector.load %arg10[%c2_207, %c0_208, %c0_209] : memref<3x1x64xf32, #tpu.memory_space<vmem>>, vector<1x1x64xf32>
    %565 = vector.shape_cast %564 : vector<1x1x64xf32> to vector<1x64xf32>
    %566 = vector.shape_cast %565 : vector<1x64xf32> to vector<1x1x64xf32>
    %567 = vector.broadcast %566 : vector<1x1x64xf32> to vector<2x5x64xf32>
    %568 = arith.addf %563, %567 : vector<2x5x64xf32>
    %cst_210 = arith.constant 5.000000e-01 : f32
    %569 = vector.broadcast %cst_210 : f32 to vector<2x5x64xf32>
    %570 = arith.mulf %569, %568 : vector<2x5x64xf32>
    %cst_211 = arith.constant 0.707106769 : f32
    %571 = vector.broadcast %cst_211 : f32 to vector<2x5x64xf32>
    %572 = arith.mulf %568, %571 : vector<2x5x64xf32>
    %573 = math.erf %572 : vector<2x5x64xf32>
    %cst_212 = arith.constant 1.000000e+00 : f32
    %574 = vector.broadcast %cst_212 : f32 to vector<2x5x64xf32>
    %575 = arith.addf %574, %573 : vector<2x5x64xf32>
    %576 = arith.mulf %570, %575 : vector<2x5x64xf32>
    %577 = arith.truncf %576 : vector<2x5x64xf32> to vector<2x5x64xbf16>
    %c2_213 = arith.constant 2 : index
    %c0_214 = arith.constant 0 : index
    %c0_215 = arith.constant 0 : index
    %578 = vector.load %arg11[%c2_213, %c0_214, %c0_215] : memref<3x64x32xbf16, #tpu.memory_space<vmem>>, vector<1x64x32xbf16>
    %579 = vector.shape_cast %578 : vector<1x64x32xbf16> to vector<64x32xbf16>
    %580 = vector.shape_cast %579 : vector<64x32xbf16> to vector<1x64x32xbf16>
    %581 = vector.broadcast %580 : vector<1x64x32xbf16> to vector<2x64x32xbf16>
    "tpu.trace_start"() <{level = 10 : i32, message = "bnk,bkd->bnd"}> : () -> ()
    %cst_216 = arith.constant dense<0.000000e+00> : vector<2x5x32xf32>
    %582 = tpu.matmul %577, %581, %cst_216 {dimension_numbers = #tpu.dot_dimension_numbers<[2], [1], [1], [2], [0, 0, 0, 1, 1, 2], [0], [0]>} : vector<2x5x64xbf16>, vector<2x64x32xbf16>, vector<2x5x32xf32> -> vector<2x5x32xf32>
    "tpu.trace_stop"() : () -> ()
    %c2_217 = arith.constant 2 : index
    %c0_218 = arith.constant 0 : index
    %c0_219 = arith.constant 0 : index
    %583 = vector.load %arg12[%c2_217, %c0_218, %c0_219] : memref<3x1x32xf32, #tpu.memory_space<vmem>>, vector<1x1x32xf32>
    %584 = vector.shape_cast %583 : vector<1x1x32xf32> to vector<1x32xf32>
    %585 = vector.shape_cast %584 : vector<1x32xf32> to vector<1x1x32xf32>
    %586 = vector.broadcast %585 : vector<1x1x32xf32> to vector<2x5x32xf32>
    %587 = arith.addf %582, %586 : vector<2x5x32xf32>
    %588 = arith.addf %529, %587 : vector<2x5x32xf32>
    %c0_220 = arith.constant 0 : index
    %c0_221 = arith.constant 0 : index
    %c0_222 = arith.constant 0 : index
    %589 = vector.load %arg16[%c0_220, %c0_221, %c0_222] : memref<2x5x32xf32, #tpu.memory_space<vmem>>, vector<2x5x32xf32>
    tpu.vector_store %arg16[%c0_220, %c0_221, %c0_222], %588 {strides = array<i32>} : memref<2x5x32xf32, #tpu.memory_space<vmem>>, vector<2x5x32xf32>,
    return
  }
  func.func @transform_0(%arg0: i32) -> (i32, i32, i32) {
    %c0_i32 = arith.constant 0 : i32
    %c0_i32_0 = arith.constant 0 : i32
    %c0_i32_1 = arith.constant 0 : i32
    return %arg0, %c0_i32, %c0_i32_0 : i32, i32, i32
  }
  func.func @transform_1(%arg0: i32) -> (i32, i32, i32) {
    %c0_i32 = arith.constant 0 : i32
    %c0_i32_0 = arith.constant 0 : i32
    %c0_i32_1 = arith.constant 0 : i32
    %c0_i32_2 = arith.constant 0 : i32
    return %c0_i32, %c0_i32_0, %c0_i32_1 : i32, i32, i32
  }
  func.func @transform_2(%arg0: i32) -> (i32, i32, i32) {
    %c0_i32 = arith.constant 0 : i32
    %c0_i32_0 = arith.constant 0 : i32
    %c0_i32_1 = arith.constant 0 : i32
    %c0_i32_2 = arith.constant 0 : i32
    return %c0_i32, %c0_i32_0, %c0_i32_1 : i32, i32, i32
  }
  func.func @transform_3(%arg0: i32) -> (i32, i32, i32) {
    %c0_i32 = arith.constant 0 : i32
    %c0_i32_0 = arith.constant 0 : i32
    %c0_i32_1 = arith.constant 0 : i32
    %c0_i32_2 = arith.constant 0 : i32
    return %c0_i32, %c0_i32_0, %c0_i32_1 : i32, i32, i32
  }
  func.func @transform_4(%arg0: i32) -> (i32, i32, i32) {
    %c0_i32 = arith.constant 0 : i32
    %c0_i32_0 = arith.constant 0 : i32
    %c0_i32_1 = arith.constant 0 : i32
    %c0_i32_2 = arith.constant 0 : i32
    return %c0_i32, %c0_i32_0, %c0_i32_1 : i32, i32, i32
  }
  func.func @transform_5(%arg0: i32) -> (i32, i32, i32) {
    %c0_i32 = arith.constant 0 : i32
    %c0_i32_0 = arith.constant 0 : i32
    %c0_i32_1 = arith.constant 0 : i32
    %c0_i32_2 = arith.constant 0 : i32
    return %c0_i32, %c0_i32_0, %c0_i32_1 : i32, i32, i32
  }
  func.func @transform_6(%arg0: i32) -> (i32, i32, i32) {
    %c0_i32 = arith.constant 0 : i32
    %c0_i32_0 = arith.constant 0 : i32
    %c0_i32_1 = arith.constant 0 : i32
    %c0_i32_2 = arith.constant 0 : i32
    return %c0_i32, %c0_i32_0, %c0_i32_1 : i32, i32, i32
  }
  func.func @transform_7(%arg0: i32) -> (i32, i32, i32) {
    %c0_i32 = arith.constant 0 : i32
    %c0_i32_0 = arith.constant 0 : i32
    %c0_i32_1 = arith.constant 0 : i32
    %c0_i32_2 = arith.constant 0 : i32
    return %c0_i32, %c0_i32_0, %c0_i32_1 : i32, i32, i32
  }
  func.func @transform_8(%arg0: i32) -> (i32, i32, i32) {
    %c0_i32 = arith.constant 0 : i32
    %c0_i32_0 = arith.constant 0 : i32
    %c0_i32_1 = arith.constant 0 : i32
    %c0_i32_2 = arith.constant 0 : i32
    return %c0_i32, %c0_i32_0, %c0_i32_1 : i32, i32, i32
  }
  func.func @transform_9(%arg0: i32) -> (i32, i32, i32) {
    %c0_i32 = arith.constant 0 : i32
    %c0_i32_0 = arith.constant 0 : i32
    %c0_i32_1 = arith.constant 0 : i32
    %c0_i32_2 = arith.constant 0 : i32
    return %c0_i32, %c0_i32_0, %c0_i32_1 : i32, i32, i32
  }
  func.func @transform_10(%arg0: i32) -> (i32, i32, i32) {
    %c0_i32 = arith.constant 0 : i32
    %c0_i32_0 = arith.constant 0 : i32
    %c0_i32_1 = arith.constant 0 : i32
    %c0_i32_2 = arith.constant 0 : i32
    return %c0_i32, %c0_i32_0, %c0_i32_1 : i32, i32, i32
  }
  func.func @transform_11(%arg0: i32) -> (i32, i32, i32) {
    %c0_i32 = arith.constant 0 : i32
    %c0_i32_0 = arith.constant 0 : i32
    %c0_i32_1 = arith.constant 0 : i32
    %c0_i32_2 = arith.constant 0 : i32
    return %c0_i32, %c0_i32_0, %c0_i32_1 : i32, i32, i32
  }
  func.func @transform_12(%arg0: i32) -> (i32, i32, i32) {
    %c0_i32 = arith.constant 0 : i32
    %c0_i32_0 = arith.constant 0 : i32
    %c0_i32_1 = arith.constant 0 : i32
    %c0_i32_2 = arith.constant 0 : i32
    return %c0_i32, %c0_i32_0, %c0_i32_1 : i32, i32, i32
  }
  func.func @transform_13(%arg0: i32) -> (i32, i32, i32) {
    %c0_i32 = arith.constant 0 : i32
    %c0_i32_0 = arith.constant 0 : i32
    %c0_i32_1 = arith.constant 0 : i32
    %c0_i32_2 = arith.constant 0 : i32
    return %c0_i32, %c0_i32_0, %c0_i32_1 : i32, i32, i32
  }
  func.func @transform_14(%arg0: i32) -> (i32, i32, i32) {
    %c0_i32 = arith.constant 0 : i32
    %c0_i32_0 = arith.constant 0 : i32
    %c0_i32_1 = arith.constant 0 : i32
    %c0_i32_2 = arith.constant 0 : i32
    return %c0_i32, %c0_i32_0, %c0_i32_1 : i32, i32, i32
  }
  func.func @transform_15(%arg0: i32) -> (i32, i32, i32) {
    %c0_i32 = arith.constant 0 : i32
    %c0_i32_0 = arith.constant 0 : i32
    %c0_i32_1 = arith.constant 0 : i32
    return %arg0, %c0_i32, %c0_i32_0 : i32, i32, i32
  }
}

</mosaic_0001>

<bundles_post_ra>
// kernel: _lambda_.1
= control target key start
LH: loop header
LB: loop body
LE: loop exit
PB: predicated region body
PF: predicated region fallthrough
CT: control target
= control target key end

     0   :  { %vm55_vm0 = vcmask 258048   ;;  %v5830_v14 = vmov 0.0   ;;  %vm5831_vm1 = vmmov 0   ;;  %vm117_vm2 = vcmask 261120   ;;  %s5832_s30 = smov 96   ;;  %s5833_s16 = smov 64   ;;  %s6858_s0 = inlined_call_operand.vmem [shape: f32[2,5,32], index: 0, kind: input, shape index: {}]   ;;  %s6859_s3 = inlined_call_operand.vmem [shape: bf16[3,32,96], index: 3, kind: input, shape index: {}]   ;;  %s6860_s1 = inlined_call_operand.vmem [shape: f32[3,1,32], index: 1, kind: input, shape index: {}]   ;;  %s6861_s2 = inlined_call_operand.vmem [shape: f32[3,1,32], index: 2, kind: input, shape index: {}]   ;;  %s6862_s4 = inlined_call_operand.vmem [shape: bf16[3,32,32], index: 4, kind: input, shape index: {}]   ;;  %s6863_s5 = inlined_call_operand.vmem [shape: f32[3,1,32], index: 5, kind: input, shape index: {}]   ;;  %s6864_s8 = inlined_call_operand.vmem [shape: bf16[3,32,64], index: 8, kind: input, shape index: {}]   ;;  %s6865_s6 = inlined_call_operand.vmem [shape: f32[3,1,32], index: 6, kind: input, shape index: {}]   ;;  %s6866_s7 = inlined_call_operand.vmem [shape: f32[3,1,32], index: 7, kind: input, shape index: {}]   ;;  %s6867_s10 = inlined_call_operand.vmem [shape: bf16[3,64,32], index: 10, kind: input, shape index: {}]   ;;  %s6868_s9 = inlined_call_operand.vmem [shape: f32[3,1,64], index: 9, kind: input, shape index: {}]   ;;  %s6869_s11 = inlined_call_operand.vmem [shape: f32[3,1,32], index: 11, kind: input, shape index: {}]   ;;  %s6870_s13 = inlined_call_operand.vmem [shape: bf16[1,5,5], index: 13, kind: input, shape index: {}]   ;;  %s6871_s14 = inlined_call_operand.vmem [shape: f32[1,5,1], index: 14, kind: input, shape index: {}]   ;;  %s6872_s12 = inlined_call_operand.vmem [shape: bf16[1,5,5], index: 12, kind: input, shape index: {}]   ;;  %s6873_s15 = inlined_call_operand.vmem [shape: f32[2,5,32], index: 15, kind: output, shape index: {}]  }
   0x1   :  { %v5931_v0 = vld [vmem:[%s6858_s0] sm:$0x1f]  ;;  %v5936_v1 = vld [vmem:[%s6858_s0 + $0x8] sm:$0x1f]  ;;  %5074 = vmatprep.subr.bf16.mxu0 %v5830_v14  ;;  %5082 = vmatprep.subr.bf16.mxu1 %v5830_v14  ;;  %vm209_vm3 = vcmask 64512   ;;  %vm307_vm4 = vcmask 36864  }
   0x2   :  { %v56_v2 = vsel %vm55_vm0, %v5931_v0, 0.0  ;;  %v59_v3 = vsel %vm55_vm0, %v5936_v1, 0.0  ;;  %v5666_v15 = vld [vmem:[%s6859_s3 + $0x8] sm:$0xff]   ;;  %5078 = vmatprep.mubr.msk.bf16.mxu0 %vm5831_vm1, %v5830_v14  ;;  %5086 = vmatprep.mubr.msk.bf16.mxu1 %vm5831_vm1, %v5830_v14  ;;  %v5667_v16 = vld [vmem:[%s6859_s3] sm:$0xff]   ;;  %s5834_s17 = smov 88   ;;  %vm338_vm5 = vcmask 1041408  }
   0x3   :  { %57 = vadd.xlane.f32.xlu0 %v56_v2  ;;  %5075 = vmatpush3.bf16.msra.mxu0 %v5666_v15  ;;  %v4705_v24 = vld [vmem:[%s6860_s1] ss:$0 sm:$0xff]  ;;  %vm339_vm6 = vcmask 1042432   ;;  %v5835_v61 = vmov 65535   ;;  %s5836_s18 = smov 120   ;;  %vm334_vm7 = vcmask 39936  }
   0x4   :  { %5083 = vmatpush3.bf16.msra.mxu1 %v5666_v15  ;;  %5076 = vmatprep.subr.bf16.mxu0 %v5830_v14  ;;  %v4706_v26 = vld [vmem:[%s6861_s2] ss:$0 sm:$0xff]  ;;  %v340_v62 = vsel %vm338_vm5, 4294967295, %v5835_v61  ;;  %s6892_s19 = smov 56   ;;  %s6890_s20 = smov 80   ;;  %vm1125_vm8 = vcmask 130048  }
   0x5   :  { %5084 = vmatprep.subr.bf16.mxu1 %v5830_v14  ;;  %s6888_s21 = smov 112   ;;  %s6886_s22 = smov 48   ;;  %vm1128_vm9 = vcmask 195584   ;;  %vm1450_vm10 = vcmask 523264  }
   0x6   :  { %s6884_s23 = smov 72   ;;  %s6882_s24 = smov 104  }
   0x7   :  { %60 = vadd.xlane.f32.xlu0 %v59_v3  ;;  %5077 = vmatpush3.bf16.msra.mxu0 %v5667_v16  ;;  %v6000_v3 = vsel %vm339_vm6, %v340_v62, 0  ;;  %s6880_s25 = smov 40   ;;  %s6876_s26 = smov 8  }
   0x8   :  { %5085 = vmatpush3.bf16.msra.mxu1 %v5667_v16  ;;  %5090 = vmatprep.subr.bf16.mxu0 %v5830_v14  ;;  %s6874_s27 = smov 16   ;;  %s6878_s28 = smov 24  }
   0x9   :  { %5096 = vmatprep.subr.bf16.mxu1 %v5830_v14  ;;  %s6898_s29 = smov 24  }
  0x8c   :  { %v58_v4 = vpop.xlane.xlu0 %57 }
  0x8d   :  { %v63_v5 = vmul.f32 0.03125, %v58_v4 }
  0x8f   :  { %v65_v6 = vsub.f32 %v5931_v0, %v63_v5 }
  0x90   :  { %v61_v7 = vpop.xlane.xlu0 %60 }
  0x91   :  { %v64_v8 = vmul.f32 0.03125, %v61_v7  ;;  %v67_v9 = vmul.f32 %v65_v6, %v65_v6 }
  0x93   :  { %v66_v10 = vsub.f32 %v5936_v1, %v64_v8  ;;  %v69_v11 = vsel %vm55_vm0, %v67_v9, 0.0 }
  0x94   :  { %70 = vadd.xlane.f32.xlu1 %v69_v11 }
  0x95   :  { %v68_v12 = vmul.f32 %v66_v10, %v66_v10 }
  0x97   :  { %v72_v13 = vsel %vm55_vm0, %v68_v12, 0.0 }
  0x98   :  { %73 = vadd.xlane.f32.xlu1 %v72_v13 }
 0x11d   :  { %v71_v17 = vpop.xlane.xlu1 %70 }
 0x11e   :  { %v75_v18 = vmul.f32 0.03125, %v71_v17 }
 0x120   :  { %v77_v19 = vadd.f32 1e-05, %v75_v18 }
 0x121   :  { %v74_v20 = vpop.xlane.xlu1 %73 }
 0x122   :  { %5696 = vrsqrt.f32 %v77_v19  ;;  %v76_v21 = vmul.f32 0.03125, %v74_v20 }
 0x124   :  { %v78_v22 = vadd.f32 1e-05, %v76_v21 }
 0x126   :  { %5698 = vrsqrt.f32 %v78_v22 }
 0x12f   :  { %v5697_v23 = vpop.eup %5696 }
 0x130   :  { %v81_v25 = vmul.f32 %v5697_v23, %v65_v6 }
 0x132   :  { %v89_v27 = vmul.f32 %v4705_v24, %v81_v25 }
 0x133   :  { %v5699_v28 = vpop.eup %5698 }
 0x134   :  { %v97_v29 = vadd.f32 %v4706_v26, %v89_v27  ;;  %v82_v30 = vmul.f32 %v5699_v28, %v66_v10 }
 0x136   :  { %v99_v31 = vpack.c.bf16 %v97_v29, %v97_v29  ;;  %v90_v32 = vmul.f32 %v4705_v24, %v82_v30 }
 0x138   :  { %5079 = vmatmul.mubr.msk.bf16.vlgmr.msra.gmra.mxu0 %vm117_vm2, %v99_v31  ;;  %v98_v33 = vadd.f32 %v4706_v26, %v90_v32 }
 0x139   :  { %5092 = vmatprep.mubr.msk.bf16.mxu0 %vm5831_vm1, %v5830_v14 }
 0x13a   :  { %v100_v34 = vpack.c.bf16 %v98_v33, %v98_v33 }
 0x13c   :  { %5087 = vmatmul.mubr.msk.bf16.vlgmr.msra.gmra.mxu1 %vm117_vm2, %v100_v34 }
 0x13d   :  { %5098 = vmatprep.mubr.msk.bf16.mxu1 %vm5831_vm1, %v5830_v14 }
 0x1f8   :  { %v155_v35 = vpop.f32.mrf.mxu0 }
 0x1f9   :  { %v5974_v36 = vpack.c.bf16 %v155_v35, %v155_v35 }
 0x1fa   :  { %v5080_v37 = vpop.f32.mrf.mxu0 }
 0x1fb   :  { %207 = vrot.lane.b32.xlu0 %v5974_v36, %s5832_s30 }
 0x1fc   :  { %v158_v38 = vpop.f32.mrf.mxu0  ;;  %v198_v39 = vpop.f32.mrf.mxu1 }
 0x1fd   :  { %v5978_v40 = vpack.c.bf16 %v198_v39, %v198_v39 }
 0x1fe   :  { %v5081_v41 = vpop.f32.mrf.mxu0  ;;  %v5088_v42 = vpop.f32.mrf.mxu1 }
 0x1ff   :  { %257 = vrot.lane.b32.xlu1 %v5978_v40, %s5832_s30 }
 0x200   :  { %v201_v43 = vpop.f32.mrf.mxu1 }
 0x202   :  { %v5089_v44 = vpop.f32.mrf.mxu1 }
 0x26d   :  { %v208_v45 = vpop.permute.xlu0 %207 }
 0x26e   :  { %v214_v46 = vsel %vm209_vm3, %v208_v45, 0 }
 0x26f   :  { %5091 = vmatpush3.bf16.xpose.msra.mxu0 %v214_v46 }
 0x270   :  { %5102 = vmatprep.subr.bf16.mxu0 %v5830_v14 }
 0x271   :  { %v258_v47 = vpop.permute.xlu1 %257 }
 0x272   :  { %v263_v48 = vsel %vm209_vm3, %v258_v47, 0 }
 0x273   :  { %5097 = vmatpush3.bf16.xpose.msra.mxu1 %v263_v48 }
 0x274   :  { %5108 = vmatprep.subr.bf16.mxu1 %v5830_v14 }
 0x276   :  { %5093 = vmatmul.mubr.msk.bf16.vlgmr.msra.gmra.mxu0 %vm209_vm3, %v5974_v36 }
 0x277   :  { %5104 = vmatprep.mubr.msk.bf16.mxu0 %vm5831_vm1, %v5830_v14 }
 0x27a   :  { %5099 = vmatmul.mubr.msk.bf16.vlgmr.msra.gmra.mxu1 %vm209_vm3, %v5978_v40 }
 0x27b   :  { %5110 = vmatprep.mubr.msk.bf16.mxu1 %vm5831_vm1, %v5830_v14 }
 0x336   :  { %v250_v49 = vpop.f32.mrf.mxu0 }
 0x337   :  { %v305_v50 = vmul.f32 0.35355338, %v250_v49 }
 0x338   :  { %v5094_v51 = vpop.f32.mrf.mxu0 }
 0x339   :  { %v308_v52 = vsel %vm307_vm4, %v305_v50, -inf }
 0x33a   :  { %v299_v53 = vpop.f32.mrf.mxu1  ;;  %309 = vmax.xlane.f32.xlu1 %v308_v52  ;;  %v253_v54 = vpop.f32.mrf.mxu0 }
 0x33b   :  { %v306_v55 = vmul.f32 0.35355338, %v299_v53 }
 0x33c   :  { %v5095_v56 = vpop.f32.mrf.mxu0  ;;  %v5100_v57 = vpop.f32.mrf.mxu1 }
 0x33d   :  { %v311_v58 = vsel %vm307_vm4, %v306_v55, -inf }
 0x33e   :  { %312 = vmax.xlane.f32.xlu0 %v311_v58  ;;  %v302_v59 = vpop.f32.mrf.mxu1 }
 0x340   :  { %v5101_v60 = vpop.f32.mrf.mxu1 }
 0x34b   :  { %385 = vrot.lane.b32.xlu1 %v5978_v40, %s5833_s16 }
 0x34f   :  { %435 = vrot.lane.b32.xlu1 %v5974_v36, %s5834_s17 }
 0x3c3   :  { %v310_v63 = vpop.xlane.xlu1 %309 }
 0x3c4   :  { %v314_v2 = vsub.f32 %v305_v50, %v310_v63 }
 0x3c6   :  { %v316_v4 = vmul.f32 1.442695, %v314_v2 }
 0x3c7   :  { %v386_v5 = vpop.permute.xlu1 %385  ;;  %v313_v6 = vpop.xlane.xlu0 %312 }
 0x3c8   :  { %5700 = vpow2.f32 %v316_v4  ;;  %v391_v7 = vand.u32 %v386_v5, %v6000_v3  ;;  %v315_v8 = vsub.f32 %v306_v55, %v313_v6 }
 0x3ca   :  { %v318_v9 = vmul.f32 1.442695, %v315_v8  ;;  %5109 = vmatpush3.bf16.msra.mxu1 %v391_v7 }
 0x3cb   :  { %5120 = vmatprep.subr.bf16.mxu1 %v5830_v14  ;;  %v436_v15 = vpop.permute.xlu1 %435 }
 0x3cc   :  { %5702 = vpow2.f32 %v318_v9  ;;  %v441_v24 = vsel %vm209_vm3, %v436_v15, 0 }
 0x3d5   :  { %v5701_v10 = vpop.eup %5700 }
 0x3d6   :  { %v320_v11 = vsel %vm307_vm4, %v5701_v10, 0.0 }
 0x3d7   :  { %321 = vadd.xlane.f32.xlu0 %v320_v11 }
 0x3d9   :  { %v5703_v12 = vpop.eup %5702 }
 0x3da   :  { %v323_v13 = vsel %vm307_vm4, %v5703_v12, 0.0 }
 0x3db   :  { %324 = vadd.xlane.f32.xlu1 %v323_v13 }
 0x3ec   :  { %485 = vrot.lane.b32.xlu1 %v5978_v40, %s5834_s17 }
 0x3ed   :  { %332 = vrot.lane.b32.xlu0 %v5974_v36, %s5833_s16 }
 0x3f0   :  { %483 = vrot.lane.b32.xlu1 %v5978_v40, %s5836_s18 }
 0x3f1   :  { %433 = vrot.lane.b32.xlu0 %v5974_v36, %s5836_s18 }
 0x460   :  { %v322_v16 = vpop.xlane.xlu0 %321 }
 0x461   :  { %5704 = vrcp.f32 %v322_v16 }
 0x464   :  { %v325_v17 = vpop.xlane.xlu1 %324  ;;  %v333_v18 = vpop.permute.xlu0 %332 }
 0x465   :  { %5706 = vrcp.f32 %v325_v17  ;;  %v343_v19 = vand.u32 %v6000_v3, %v333_v18 }
 0x467   :  { %5103 = vmatpush3.bf16.msra.mxu0 %v343_v19 }
 0x468   :  { %5114 = vmatprep.subr.bf16.mxu0 %v5830_v14  ;;  %v486_v26 = vpop.permute.xlu1 %485  ;;  %v434_v29 = vpop.permute.xlu0 %433 }
 0x469   :  { %v491_v28 = vsel %vm209_vm3, %v486_v26, 0 }
 0x46c   :  { %v484_v30 = vpop.permute.xlu1 %483 }
 0x46e   :  { %v5705_v20 = vpop.eup %5704 }
 0x46f   :  { %v328_v21 = vmul.f32 %v5705_v20, %v5701_v10 }
 0x471   :  { %v330_v22 = vpack.c.bf16 %v328_v21, %v328_v21 }
 0x472   :  { %v5707_v23 = vpop.eup %5706 }
 0x473   :  { %5105 = vmatmul.mubr.msk.bf16.vlgmr.msra.gmra.mxu0 %vm334_vm7, %v330_v22  ;;  %v329_v25 = vmul.f32 %v5707_v23, %v5703_v12 }
 0x474   :  { %5115 = vmatpush3.bf16.xpose.msra.mxu0 %v441_v24  ;;  %5116 = vmatprep.mubr.msk.bf16.mxu0 %vm5831_vm1, %v5830_v14 }
 0x475   :  { %v331_v27 = vpack.c.bf16 %v329_v25, %v329_v25  ;;  %5126 = vmatprep.subr.bf16.mxu0 %v5830_v14 }
 0x477   :  { %5111 = vmatmul.mubr.msk.bf16.vlgmr.msra.gmra.mxu1 %vm334_vm7, %v331_v27 }
 0x478   :  { %5121 = vmatpush3.bf16.xpose.msra.mxu1 %v491_v28  ;;  %5122 = vmatprep.mubr.msk.bf16.mxu1 %vm5831_vm1, %v5830_v14 }
 0x479   :  { %5132 = vmatprep.subr.bf16.mxu1 %v5830_v14 }
 0x47b   :  { %5117 = vmatmul.mubr.msk.bf16.vlgmr.msra.gmra.mxu0 %vm209_vm3, %v434_v29 }
 0x47c   :  { %5128 = vmatprep.mubr.msk.bf16.mxu0 %vm5831_vm1, %v5830_v14 }
 0x47f   :  { %5123 = vmatmul.mubr.msk.bf16.vlgmr.msra.gmra.mxu1 %vm209_vm3, %v484_v30 }
 0x480   :  { %5134 = vmatprep.mubr.msk.bf16.mxu1 %vm5831_vm1, %v5830_v14 }
 0x533   :  { %v6032_v31 = vpop.f32.mrf.mxu0 }
 0x535   :  { %v5106_v32 = vpop.f32.mrf.mxu0 }
 0x537   :  { %v382_v33 = vpop.f32.mrf.mxu0  ;;  %v6034_v34 = vpop.f32.mrf.mxu1 }
 0x539   :  { %v5107_v35 = vpop.f32.mrf.mxu0  ;;  %v5112_v37 = vpop.f32.mrf.mxu1 }
 0x53b   :  { %v430_v38 = vpop.f32.mrf.mxu1  ;;  %v477_v39 = vpop.f32.mrf.mxu0 }
 0x53c   :  { %v533_v41 = vmul.f32 0.35355338, %v477_v39 }
 0x53d   :  { %v5113_v42 = vpop.f32.mrf.mxu1  ;;  %v5118_v43 = vpop.f32.mrf.mxu0 }
 0x53e   :  { %v535_v44 = vsel %vm307_vm4, %v533_v41, -inf }
 0x53f   :  { %v527_v45 = vpop.f32.mrf.mxu1  ;;  %536 = vmax.xlane.f32.xlu0 %v535_v44  ;;  %v480_v46 = vpop.f32.mrf.mxu0 }
 0x540   :  { %v534_v47 = vmul.f32 0.35355338, %v527_v45 }
 0x541   :  { %v5119_v48 = vpop.f32.mrf.mxu0  ;;  %v5124_v49 = vpop.f32.mrf.mxu1 }
 0x542   :  { %v538_v50 = vsel %vm307_vm4, %v534_v47, -inf }
 0x543   :  { %539 = vmax.xlane.f32.xlu1 %v538_v50  ;;  %v530_v51 = vpop.f32.mrf.mxu1 }
 0x545   :  { %v5125_v52 = vpop.f32.mrf.mxu1 }
 0x554   :  { %607 = vrot.lane.b32.xlu1 %v5978_v40, %s6892_s19 }
 0x558   :  { %657 = vrot.lane.b32.xlu1 %v5974_v36, %s6890_s20 }
 0x55c   :  { %707 = vrot.lane.b32.xlu1 %v5978_v40, %s6890_s20 }
 0x560   :  { %705 = vrot.lane.b32.xlu1 %v5978_v40, %s6888_s21 }
 0x5c8   :  { %v537_v53 = vpop.xlane.xlu0 %536 }
 0x5c9   :  { %v541_v54 = vsub.f32 %v533_v41, %v537_v53 }
 0x5cb   :  { %v543_v55 = vmul.f32 1.442695, %v541_v54 }
 0x5cc   :  { %v540_v56 = vpop.xlane.xlu1 %539 }
 0x5cd   :  { %5708 = vpow2.f32 %v543_v55  ;;  %v542_v57 = vsub.f32 %v534_v47, %v540_v56 }
 0x5cf   :  { %v545_v58 = vmul.f32 1.442695, %v542_v57 }
 0x5d0   :  { %v608_v59 = vpop.permute.xlu1 %607 }
 0x5d1   :  { %5710 = vpow2.f32 %v545_v58  ;;  %v613_v60 = vand.u32 %v608_v59, %v6000_v3 }
 0x5d3   :  { %5133 = vmatpush3.bf16.msra.mxu1 %v613_v60 }
 0x5d4   :  { %5144 = vmatprep.subr.bf16.mxu1 %v5830_v14  ;;  %v658_v9 = vpop.permute.xlu1 %657 }
 0x5d5   :  { %v663_v13 = vsel %vm209_vm3, %v658_v9, 0 }
 0x5d8   :  { %v708_v16 = vpop.permute.xlu1 %707 }
 0x5d9   :  { %v713_v18 = vsel %vm209_vm3, %v708_v16, 0 }
 0x5da   :  { %v5709_v61 = vpop.eup %5708 }
 0x5db   :  { %v547_v62 = vsel %vm307_vm4, %v5709_v61, 0.0 }
 0x5dc   :  { %548 = vadd.xlane.f32.xlu0 %v547_v62  ;;  %v706_v20 = vpop.permute.xlu1 %705 }
 0x5de   :  { %v5711_v63 = vpop.eup %5710 }
 0x5df   :  { %v550_v2 = vsel %vm307_vm4, %v5711_v63, 0.0 }
 0x5e0   :  { %551 = vadd.xlane.f32.xlu0 %v550_v2 }
 0x5f6   :  { %559 = vrot.lane.b32.xlu0 %v5974_v36, %s6892_s19 }
 0x5fa   :  { %655 = vrot.lane.b32.xlu0 %v5974_v36, %s6888_s21 }
 0x665   :  { %v549_v4 = vpop.xlane.xlu0 %548 }
 0x666   :  { %5712 = vrcp.f32 %v549_v4 }
 0x669   :  { %v552_v5 = vpop.xlane.xlu0 %551 }
 0x66a   :  { %5714 = vrcp.f32 %v552_v5 }
 0x66d   :  { %v560_v6 = vpop.permute.xlu0 %559 }
 0x66e   :  { %v565_v7 = vand.u32 %v560_v6, %v6000_v3 }
 0x670   :  { %5127 = vmatpush3.bf16.msra.mxu0 %v565_v7 }
 0x671   :  { %5138 = vmatprep.subr.bf16.mxu0 %v5830_v14  ;;  %v656_v19 = vpop.permute.xlu0 %655 }
 0x673   :  { %v5713_v8 = vpop.eup %5712 }
 0x674   :  { %v555_v10 = vmul.f32 %v5713_v8, %v5709_v61 }
 0x676   :  { %v557_v11 = vpack.c.bf16 %v555_v10, %v555_v10 }
 0x677   :  { %v5715_v12 = vpop.eup %5714 }
 0x678   :  { %5129 = vmatmul.mubr.msk.bf16.vlgmr.msra.gmra.mxu0 %vm334_vm7, %v557_v11  ;;  %v556_v15 = vmul.f32 %v5715_v12, %v5711_v63 }
 0x679   :  { %5139 = vmatpush3.bf16.xpose.msra.mxu0 %v663_v13  ;;  %5140 = vmatprep.mubr.msk.bf16.mxu0 %vm5831_vm1, %v5830_v14 }
 0x67a   :  { %v558_v17 = vpack.c.bf16 %v556_v15, %v556_v15  ;;  %5150 = vmatprep.subr.bf16.mxu0 %v5830_v14 }
 0x67c   :  { %5135 = vmatmul.mubr.msk.bf16.vlgmr.msra.gmra.mxu1 %vm334_vm7, %v558_v17 }
 0x67d   :  { %5145 = vmatpush3.bf16.xpose.msra.mxu1 %v713_v18  ;;  %5146 = vmatprep.mubr.msk.bf16.mxu1 %vm5831_vm1, %v5830_v14 }
 0x67e   :  { %5156 = vmatprep.subr.bf16.mxu1 %v5830_v14 }
 0x680   :  { %5141 = vmatmul.mubr.msk.bf16.vlgmr.msra.gmra.mxu0 %vm209_vm3, %v656_v19 }
 0x681   :  { %5152 = vmatprep.mubr.msk.bf16.mxu0 %vm5831_vm1, %v5830_v14 }
 0x684   :  { %5147 = vmatmul.mubr.msk.bf16.vlgmr.msra.gmra.mxu1 %vm209_vm3, %v706_v20 }
 0x685   :  { %5158 = vmatprep.mubr.msk.bf16.mxu1 %vm5831_vm1, %v5830_v14 }
 0x738   :  { %v6072_v21 = vpop.f32.mrf.mxu0 }
 0x73a   :  { %v5130_v22 = vpop.f32.mrf.mxu0 }
 0x73c   :  { %v604_v23 = vpop.f32.mrf.mxu0  ;;  %v6074_v24 = vpop.f32.mrf.mxu1 }
 0x73d   :  { %v5620_v25 = vpack.i.bf16 %v6074_v24, %v6072_v21 }
 0x73e   :  { %v5131_v26 = vpop.f32.mrf.mxu0  ;;  %v5136_v27 = vpop.f32.mrf.mxu1 }
 0x740   :  { %v652_v28 = vpop.f32.mrf.mxu1  ;;  %v699_v29 = vpop.f32.mrf.mxu0 }
 0x741   :  { %v755_v30 = vmul.f32 0.35355338, %v699_v29 }
 0x742   :  { %v5137_v32 = vpop.f32.mrf.mxu1  ;;  %v5142_v33 = vpop.f32.mrf.mxu0 }
 0x743   :  { %v757_v35 = vsel %vm307_vm4, %v755_v30, -inf }
 0x744   :  { %v749_v37 = vpop.f32.mrf.mxu1  ;;  %758 = vmax.xlane.f32.xlu0 %v757_v35  ;;  %v702_v38 = vpop.f32.mrf.mxu0 }
 0x745   :  { %v756_v39 = vmul.f32 0.35355338, %v749_v37 }
 0x746   :  { %v5143_v41 = vpop.f32.mrf.mxu0  ;;  %v5148_v42 = vpop.f32.mrf.mxu1 }
 0x747   :  { %v760_v43 = vsel %vm307_vm4, %v756_v39, -inf }
 0x748   :  { %761 = vmax.xlane.f32.xlu1 %v760_v43  ;;  %v752_v44 = vpop.f32.mrf.mxu1 }
 0x74a   :  { %v5149_v45 = vpop.f32.mrf.mxu1 }
 0x759   :  { %829 = vrot.lane.b32.xlu1 %v5978_v40, %s6886_s22 }
 0x75d   :  { %879 = vrot.lane.b32.xlu1 %v5974_v36, %s6884_s23 }
 0x761   :  { %929 = vrot.lane.b32.xlu1 %v5978_v40, %s6884_s23 }
 0x765   :  { %927 = vrot.lane.b32.xlu1 %v5978_v40, %s6882_s24 }
 0x7cd   :  { %v759_v46 = vpop.xlane.xlu0 %758 }
 0x7ce   :  { %v763_v47 = vsub.f32 %v755_v30, %v759_v46 }
 0x7d0   :  { %v765_v48 = vmul.f32 1.442695, %v763_v47 }
 0x7d1   :  { %v762_v49 = vpop.xlane.xlu1 %761 }
 0x7d2   :  { %5716 = vpow2.f32 %v765_v48  ;;  %v764_v50 = vsub.f32 %v756_v39, %v762_v49 }
 0x7d4   :  { %v767_v51 = vmul.f32 1.442695, %v764_v50 }
 0x7d5   :  { %v830_v52 = vpop.permute.xlu1 %829 }
 0x7d6   :  { %5718 = vpow2.f32 %v767_v51  ;;  %v835_v53 = vand.u32 %v830_v52, %v6000_v3 }
 0x7d8   :  { %5157 = vmatpush3.bf16.msra.mxu1 %v835_v53 }
 0x7d9   :  { %5168 = vmatprep.subr.bf16.mxu1 %v5830_v14  ;;  %v880_v63 = vpop.permute.xlu1 %879 }
 0x7da   :  { %v885_v6 = vsel %vm209_vm3, %v880_v63, 0 }
 0x7dd   :  { %v930_v8 = vpop.permute.xlu1 %929 }
 0x7de   :  { %v935_v10 = vsel %vm209_vm3, %v930_v8, 0 }
 0x7df   :  { %v5717_v54 = vpop.eup %5716 }
 0x7e0   :  { %v769_v55 = vsel %vm307_vm4, %v5717_v54, 0.0 }
 0x7e1   :  { %770 = vadd.xlane.f32.xlu0 %v769_v55  ;;  %v928_v12 = vpop.permute.xlu1 %927 }
 0x7e3   :  { %v5719_v56 = vpop.eup %5718 }
 0x7e4   :  { %v772_v57 = vsel %vm307_vm4, %v5719_v56, 0.0 }
 0x7e5   :  { %773 = vadd.xlane.f32.xlu0 %v772_v57 }
 0x7fb   :  { %781 = vrot.lane.b32.xlu0 %v5974_v36, %s6886_s22 }
 0x7ff   :  { %877 = vrot.lane.b32.xlu0 %v5974_v36, %s6882_s24  ;;  %s6896_s24 = smov 8  }
 0x86a   :  { %v771_v58 = vpop.xlane.xlu0 %770 }
 0x86b   :  { %5720 = vrcp.f32 %v771_v58 }
 0x86e   :  { %v774_v59 = vpop.xlane.xlu0 %773 }
 0x86f   :  { %5722 = vrcp.f32 %v774_v59  ;;  %v5668_v59 = vld [vmem:[%s6862_s4 + $0x8] sm:$0xff]  }
 0x872   :  { %v782_v60 = vpop.permute.xlu0 %781 }
 0x873   :  { %v787_v61 = vand.u32 %v782_v60, %v6000_v3  ;;  %v5669_v60 = vld [vmem:[%s6862_s4] sm:$0xff]  }
 0x875   :  { %5151 = vmatpush3.bf16.msra.mxu0 %v787_v61 }
 0x876   :  { %5162 = vmatprep.subr.bf16.mxu0 %v5830_v14  ;;  %v878_v11 = vpop.permute.xlu0 %877 }
 0x878   :  { %v5721_v62 = vpop.eup %5720 }
 0x879   :  { %v777_v2 = vmul.f32 %v5721_v62, %v5717_v54 }
 0x87b   :  { %v779_v4 = vpack.c.bf16 %v777_v2, %v777_v2 }
 0x87c   :  { %v5723_v5 = vpop.eup %5722 }
 0x87d   :  { %5153 = vmatmul.mubr.msk.bf16.vlgmr.msra.gmra.mxu0 %vm334_vm7, %v779_v4  ;;  %v778_v7 = vmul.f32 %v5723_v5, %v5719_v56 }
 0x87e   :  { %5163 = vmatpush3.bf16.xpose.msra.mxu0 %v885_v6  ;;  %5164 = vmatprep.mubr.msk.bf16.mxu0 %vm5831_vm1, %v5830_v14 }
 0x87f   :  { %v780_v9 = vpack.c.bf16 %v778_v7, %v778_v7  ;;  %5174 = vmatprep.subr.bf16.mxu0 %v5830_v14 }
 0x881   :  { %5159 = vmatmul.mubr.msk.bf16.vlgmr.msra.gmra.mxu1 %vm334_vm7, %v780_v9 }
 0x882   :  { %5169 = vmatpush3.bf16.xpose.msra.mxu1 %v935_v10  ;;  %5170 = vmatprep.mubr.msk.bf16.mxu1 %vm5831_vm1, %v5830_v14 }
 0x883   :  { %5180 = vmatprep.subr.bf16.mxu1 %v5830_v14 }
 0x885   :  { %5165 = vmatmul.mubr.msk.bf16.vlgmr.msra.gmra.mxu0 %vm209_vm3, %v878_v11 }
 0x886   :  { %5176 = vmatprep.mubr.msk.bf16.mxu0 %vm5831_vm1, %v5830_v14 }
 0x889   :  { %5171 = vmatmul.mubr.msk.bf16.vlgmr.msra.gmra.mxu1 %vm209_vm3, %v928_v12 }
 0x88a   :  { %5182 = vmatprep.mubr.msk.bf16.mxu1 %vm5831_vm1, %v5830_v14 }
 0x93d   :  { %v823_v13 = vpop.f32.mrf.mxu0 }
 0x93f   :  { %v5154_v15 = vpop.f32.mrf.mxu0 }
 0x941   :  { %v826_v16 = vpop.f32.mrf.mxu0  ;;  %v871_v17 = vpop.f32.mrf.mxu1 }
 0x942   :  { %v5625_v41 = vpack.i.bf16 %v871_v17, %v823_v13 }
 0x943   :  { %v5155_v18 = vpop.f32.mrf.mxu0  ;;  %v5160_v19 = vpop.f32.mrf.mxu1 }
 0x945   :  { %v874_v20 = vpop.f32.mrf.mxu1  ;;  %v921_v22 = vpop.f32.mrf.mxu0 }
 0x946   :  { %v977_v23 = vmul.f32 0.35355338, %v921_v22 }
 0x947   :  { %v5161_v26 = vpop.f32.mrf.mxu1  ;;  %v5166_v27 = vpop.f32.mrf.mxu0 }
 0x948   :  { %v979_v28 = vsel %vm307_vm4, %v977_v23, -inf }
 0x949   :  { %v971_v29 = vpop.f32.mrf.mxu1  ;;  %980 = vmax.xlane.f32.xlu0 %v979_v28  ;;  %v924_v30 = vpop.f32.mrf.mxu0 }
 0x94a   :  { %v978_v32 = vmul.f32 0.35355338, %v971_v29 }
 0x94b   :  { %v5167_v33 = vpop.f32.mrf.mxu0  ;;  %v5172_v35 = vpop.f32.mrf.mxu1 }
 0x94c   :  { %v982_v37 = vsel %vm307_vm4, %v978_v32, -inf }
 0x94d   :  { %983 = vmax.xlane.f32.xlu1 %v982_v37  ;;  %v974_v38 = vpop.f32.mrf.mxu1 }
 0x94f   :  { %v5173_v39 = vpop.f32.mrf.mxu1 }
 0x95e   :  { %1051 = vrot.lane.b32.xlu1 %v5978_v40, %s6880_s25 }
 0x962   :  { %5621 = vrot.lane.b32.xlu1 %v5620_v25, %s6876_s26 }
 0x966   :  { %5626 = vrot.lane.b32.xlu1 %v5625_v41, %s6874_s27  ;;  %s6895_s27 = smov 40  }
 0x9d2   :  { %v981_v42 = vpop.xlane.xlu0 %980 }
 0x9d3   :  { %v985_v43 = vsub.f32 %v977_v23, %v981_v42 }
 0x9d5   :  { %v987_v44 = vmul.f32 1.442695, %v985_v43 }
 0x9d6   :  { %v984_v45 = vpop.xlane.xlu1 %983 }
 0x9d7   :  { %5724 = vpow2.f32 %v987_v44  ;;  %v986_v46 = vsub.f32 %v978_v32, %v984_v45 }
 0x9d9   :  { %v989_v47 = vmul.f32 1.442695, %v986_v46 }
 0x9da   :  { %v1052_v48 = vpop.permute.xlu1 %1051 }
 0x9db   :  { %5726 = vpow2.f32 %v989_v47  ;;  %v1057_v40 = vand.u32 %v1052_v48, %v6000_v3 }
 0x9dd   :  { %5181 = vmatpush3.bf16.msra.mxu1 %v1057_v40 }
 0x9de   :  { %5194 = vmatprep.subr.bf16.mxu1 %v5830_v14  ;;  %v5622_v9 = vpop.permute.xlu1 %5621 }
 0x9df   :  { %v5624_v11 = vunpack.i.h.bf16 %v5622_v9  ;;  %v5623_v12 = vunpack.i.l.bf16 %v5622_v9  ;;  %v5672_v9 = vld [vmem:[%s6867_s10 + $0x18] sm:$0xff]  }
 0x9e1   :  { %v1124_v17 = vsel %vm209_vm3, %v6034_v34, %v5624_v11  ;;  %v1123_v18 = vsel %vm209_vm3, %v6032_v31, %v5623_v12  ;;  %v4727_v31 = vld [vmem:[%s6863_s5] ss:$0 sm:$0xff]  ;;  %v5674_v11 = vld [vmem:[%s6867_s10 + $0x8] sm:$0xff]  }
 0x9e2   :  { %v5627_v10 = vpop.permute.xlu1 %5626  ;;  %v5675_v12 = vld [vmem:[%s6867_s10] sm:$0xff]  }
 0x9e3   :  { %v5629_v13 = vunpack.i.h.bf16 %v5627_v10  ;;  %v5628_v15 = vunpack.i.l.bf16 %v5627_v10  ;;  %v5673_v10 = vld [vmem:[%s6867_s10 + $0x10] sm:$0xff]  }
 0x9e4   :  { %v5725_v21 = vpop.eup %5724 }
 0x9e5   :  { %v991_v24 = vsel %vm307_vm4, %v5725_v21, 0.0  ;;  %v1127_v22 = vsel %vm1125_vm8, %v1124_v17, %v5629_v13  ;;  %v1126_v23 = vsel %vm1125_vm8, %v1123_v18, %v5628_v15  ;;  %v4734_v13 = vld [vmem:[%s6868_s9] ss:$0 sm:$0xff] }
 0x9e6   :  { %992 = vadd.xlane.f32.xlu0 %v991_v24 }
 0x9e8   :  { %v5727_v25 = vpop.eup %5726 }
 0x9e9   :  { %v994_v49 = vsel %vm307_vm4, %v5727_v25, 0.0 }
 0x9ea   :  { %995 = vadd.xlane.f32.xlu0 %v994_v49 }
 0xa00   :  { %1003 = vrot.lane.b32.xlu0 %v5974_v36, %s6880_s25  ;;  %s6897_s25 = smov 16  }
 0xa6f   :  { %v993_v50 = vpop.xlane.xlu0 %992 }
 0xa70   :  { %5728 = vrcp.f32 %v993_v50 }
 0xa73   :  { %v996_v51 = vpop.xlane.xlu0 %995 }
 0xa74   :  { %5730 = vrcp.f32 %v996_v51  ;;  %v5670_v51 = vld [vmem:[%s6864_s8 + $0x8] sm:$0xff]  }
 0xa77   :  { %v1004_v52 = vpop.permute.xlu0 %1003 }
 0xa78   :  { %v1009_v53 = vand.u32 %v1004_v52, %v6000_v3  ;;  %v5671_v52 = vld [vmem:[%s6864_s8] sm:$0xff]  }
 0xa7a   :  { %5175 = vmatpush3.bf16.msra.mxu0 %v1009_v53 }
 0xa7b   :  { %5186 = vmatprep.subr.bf16.mxu0 %v5830_v14 }
 0xa7d   :  { %v5729_v54 = vpop.eup %5728 }
 0xa7e   :  { %v999_v55 = vmul.f32 %v5729_v54, %v5725_v21 }
 0xa80   :  { %v1001_v56 = vpack.c.bf16 %v999_v55, %v999_v55 }
 0xa81   :  { %v5731_v57 = vpop.eup %5730 }
 0xa82   :  { %5177 = vmatmul.mubr.msk.bf16.vlgmr.msra.gmra.mxu0 %vm334_vm7, %v1001_v56  ;;  %v1000_v58 = vmul.f32 %v5731_v57, %v5727_v25 }
 0xa83   :  { %5190 = vmatprep.mubr.msk.bf16.mxu0 %vm5831_vm1, %v5830_v14  ;;  %5187 = vmatpush3.bf16.msra.mxu0 %v5668_v59 }
 0xa84   :  { %v1002_v36 = vpack.c.bf16 %v1000_v58, %v1000_v58  ;;  %5188 = vmatprep.subr.bf16.mxu0 %v5830_v14 }
 0xa86   :  { %5183 = vmatmul.mubr.msk.bf16.vlgmr.msra.gmra.mxu1 %vm334_vm7, %v1002_v36 }
 0xa87   :  { %5198 = vmatprep.mubr.msk.bf16.mxu1 %vm5831_vm1, %v5830_v14  ;;  %5195 = vmatpush3.bf16.msra.mxu1 %v5668_v59  ;;  %v4732_v59 = vld [vmem:[%s6865_s6] ss:$0 sm:$0xff] }
 0xa88   :  { %5196 = vmatprep.subr.bf16.mxu1 %v5830_v14  ;;  %5189 = vmatpush3.bf16.msra.mxu0 %v5669_v60 }
 0xa89   :  { %5202 = vmatprep.subr.bf16.mxu0 %v5830_v14 }
 0xa8b   :  { %5197 = vmatpush3.bf16.msra.mxu1 %v5669_v60 }
 0xa8c   :  { %5210 = vmatprep.subr.bf16.mxu1 %v5830_v14 }
 0xb42   :  { %v1045_v61 = vpop.f32.mrf.mxu0 }
 0xb44   :  { %v5178_v62 = vpop.f32.mrf.mxu0 }
 0xb46   :  { %v1048_v63 = vpop.f32.mrf.mxu0  ;;  %v1093_v2 = vpop.f32.mrf.mxu1 }
 0xb47   :  { %v5630_v4 = vpack.i.bf16 %v1093_v2, %v1045_v61  ;;  %v4733_v61 = vld [vmem:[%s6866_s7] ss:$0 sm:$0xff] }
 0xb48   :  { %v5179_v5 = vpop.f32.mrf.mxu0  ;;  %v5184_v6 = vpop.f32.mrf.mxu1 }
 0xb49   :  { %5631 = vrot.lane.b32.xlu0 %v5630_v4, %s6878_s28  ;;  %s6894_s28 = smov 104  }
 0xb4a   :  { %v1096_v7 = vpop.f32.mrf.mxu1 }
 0xb4c   :  { %v5185_v8 = vpop.f32.mrf.mxu1 }
 0xbbb   :  { %v5632_v16 = vpop.permute.xlu0 %5631 }
 0xbbc   :  { %v5634_v19 = vunpack.i.h.bf16 %v5632_v16  ;;  %v5633_v20 = vunpack.i.l.bf16 %v5632_v16 }
 0xbbe   :  { %v1130_v26 = vsel %vm1128_vm9, %v1127_v22, %v5634_v19  ;;  %v1129_v27 = vsel %vm1128_vm9, %v1126_v23, %v5633_v20 }
 0xbbf   :  { %v1132_v28 = vpack.c.bf16 %v1130_v26, %v1130_v26  ;;  %v1131_v29 = vpack.c.bf16 %v1129_v27, %v1129_v27 }
 0xbc1   :  { %5191 = vmatmul.mubr.msk.bf16.vlgmr.msra.gmra.mxu0 %vm117_vm2, %v1131_v29  ;;  %5199 = vmatmul.mubr.msk.bf16.vlgmr.msra.gmra.mxu1 %vm117_vm2, %v1132_v28 }
 0xbc2   :  { %5206 = vmatprep.mubr.msk.bf16.mxu0 %vm5831_vm1, %v5830_v14  ;;  %5214 = vmatprep.mubr.msk.bf16.mxu1 %vm5831_vm1, %v5830_v14 }
 0xbc3   :  { %5203 = vmatpush3.bf16.msra.mxu0 %v5670_v51  ;;  %5211 = vmatpush3.bf16.msra.mxu1 %v5670_v51 }
 0xbc4   :  { %5204 = vmatprep.subr.bf16.mxu0 %v5830_v14  ;;  %5212 = vmatprep.subr.bf16.mxu1 %v5830_v14 }
 0xbc7   :  { %5205 = vmatpush3.bf16.msra.mxu0 %v5671_v52  ;;  %5213 = vmatpush3.bf16.msra.mxu1 %v5671_v52 }
 0xbc8   :  { %5218 = vmatprep.subr.bf16.mxu0 %v5830_v14  ;;  %5230 = vmatprep.subr.bf16.mxu1 %v5830_v14 }
 0xc81   :  { %v1193_v34 = vpop.f32.mrf.mxu0  ;;  %v1236_v30 = vpop.f32.mrf.mxu1 }
 0xc82   :  { %v1194_v32 = vadd.f32 %v4727_v31, %v1193_v34  ;;  %v1237_v33 = vadd.f32 %v4727_v31, %v1236_v30 }
 0xc83   :  { %v5192_v35 = vpop.f32.mrf.mxu0  ;;  %v5200_v37 = vpop.f32.mrf.mxu1 }
 0xc84   :  { %v6166_v38 = vadd.f32 %v1194_v32, %v5931_v0  ;;  %v6169_v39 = vadd.f32 %v1237_v33, %v5936_v1 }
 0xc85   :  { %v1196_v41 = vpop.f32.mrf.mxu0  ;;  %v1239_v42 = vpop.f32.mrf.mxu1 }
 0xc86   :  { %v1249_v43 = vsel %vm55_vm0, %v6169_v39, 0.0  ;;  %v1246_v44 = vsel %vm55_vm0, %v6166_v38, 0.0 }
 0xc87   :  { %1250 = vadd.xlane.f32.xlu0 %v1249_v43  ;;  %v5201_v45 = vpop.f32.mrf.mxu1  ;;  %1247 = vadd.xlane.f32.xlu1 %v1246_v44  ;;  %v5193_v46 = vpop.f32.mrf.mxu0  ;;  %v4739_v44 = vld [vmem:[%s6869_s11] ss:$0 sm:$0xff] }
 0xd10   :  { %v1251_v47 = vpop.xlane.xlu0 %1250  ;;  %v1248_v48 = vpop.xlane.xlu1 %1247 }
 0xd11   :  { %v1253_v40 = vmul.f32 0.03125, %v1251_v47  ;;  %v1252_v0 = vmul.f32 0.03125, %v1248_v48 }
 0xd13   :  { %v1255_v21 = vsub.f32 %v6169_v39, %v1253_v40  ;;  %v1254_v1 = vsub.f32 %v6166_v38, %v1252_v0 }
 0xd15   :  { %v1256_v24 = vmul.f32 %v1254_v1, %v1254_v1  ;;  %v1257_v49 = vmul.f32 %v1255_v21, %v1255_v21 }
 0xd17   :  { %v1258_v25 = vsel %vm55_vm0, %v1256_v24, 0.0  ;;  %v1261_v50 = vsel %vm55_vm0, %v1257_v49, 0.0 }
 0xd18   :  { %1259 = vadd.xlane.f32.xlu0 %v1258_v25 }
 0xd1c   :  { %1262 = vadd.xlane.f32.xlu0 %v1261_v50 }
 0xda1   :  { %v1260_v53 = vpop.xlane.xlu0 %1259 }
 0xda2   :  { %v1264_v54 = vmul.f32 0.03125, %v1260_v53 }
 0xda4   :  { %v1266_v55 = vadd.f32 1e-05, %v1264_v54 }
 0xda5   :  { %v1263_v56 = vpop.xlane.xlu0 %1262 }
 0xda6   :  { %5732 = vrsqrt.f32 %v1266_v55  ;;  %v1265_v57 = vmul.f32 0.03125, %v1263_v56 }
 0xda8   :  { %v1267_v58 = vadd.f32 1e-05, %v1265_v57 }
 0xdaa   :  { %5734 = vrsqrt.f32 %v1267_v58 }
 0xdb3   :  { %v5733_v36 = vpop.eup %5732 }
 0xdb4   :  { %v1270_v60 = vmul.f32 %v5733_v36, %v1254_v1 }
 0xdb6   :  { %v1278_v62 = vmul.f32 %v4732_v59, %v1270_v60  ;;  %v5676_v60 = vld [vmem:[%s6859_s3 + $0x18] sm:$0xff]  }
 0xdb7   :  { %v5735_v63 = vpop.eup %5734 }
 0xdb8   :  { %v1271_v2 = vmul.f32 %v5735_v63, %v1255_v21  ;;  %v1286_v4 = vadd.f32 %v4733_v61, %v1278_v62 }
 0xdba   :  { %v1288_v5 = vpack.c.bf16 %v1286_v4, %v1286_v4  ;;  %v1279_v6 = vmul.f32 %v4732_v59, %v1271_v2 }
 0xdbc   :  { %5207 = vmatmul.mubr.msk.bf16.vlgmr.msra.gmra.mxu0 %vm117_vm2, %v1288_v5  ;;  %v1287_v7 = vadd.f32 %v4733_v61, %v1279_v6  ;;  %v5677_v61 = vld [vmem:[%s6859_s3 + $0x10] sm:$0xff]  }
 0xdbd   :  { %5226 = vmatprep.mubr.msk.bf16.mxu0 %vm5831_vm1, %v5830_v14  ;;  %5219 = vmatpush3.bf16.msra.mxu0 %v5672_v9 }
 0xdbe   :  { %v1289_v8 = vpack.c.bf16 %v1287_v7, %v1287_v7  ;;  %5220 = vmatprep.subr.bf16.mxu0 %v5830_v14 }
 0xdc0   :  { %5215 = vmatmul.mubr.msk.bf16.vlgmr.msra.gmra.mxu1 %vm117_vm2, %v1289_v8  ;;  %v4748_v8 = vld [vmem:[%s6860_s1 + $0x1] ss:$0 sm:$0xff] }
 0xdc1   :  { %5238 = vmatprep.mubr.msk.bf16.mxu1 %vm5831_vm1, %v5830_v14  ;;  %5231 = vmatpush3.bf16.msra.mxu1 %v5672_v9 }
 0xdc2   :  { %5232 = vmatprep.subr.bf16.mxu1 %v5830_v14  ;;  %5221 = vmatpush3.bf16.msra.mxu0 %v5673_v10 }
 0xdc3   :  { %5222 = vmatprep.subr.bf16.mxu0 %v5830_v14 }
 0xdc5   :  { %5233 = vmatpush3.bf16.msra.mxu1 %v5673_v10  ;;  %v4749_v10 = vld [vmem:[%s6861_s2 + $0x1] ss:$0 sm:$0xff] }
 0xdc6   :  { %5234 = vmatprep.subr.bf16.mxu1 %v5830_v14  ;;  %5223 = vmatpush3.bf16.msra.mxu0 %v5674_v11 }
 0xdc7   :  { %5224 = vmatprep.subr.bf16.mxu0 %v5830_v14 }
 0xdc9   :  { %5235 = vmatpush3.bf16.msra.mxu1 %v5674_v11 }
 0xdca   :  { %5236 = vmatprep.subr.bf16.mxu1 %v5830_v14  ;;  %5225 = vmatpush3.bf16.msra.mxu0 %v5675_v12 }
 0xdcb   :  { %5242 = vmatprep.subr.bf16.mxu0 %v5830_v14 }
 0xdcd   :  { %5237 = vmatpush3.bf16.msra.mxu1 %v5675_v12 }
 0xdce   :  { %5250 = vmatprep.subr.bf16.mxu1 %v5830_v14 }
 0xe7c   :  { %v1350_v15 = vpop.f32.mrf.mxu0 }
 0xe7d   :  { %v1351_v16 = vadd.f32 %v4734_v13, %v1350_v15 }
 0xe7e   :  { %v5208_v17 = vpop.f32.mrf.mxu0 }
 0xe7f   :  { %v1401_v18 = vmul.f32 0.70710677, %v1351_v16  ;;  %v1399_v34 = vmul.f32 0.5, %v1351_v16 }
 0xe80   :  { %v1353_v19 = vpop.f32.mrf.mxu0  ;;  %v1393_v20 = vpop.f32.mrf.mxu1 }
 0xe81   :  { %5736 = verf.f32 %v1401_v18  ;;  %v1394_v22 = vadd.f32 %v4734_v13, %v1393_v20 }
 0xe82   :  { %v5209_v23 = vpop.f32.mrf.mxu0  ;;  %v5216_v26 = vpop.f32.mrf.mxu1 }
 0xe83   :  { %v1402_v27 = vmul.f32 0.70710677, %v1394_v22  ;;  %v1400_v37 = vmul.f32 0.5, %v1394_v22 }
 0xe84   :  { %v1396_v28 = vpop.f32.mrf.mxu1 }
 0xe85   :  { %5738 = verf.f32 %v1402_v27 }
 0xe86   :  { %v5217_v29 = vpop.f32.mrf.mxu1 }
 0xe8e   :  { %v5737_v31 = vpop.eup %5736 }
 0xe8f   :  { %v1405_v30 = vadd.f32 1.0, %v5737_v31 }
 0xe91   :  { %v1407_v32 = vmul.f32 %v1405_v30, %v1399_v34 }
 0xe92   :  { %v5739_v33 = vpop.eup %5738 }
 0xe93   :  { %v1409_v35 = vpack.c.bf16 %v1407_v32, %v1407_v32  ;;  %v1406_v41 = vadd.f32 1.0, %v5739_v33 }
 0xe95   :  { %v1408_v42 = vmul.f32 %v1406_v41, %v1400_v37  ;;  %5227 = vmatmul.mubr.msk.bf16.vlgmr.msra.gmra.mxu0 %vm1450_vm10, %v1409_v35 }
 0xe96   :  { %5246 = vmatprep.mubr.msk.bf16.mxu0 %vm5831_vm1, %v5830_v14  ;;  %5243 = vmatpush3.bf16.msra.mxu0 %v5676_v60 }
 0xe97   :  { %v1410_v43 = vpack.c.bf16 %v1408_v42, %v1408_v42  ;;  %5244 = vmatprep.subr.bf16.mxu0 %v5830_v14 }
 0xe99   :  { %5239 = vmatmul.mubr.msk.bf16.vlgmr.msra.gmra.mxu1 %vm1450_vm10, %v1410_v43 }
 0xe9a   :  { %5254 = vmatprep.mubr.msk.bf16.mxu1 %vm5831_vm1, %v5830_v14  ;;  %5251 = vmatpush3.bf16.msra.mxu1 %v5676_v60 }
 0xe9b   :  { %5252 = vmatprep.subr.bf16.mxu1 %v5830_v14  ;;  %5245 = vmatpush3.bf16.msra.mxu0 %v5677_v61 }
 0xe9c   :  { %5258 = vmatprep.subr.bf16.mxu0 %v5830_v14 }
 0xe9e   :  { %5253 = vmatpush3.bf16.msra.mxu1 %v5677_v61 }
 0xe9f   :  { %5264 = vmatprep.subr.bf16.mxu1 %v5830_v14 }
 0xf55   :  { %v1488_v45 = vpop.f32.mrf.mxu0 }
 0xf56   :  { %v1489_v46 = vadd.f32 %v4739_v44, %v1488_v45 }
 0xf57   :  { %v5228_v47 = vpop.f32.mrf.mxu0 }
 0xf58   :  { %v6234_v48 = vadd.f32 %v1489_v46, %v6166_v38 }
 0xf59   :  { %v1491_v40 = vpop.f32.mrf.mxu0  ;;  %v1531_v0 = vpop.f32.mrf.mxu1 }
 0xf5a   :  { %v1532_v21 = vadd.f32 %v4739_v44, %v1531_v0  ;;  %v1543_v1 = vsel %vm55_vm0, %v6234_v48, 0.0 }
 0xf5b   :  { %v5240_v24 = vpop.f32.mrf.mxu1  ;;  %1544 = vadd.xlane.f32.xlu1 %v1543_v1  ;;  %v5229_v25 = vpop.f32.mrf.mxu0 }
 0xf5c   :  { %v6239_v49 = vadd.f32 %v1532_v21, %v6169_v39 }
 0xf5d   :  { %v1534_v50 = vpop.f32.mrf.mxu1 }
 0xf5e   :  { %v1546_v51 = vsel %vm55_vm0, %v6239_v49, 0.0 }
 0xf5f   :  { %1547 = vadd.xlane.f32.xlu0 %v1546_v51  ;;  %v5241_v52 = vpop.f32.mrf.mxu1 }
 0xfe4   :  { %v1545_v38 = vpop.xlane.xlu1 %1544 }
 0xfe5   :  { %v1549_v53 = vmul.f32 0.03125, %v1545_v38 }
 0xfe7   :  { %v1551_v54 = vsub.f32 %v6234_v48, %v1549_v53 }
 0xfe8   :  { %v1548_v55 = vpop.xlane.xlu0 %1547 }
 0xfe9   :  { %v1550_v56 = vmul.f32 0.03125, %v1548_v55  ;;  %v1553_v57 = vmul.f32 %v1551_v54, %v1551_v54 }
 0xfeb   :  { %v1552_v58 = vsub.f32 %v6239_v49, %v1550_v56  ;;  %v1555_v36 = vsel %vm55_vm0, %v1553_v57, 0.0 }
 0xfec   :  { %1556 = vadd.xlane.f32.xlu1 %v1555_v36 }
 0xfed   :  { %v1554_v39 = vmul.f32 %v1552_v58, %v1552_v58 }
 0xfef   :  { %v1558_v59 = vsel %vm55_vm0, %v1554_v39, 0.0 }
 0xff0   :  { %1559 = vadd.xlane.f32.xlu0 %v1558_v59 }
0x1075   :  { %v1557_v62 = vpop.xlane.xlu1 %1556 }
0x1076   :  { %v1561_v63 = vmul.f32 0.03125, %v1557_v62 }
0x1078   :  { %v1563_v2 = vadd.f32 1e-05, %v1561_v63 }
0x1079   :  { %v1560_v4 = vpop.xlane.xlu0 %1559 }
0x107a   :  { %5740 = vrsqrt.f32 %v1563_v2  ;;  %v1562_v5 = vmul.f32 0.03125, %v1560_v4 }
0x107c   :  { %v1564_v6 = vadd.f32 1e-05, %v1562_v5 }
0x107e   :  { %5742 = vrsqrt.f32 %v1564_v6 }
0x1087   :  { %v5741_v7 = vpop.eup %5740 }
0x1088   :  { %v1567_v9 = vmul.f32 %v5741_v7, %v1551_v54 }
0x108a   :  { %v1575_v11 = vmul.f32 %v4748_v8, %v1567_v9 }
0x108b   :  { %v5743_v12 = vpop.eup %5742 }
0x108c   :  { %v1568_v13 = vmul.f32 %v5743_v12, %v1552_v58  ;;  %v1583_v15 = vadd.f32 %v4749_v10, %v1575_v11 }
0x108e   :  { %v1585_v16 = vpack.c.bf16 %v1583_v15, %v1583_v15  ;;  %v1576_v17 = vmul.f32 %v4748_v8, %v1568_v13 }
0x1090   :  { %5247 = vmatmul.mubr.msk.bf16.vlgmr.msra.gmra.mxu0 %vm117_vm2, %v1585_v16  ;;  %v1584_v18 = vadd.f32 %v4749_v10, %v1576_v17 }
0x1091   :  { %5260 = vmatprep.mubr.msk.bf16.mxu0 %vm5831_vm1, %v5830_v14 }
0x1092   :  { %v1586_v19 = vpack.c.bf16 %v1584_v18, %v1584_v18 }
0x1094   :  { %5255 = vmatmul.mubr.msk.bf16.vlgmr.msra.gmra.mxu1 %vm117_vm2, %v1586_v19 }
0x1095   :  { %5266 = vmatprep.mubr.msk.bf16.mxu1 %vm5831_vm1, %v5830_v14 }
0x1150   :  { %v1641_v20 = vpop.f32.mrf.mxu0 }
0x1151   :  { %v6269_v22 = vpack.c.bf16 %v1641_v20, %v1641_v20 }
0x1152   :  { %v5248_v23 = vpop.f32.mrf.mxu0 }
0x1153   :  { %1693 = vrot.lane.b32.xlu1 %v6269_v22, %s5832_s30 }
0x1154   :  { %v1644_v26 = vpop.f32.mrf.mxu0  ;;  %v1684_v27 = vpop.f32.mrf.mxu1 }
0x1155   :  { %v6273_v28 = vpack.c.bf16 %v1684_v27, %v1684_v27 }
0x1156   :  { %v5249_v29 = vpop.f32.mrf.mxu0  ;;  %v5256_v31 = vpop.f32.mrf.mxu1 }
0x1157   :  { %1742 = vrot.lane.b32.xlu0 %v6273_v28, %s5832_s30 }
0x1158   :  { %v1687_v34 = vpop.f32.mrf.mxu1 }
0x115a   :  { %v5257_v30 = vpop.f32.mrf.mxu1 }
0x11c5   :  { %v1694_v32 = vpop.permute.xlu1 %1693 }
0x11c6   :  { %v1699_v33 = vsel %vm209_vm3, %v1694_v32, 0 }
0x11c7   :  { %5259 = vmatpush3.bf16.xpose.msra.mxu0 %v1699_v33 }
0x11c8   :  { %5270 = vmatprep.subr.bf16.mxu0 %v5830_v14 }
0x11c9   :  { %v1743_v35 = vpop.permute.xlu0 %1742 }
0x11ca   :  { %v1748_v37 = vsel %vm209_vm3, %v1743_v35, 0 }
0x11cb   :  { %5265 = vmatpush3.bf16.xpose.msra.mxu1 %v1748_v37 }
0x11cc   :  { %5276 = vmatprep.subr.bf16.mxu1 %v5830_v14 }
0x11ce   :  { %5261 = vmatmul.mubr.msk.bf16.vlgmr.msra.gmra.mxu0 %vm209_vm3, %v6269_v22 }
0x11cf   :  { %5272 = vmatprep.mubr.msk.bf16.mxu0 %vm5831_vm1, %v5830_v14 }
0x11d2   :  { %5267 = vmatmul.mubr.msk.bf16.vlgmr.msra.gmra.mxu1 %vm209_vm3, %v6273_v28 }
0x11d3   :  { %5278 = vmatprep.mubr.msk.bf16.mxu1 %vm5831_vm1, %v5830_v14 }
0x128e   :  { %v1735_v41 = vpop.f32.mrf.mxu0 }
0x128f   :  { %v1790_v42 = vmul.f32 0.35355338, %v1735_v41 }
0x1290   :  { %v5262_v43 = vpop.f32.mrf.mxu0 }
0x1291   :  { %v1792_v44 = vsel %vm307_vm4, %v1790_v42, -inf }
0x1292   :  { %v1784_v45 = vpop.f32.mrf.mxu1  ;;  %1793 = vmax.xlane.f32.xlu1 %v1792_v44  ;;  %v1738_v46 = vpop.f32.mrf.mxu0 }
0x1293   :  { %v1791_v47 = vmul.f32 0.35355338, %v1784_v45 }
0x1294   :  { %v5263_v40 = vpop.f32.mrf.mxu0  ;;  %v5268_v0 = vpop.f32.mrf.mxu1 }
0x1295   :  { %v1795_v21 = vsel %vm307_vm4, %v1791_v47, -inf }
0x1296   :  { %1796 = vmax.xlane.f32.xlu0 %v1795_v21  ;;  %v1787_v1 = vpop.f32.mrf.mxu1 }
0x1298   :  { %v5269_v24 = vpop.f32.mrf.mxu1 }
0x12a3   :  { %1816 = vrot.lane.b32.xlu1 %v6269_v22, %s5833_s16 }
0x131b   :  { %v1794_v25 = vpop.xlane.xlu1 %1793 }
0x131c   :  { %v1798_v50 = vsub.f32 %v1790_v42, %v1794_v25 }
0x131e   :  { %v1800_v51 = vmul.f32 1.442695, %v1798_v50 }
0x131f   :  { %v1797_v52 = vpop.xlane.xlu0 %1796  ;;  %v1817_v38 = vpop.permute.xlu1 %1816 }
0x1320   :  { %5744 = vpow2.f32 %v1800_v51  ;;  %v1799_v53 = vsub.f32 %v1791_v47, %v1797_v52  ;;  %v1822_v54 = vand.u32 %v1817_v38, %v6000_v3 }
0x1322   :  { %v1802_v55 = vmul.f32 1.442695, %v1799_v53  ;;  %5271 = vmatpush3.bf16.msra.mxu0 %v1822_v54 }
0x1323   :  { %5282 = vmatprep.subr.bf16.mxu0 %v5830_v14 }
0x1324   :  { %5746 = vpow2.f32 %v1802_v55 }
0x132d   :  { %v5745_v56 = vpop.eup %5744 }
0x132e   :  { %v1804_v57 = vsel %vm307_vm4, %v5745_v56, 0.0 }
0x132f   :  { %1805 = vadd.xlane.f32.xlu1 %v1804_v57 }
0x1331   :  { %v5747_v58 = vpop.eup %5746 }
0x1332   :  { %v1807_v36 = vsel %vm307_vm4, %v5747_v58, 0.0 }
0x1333   :  { %1808 = vadd.xlane.f32.xlu0 %v1807_v36 }
0x1340   :  { %1914 = vrot.lane.b32.xlu1 %v6269_v22, %s5834_s17 }
0x1344   :  { %1964 = vrot.lane.b32.xlu1 %v6273_v28, %s5834_s17 }
0x1348   :  { %1912 = vrot.lane.b32.xlu1 %v6269_v22, %s5836_s18 }
0x1349   :  { %1864 = vrot.lane.b32.xlu0 %v6273_v28, %s5833_s16 }
0x134d   :  { %1962 = vrot.lane.b32.xlu0 %v6273_v28, %s5836_s18 }
0x13b8   :  { %v1806_v39 = vpop.xlane.xlu1 %1805 }
0x13b9   :  { %5748 = vrcp.f32 %v1806_v39 }
0x13bc   :  { %v1809_v59 = vpop.xlane.xlu0 %1808  ;;  %v1915_v63 = vpop.permute.xlu1 %1914 }
0x13bd   :  { %5750 = vrcp.f32 %v1809_v59  ;;  %v1920_v6 = vsel %vm209_vm3, %v1915_v63, 0 }
0x13c0   :  { %v1865_v60 = vpop.permute.xlu0 %1864  ;;  %v1965_v8 = vpop.permute.xlu1 %1964 }
0x13c1   :  { %v1870_v61 = vand.u32 %v1865_v60, %v6000_v3  ;;  %v1970_v10 = vsel %vm209_vm3, %v1965_v8, 0 }
0x13c3   :  { %5277 = vmatpush3.bf16.msra.mxu1 %v1870_v61 }
0x13c4   :  { %5288 = vmatprep.subr.bf16.mxu1 %v5830_v14  ;;  %v1913_v11 = vpop.permute.xlu1 %1912  ;;  %v1963_v12 = vpop.permute.xlu0 %1962 }
0x13c6   :  { %v5749_v62 = vpop.eup %5748 }
0x13c7   :  { %v1812_v2 = vmul.f32 %v5749_v62, %v5745_v56 }
0x13c9   :  { %v1814_v4 = vpack.c.bf16 %v1812_v2, %v1812_v2 }
0x13ca   :  { %v5751_v5 = vpop.eup %5750 }
0x13cb   :  { %5273 = vmatmul.mubr.msk.bf16.vlgmr.msra.gmra.mxu0 %vm334_vm7, %v1814_v4  ;;  %v1813_v7 = vmul.f32 %v5751_v5, %v5747_v58 }
0x13cc   :  { %5283 = vmatpush3.bf16.xpose.msra.mxu0 %v1920_v6  ;;  %5284 = vmatprep.mubr.msk.bf16.mxu0 %vm5831_vm1, %v5830_v14 }
0x13cd   :  { %v1815_v9 = vpack.c.bf16 %v1813_v7, %v1813_v7  ;;  %5294 = vmatprep.subr.bf16.mxu0 %v5830_v14 }
0x13cf   :  { %5279 = vmatmul.mubr.msk.bf16.vlgmr.msra.gmra.mxu1 %vm334_vm7, %v1815_v9 }
0x13d0   :  { %5289 = vmatpush3.bf16.xpose.msra.mxu1 %v1970_v10  ;;  %5290 = vmatprep.mubr.msk.bf16.mxu1 %vm5831_vm1, %v5830_v14 }
0x13d1   :  { %5300 = vmatprep.subr.bf16.mxu1 %v5830_v14 }
0x13d3   :  { %5285 = vmatmul.mubr.msk.bf16.vlgmr.msra.gmra.mxu0 %vm209_vm3, %v1913_v11 }
0x13d4   :  { %5296 = vmatprep.mubr.msk.bf16.mxu0 %vm5831_vm1, %v5830_v14 }
0x13d7   :  { %5291 = vmatmul.mubr.msk.bf16.vlgmr.msra.gmra.mxu1 %vm209_vm3, %v1963_v12 }
0x13d8   :  { %5302 = vmatprep.mubr.msk.bf16.mxu1 %vm5831_vm1, %v5830_v14 }
0x148b   :  { %v6325_v13 = vpop.f32.mrf.mxu0 }
0x148d   :  { %v5274_v15 = vpop.f32.mrf.mxu0 }
0x148f   :  { %v1861_v16 = vpop.f32.mrf.mxu0  ;;  %v6327_v17 = vpop.f32.mrf.mxu1 }
0x1491   :  { %v5275_v18 = vpop.f32.mrf.mxu0  ;;  %v5280_v19 = vpop.f32.mrf.mxu1 }
0x1493   :  { %v1909_v20 = vpop.f32.mrf.mxu1  ;;  %v1956_v23 = vpop.f32.mrf.mxu0 }
0x1494   :  { %v2012_v26 = vmul.f32 0.35355338, %v1956_v23 }
0x1495   :  { %v5281_v27 = vpop.f32.mrf.mxu1  ;;  %v5286_v29 = vpop.f32.mrf.mxu0 }
0x1496   :  { %v2014_v31 = vsel %vm307_vm4, %v2012_v26, -inf }
0x1497   :  { %v2006_v34 = vpop.f32.mrf.mxu1  ;;  %2015 = vmax.xlane.f32.xlu1 %v2014_v31  ;;  %v1959_v30 = vpop.f32.mrf.mxu0 }
0x1498   :  { %v2013_v32 = vmul.f32 0.35355338, %v2006_v34 }
0x1499   :  { %v5287_v33 = vpop.f32.mrf.mxu0  ;;  %v5292_v35 = vpop.f32.mrf.mxu1 }
0x149a   :  { %v2017_v37 = vsel %vm307_vm4, %v2013_v32, -inf }
0x149b   :  { %2018 = vmax.xlane.f32.xlu0 %v2017_v37  ;;  %v2009_v41 = vpop.f32.mrf.mxu1 }
0x149d   :  { %v5293_v42 = vpop.f32.mrf.mxu1 }
0x14a8   :  { %2038 = vrot.lane.b32.xlu1 %v6269_v22, %s6892_s19 }
0x14ac   :  { %2136 = vrot.lane.b32.xlu1 %v6269_v22, %s6890_s20 }
0x14b0   :  { %2186 = vrot.lane.b32.xlu1 %v6273_v28, %s6890_s20 }
0x14b4   :  { %2134 = vrot.lane.b32.xlu1 %v6269_v22, %s6888_s21 }
0x1520   :  { %v2016_v43 = vpop.xlane.xlu1 %2015 }
0x1521   :  { %v2020_v44 = vsub.f32 %v2012_v26, %v2016_v43 }
0x1523   :  { %v2022_v45 = vmul.f32 1.442695, %v2020_v44 }
0x1524   :  { %v2019_v46 = vpop.xlane.xlu0 %2018  ;;  %v2039_v47 = vpop.permute.xlu1 %2038 }
0x1525   :  { %5752 = vpow2.f32 %v2022_v45  ;;  %v2021_v40 = vsub.f32 %v2013_v32, %v2019_v46  ;;  %v2044_v0 = vand.u32 %v2039_v47, %v6000_v3 }
0x1527   :  { %v2024_v21 = vmul.f32 1.442695, %v2021_v40  ;;  %5295 = vmatpush3.bf16.msra.mxu0 %v2044_v0 }
0x1528   :  { %5306 = vmatprep.subr.bf16.mxu0 %v5830_v14  ;;  %v2137_v55 = vpop.permute.xlu1 %2136 }
0x1529   :  { %5754 = vpow2.f32 %v2024_v21  ;;  %v2142_v36 = vsel %vm209_vm3, %v2137_v55, 0 }
0x152c   :  { %v2187_v59 = vpop.permute.xlu1 %2186 }
0x152d   :  { %v2192_v61 = vsel %vm209_vm3, %v2187_v59, 0 }
0x1530   :  { %v2135_v62 = vpop.permute.xlu1 %2134 }
0x1532   :  { %v5753_v1 = vpop.eup %5752 }
0x1533   :  { %v2026_v24 = vsel %vm307_vm4, %v5753_v1, 0.0 }
0x1534   :  { %2027 = vadd.xlane.f32.xlu0 %v2026_v24 }
0x1536   :  { %v5755_v25 = vpop.eup %5754 }
0x1537   :  { %v2029_v50 = vsel %vm307_vm4, %v5755_v25, 0.0 }
0x1538   :  { %2030 = vadd.xlane.f32.xlu0 %v2029_v50 }
0x154e   :  { %2086 = vrot.lane.b32.xlu0 %v6273_v28, %s6892_s19 }
0x1552   :  { %2184 = vrot.lane.b32.xlu0 %v6273_v28, %s6888_s21 }
0x15bd   :  { %v2028_v51 = vpop.xlane.xlu0 %2027 }
0x15be   :  { %5756 = vrcp.f32 %v2028_v51 }
0x15c1   :  { %v2031_v52 = vpop.xlane.xlu0 %2030 }
0x15c2   :  { %5758 = vrcp.f32 %v2031_v52 }
0x15c5   :  { %v2087_v38 = vpop.permute.xlu0 %2086 }
0x15c6   :  { %v2092_v53 = vand.u32 %v2087_v38, %v6000_v3 }
0x15c8   :  { %5301 = vmatpush3.bf16.msra.mxu1 %v2092_v53 }
0x15c9   :  { %5312 = vmatprep.subr.bf16.mxu1 %v5830_v14  ;;  %v2185_v63 = vpop.permute.xlu0 %2184 }
0x15cb   :  { %v5757_v54 = vpop.eup %5756 }
0x15cc   :  { %v2034_v56 = vmul.f32 %v5757_v54, %v5753_v1 }
0x15ce   :  { %v2036_v57 = vpack.c.bf16 %v2034_v56, %v2034_v56 }
0x15cf   :  { %v5759_v58 = vpop.eup %5758 }
0x15d0   :  { %5297 = vmatmul.mubr.msk.bf16.vlgmr.msra.gmra.mxu0 %vm334_vm7, %v2036_v57  ;;  %v2035_v39 = vmul.f32 %v5759_v58, %v5755_v25 }
0x15d1   :  { %5307 = vmatpush3.bf16.xpose.msra.mxu0 %v2142_v36  ;;  %5308 = vmatprep.mubr.msk.bf16.mxu0 %vm5831_vm1, %v5830_v14 }
0x15d2   :  { %v2037_v60 = vpack.c.bf16 %v2035_v39, %v2035_v39  ;;  %5318 = vmatprep.subr.bf16.mxu0 %v5830_v14 }
0x15d4   :  { %5303 = vmatmul.mubr.msk.bf16.vlgmr.msra.gmra.mxu1 %vm334_vm7, %v2037_v60 }
0x15d5   :  { %5313 = vmatpush3.bf16.xpose.msra.mxu1 %v2192_v61  ;;  %5314 = vmatprep.mubr.msk.bf16.mxu1 %vm5831_vm1, %v5830_v14 }
0x15d6   :  { %5324 = vmatprep.subr.bf16.mxu1 %v5830_v14 }
0x15d8   :  { %5309 = vmatmul.mubr.msk.bf16.vlgmr.msra.gmra.mxu0 %vm209_vm3, %v2135_v62 }
0x15d9   :  { %5320 = vmatprep.mubr.msk.bf16.mxu0 %vm5831_vm1, %v5830_v14 }
0x15dc   :  { %5315 = vmatmul.mubr.msk.bf16.vlgmr.msra.gmra.mxu1 %vm209_vm3, %v2185_v63 }
0x15dd   :  { %5326 = vmatprep.mubr.msk.bf16.mxu1 %vm5831_vm1, %v5830_v14 }
0x1690   :  { %v6365_v2 = vpop.f32.mrf.mxu0 }
0x1692   :  { %v5298_v4 = vpop.f32.mrf.mxu0 }
0x1694   :  { %v2083_v5 = vpop.f32.mrf.mxu0  ;;  %v6367_v6 = vpop.f32.mrf.mxu1 }
0x1695   :  { %v5635_v7 = vpack.i.bf16 %v6367_v6, %v6365_v2 }
0x1696   :  { %v5299_v8 = vpop.f32.mrf.mxu0  ;;  %v5304_v9 = vpop.f32.mrf.mxu1 }
0x1698   :  { %v2131_v10 = vpop.f32.mrf.mxu1  ;;  %v2178_v11 = vpop.f32.mrf.mxu0 }
0x1699   :  { %v2234_v12 = vmul.f32 0.35355338, %v2178_v11 }
0x169a   :  { %v5305_v15 = vpop.f32.mrf.mxu1  ;;  %v5310_v16 = vpop.f32.mrf.mxu0 }
0x169b   :  { %v2236_v18 = vsel %vm307_vm4, %v2234_v12, -inf }
0x169c   :  { %v2228_v19 = vpop.f32.mrf.mxu1  ;;  %2237 = vmax.xlane.f32.xlu1 %v2236_v18  ;;  %v2181_v20 = vpop.f32.mrf.mxu0 }
0x169d   :  { %v2235_v23 = vmul.f32 0.35355338, %v2228_v19 }
0x169e   :  { %v5311_v26 = vpop.f32.mrf.mxu0  ;;  %v5316_v27 = vpop.f32.mrf.mxu1 }
0x169f   :  { %v2239_v29 = vsel %vm307_vm4, %v2235_v23, -inf }
0x16a0   :  { %2240 = vmax.xlane.f32.xlu0 %v2239_v29  ;;  %v2231_v31 = vpop.f32.mrf.mxu1 }
0x16a2   :  { %v5317_v34 = vpop.f32.mrf.mxu1 }
0x16ad   :  { %2260 = vrot.lane.b32.xlu1 %v6269_v22, %s6886_s22 }
0x16b1   :  { %2358 = vrot.lane.b32.xlu1 %v6269_v22, %s6884_s23 }
0x16b5   :  { %2408 = vrot.lane.b32.xlu1 %v6273_v28, %s6884_s23 }
0x16b9   :  { %2356 = vrot.lane.b32.xlu1 %v6269_v22, %s6894_s28 }
0x1725   :  { %v2238_v30 = vpop.xlane.xlu1 %2237 }
0x1726   :  { %v2242_v32 = vsub.f32 %v2234_v12, %v2238_v30 }
0x1728   :  { %v2244_v33 = vmul.f32 1.442695, %v2242_v32 }
0x1729   :  { %v2241_v35 = vpop.xlane.xlu0 %2240  ;;  %v2261_v37 = vpop.permute.xlu1 %2260 }
0x172a   :  { %5760 = vpow2.f32 %v2244_v33  ;;  %v2243_v41 = vsub.f32 %v2235_v23, %v2241_v35  ;;  %v2266_v42 = vand.u32 %v2261_v37, %v6000_v3 }
0x172c   :  { %v2246_v43 = vmul.f32 1.442695, %v2243_v41  ;;  %5319 = vmatpush3.bf16.msra.mxu0 %v2266_v42 }
0x172d   :  { %5330 = vmatprep.subr.bf16.mxu0 %v5830_v14  ;;  %v2359_v25 = vpop.permute.xlu1 %2358 }
0x172e   :  { %5762 = vpow2.f32 %v2246_v43  ;;  %v2364_v38 = vsel %vm209_vm3, %v2359_v25, 0 }
0x1731   :  { %v2409_v54 = vpop.permute.xlu1 %2408 }
0x1732   :  { %v2414_v56 = vsel %vm209_vm3, %v2409_v54, 0 }
0x1735   :  { %v2357_v57 = vpop.permute.xlu1 %2356 }
0x1737   :  { %v5761_v44 = vpop.eup %5760 }
0x1738   :  { %v2248_v45 = vsel %vm307_vm4, %v5761_v44, 0.0 }
0x1739   :  { %2249 = vadd.xlane.f32.xlu0 %v2248_v45 }
0x173b   :  { %v5763_v46 = vpop.eup %5762 }
0x173c   :  { %v2251_v47 = vsel %vm307_vm4, %v5763_v46, 0.0 }
0x173d   :  { %2252 = vadd.xlane.f32.xlu0 %v2251_v47 }
0x1753   :  { %2308 = vrot.lane.b32.xlu0 %v6273_v28, %s6886_s22 }
0x1757   :  { %2406 = vrot.lane.b32.xlu0 %v6273_v28, %s6894_s28 }
0x17c2   :  { %v2250_v40 = vpop.xlane.xlu0 %2249 }
0x17c3   :  { %5764 = vrcp.f32 %v2250_v40 }
0x17c6   :  { %v2253_v0 = vpop.xlane.xlu0 %2252 }
0x17c7   :  { %5766 = vrcp.f32 %v2253_v0  ;;  %v5678_v0 = vld [vmem:[%s6862_s4 + $0x18] sm:$0xff]  }
0x17ca   :  { %v2309_v21 = vpop.permute.xlu0 %2308 }
0x17cb   :  { %v2314_v1 = vand.u32 %v2309_v21, %v6000_v3  ;;  %v5679_v21 = vld [vmem:[%s6862_s4 + $0x10] sm:$0xff]  }
0x17cd   :  { %5325 = vmatpush3.bf16.msra.mxu1 %v2314_v1 }
0x17ce   :  { %5336 = vmatprep.subr.bf16.mxu1 %v5830_v14  ;;  %v2407_v58 = vpop.permute.xlu0 %2406 }
0x17d0   :  { %v5765_v24 = vpop.eup %5764 }
0x17d1   :  { %v2256_v50 = vmul.f32 %v5765_v24, %v5761_v44 }
0x17d3   :  { %v2258_v51 = vpack.c.bf16 %v2256_v50, %v2256_v50 }
0x17d4   :  { %v5767_v52 = vpop.eup %5766 }
0x17d5   :  { %5321 = vmatmul.mubr.msk.bf16.vlgmr.msra.gmra.mxu0 %vm334_vm7, %v2258_v51  ;;  %v2257_v53 = vmul.f32 %v5767_v52, %v5763_v46 }
0x17d6   :  { %5331 = vmatpush3.bf16.xpose.msra.mxu0 %v2364_v38  ;;  %5332 = vmatprep.mubr.msk.bf16.mxu0 %vm5831_vm1, %v5830_v14 }
0x17d7   :  { %v2259_v55 = vpack.c.bf16 %v2257_v53, %v2257_v53  ;;  %5342 = vmatprep.subr.bf16.mxu0 %v5830_v14 }
0x17d9   :  { %5327 = vmatmul.mubr.msk.bf16.vlgmr.msra.gmra.mxu1 %vm334_vm7, %v2259_v55 }
0x17da   :  { %5337 = vmatpush3.bf16.xpose.msra.mxu1 %v2414_v56  ;;  %5338 = vmatprep.mubr.msk.bf16.mxu1 %vm5831_vm1, %v5830_v14 }
0x17db   :  { %5348 = vmatprep.subr.bf16.mxu1 %v5830_v14 }
0x17dd   :  { %5333 = vmatmul.mubr.msk.bf16.vlgmr.msra.gmra.mxu0 %vm209_vm3, %v2357_v57 }
0x17de   :  { %5344 = vmatprep.mubr.msk.bf16.mxu0 %vm5831_vm1, %v5830_v14 }
0x17e1   :  { %5339 = vmatmul.mubr.msk.bf16.vlgmr.msra.gmra.mxu1 %vm209_vm3, %v2407_v58 }
0x17e2   :  { %5350 = vmatprep.mubr.msk.bf16.mxu1 %vm5831_vm1, %v5830_v14 }
0x1895   :  { %v2302_v36 = vpop.f32.mrf.mxu0 }
0x1897   :  { %v5322_v39 = vpop.f32.mrf.mxu0 }
0x1899   :  { %v2305_v59 = vpop.f32.mrf.mxu0  ;;  %v2350_v60 = vpop.f32.mrf.mxu1 }
0x189a   :  { %v5640_v26 = vpack.i.bf16 %v2350_v60, %v2302_v36 }
0x189b   :  { %v5323_v61 = vpop.f32.mrf.mxu0  ;;  %v5328_v62 = vpop.f32.mrf.mxu1 }
0x189d   :  { %v2353_v63 = vpop.f32.mrf.mxu1  ;;  %v2400_v4 = vpop.f32.mrf.mxu0 }
0x189e   :  { %v2456_v5 = vmul.f32 0.35355338, %v2400_v4 }
0x189f   :  { %v5329_v8 = vpop.f32.mrf.mxu1  ;;  %v5334_v9 = vpop.f32.mrf.mxu0 }
0x18a0   :  { %v2458_v10 = vsel %vm307_vm4, %v2456_v5, -inf }
0x18a1   :  { %v2450_v11 = vpop.f32.mrf.mxu1  ;;  %2459 = vmax.xlane.f32.xlu1 %v2458_v10  ;;  %v2403_v12 = vpop.f32.mrf.mxu0 }
0x18a2   :  { %v2457_v15 = vmul.f32 0.35355338, %v2450_v11 }
0x18a3   :  { %v5335_v16 = vpop.f32.mrf.mxu0  ;;  %v5340_v18 = vpop.f32.mrf.mxu1 }
0x18a4   :  { %v2461_v19 = vsel %vm307_vm4, %v2457_v15, -inf }
0x18a5   :  { %2462 = vmax.xlane.f32.xlu0 %v2461_v19  ;;  %v2453_v20 = vpop.f32.mrf.mxu1 }
0x18a7   :  { %v5341_v23 = vpop.f32.mrf.mxu1 }
0x18b2   :  { %2482 = vrot.lane.b32.xlu1 %v6269_v22, %s6895_s27 }
0x18b6   :  { %5636 = vrot.lane.b32.xlu1 %v5635_v7, %s6896_s24 }
0x18ba   :  { %5641 = vrot.lane.b32.xlu1 %v5640_v26, %s6897_s25 }
0x192a   :  { %v2460_v27 = vpop.xlane.xlu1 %2459 }
0x192b   :  { %v2464_v29 = vsub.f32 %v2456_v5, %v2460_v27 }
0x192d   :  { %v2466_v31 = vmul.f32 1.442695, %v2464_v29 }
0x192e   :  { %v2463_v34 = vpop.xlane.xlu0 %2462  ;;  %v2483_v30 = vpop.permute.xlu1 %2482 }
0x192f   :  { %5768 = vpow2.f32 %v2466_v31  ;;  %v2465_v32 = vsub.f32 %v2457_v15, %v2463_v34  ;;  %v2488_v33 = vand.u32 %v2483_v30, %v6000_v3 }
0x1931   :  { %v2468_v35 = vmul.f32 1.442695, %v2465_v32  ;;  %5343 = vmatpush3.bf16.msra.mxu0 %v2488_v33 }
0x1932   :  { %5354 = vmatprep.subr.bf16.mxu0 %v5830_v14  ;;  %v5637_v55 = vpop.permute.xlu1 %5636 }
0x1933   :  { %5770 = vpow2.f32 %v2468_v35  ;;  %v5639_v57 = vunpack.i.h.bf16 %v5637_v55  ;;  %v5638_v58 = vunpack.i.l.bf16 %v5637_v55  ;;  %v5682_v55 = vld [vmem:[%s6867_s10 + $0x38] sm:$0xff]  }
0x1935   :  { %v2603_v60 = vsel %vm209_vm3, %v6327_v17, %v5639_v57  ;;  %v2602_v61 = vsel %vm209_vm3, %v6325_v13, %v5638_v58  ;;  %v4779_v13 = vld [vmem:[%s6863_s5 + $0x1] ss:$0 sm:$0xff]  ;;  %v5684_v57 = vld [vmem:[%s6867_s10 + $0x28] sm:$0xff]  }
0x1936   :  { %v5642_v56 = vpop.permute.xlu1 %5641  ;;  %v5685_v58 = vld [vmem:[%s6867_s10 + $0x20] sm:$0xff]  }
0x1937   :  { %v5644_v36 = vunpack.i.h.bf16 %v5642_v56  ;;  %v5643_v39 = vunpack.i.l.bf16 %v5642_v56  ;;  %v5683_v56 = vld [vmem:[%s6867_s10 + $0x30] sm:$0xff]  }
0x1939   :  { %v2604_v4 = vsel %vm1125_vm8, %v2602_v61, %v5643_v39  ;;  %v2605_v5 = vsel %vm1125_vm8, %v2603_v60, %v5644_v36  ;;  %v4793_v36 = vld [vmem:[%s6868_s9 + $0x1] ss:$0 sm:$0xff] }
0x193c   :  { %v5769_v22 = vpop.eup %5768 }
0x193d   :  { %v2470_v2 = vsel %vm307_vm4, %v5769_v22, 0.0 }
0x193e   :  { %2471 = vadd.xlane.f32.xlu0 %v2470_v2 }
0x1940   :  { %v5771_v6 = vpop.eup %5770 }
0x1941   :  { %v2473_v7 = vsel %vm307_vm4, %v5771_v6, 0.0 }
0x1942   :  { %2474 = vadd.xlane.f32.xlu0 %v2473_v7 }
0x1958   :  { %2530 = vrot.lane.b32.xlu0 %v6273_v28, %s6895_s27 }
0x19c7   :  { %v2472_v37 = vpop.xlane.xlu0 %2471 }
0x19c8   :  { %5772 = vrcp.f32 %v2472_v37 }
0x19cb   :  { %v2475_v41 = vpop.xlane.xlu0 %2474 }
0x19cc   :  { %5774 = vrcp.f32 %v2475_v41  ;;  %v5680_v41 = vld [vmem:[%s6864_s8 + $0x18] sm:$0xff]  }
0x19cf   :  { %v2531_v42 = vpop.permute.xlu0 %2530 }
0x19d0   :  { %v2536_v43 = vand.u32 %v2531_v42, %v6000_v3  ;;  %v5681_v42 = vld [vmem:[%s6864_s8 + $0x10] sm:$0xff]  }
0x19d2   :  { %5349 = vmatpush3.bf16.msra.mxu1 %v2536_v43 }
0x19d3   :  { %5362 = vmatprep.subr.bf16.mxu1 %v5830_v14 }
0x19d5   :  { %v5773_v44 = vpop.eup %5772 }
0x19d6   :  { %v2478_v45 = vmul.f32 %v5773_v44, %v5769_v22 }
0x19d8   :  { %v2480_v46 = vpack.c.bf16 %v2478_v45, %v2478_v45 }
0x19d9   :  { %v5775_v47 = vpop.eup %5774 }
0x19da   :  { %5345 = vmatmul.mubr.msk.bf16.vlgmr.msra.gmra.mxu0 %vm334_vm7, %v2480_v46  ;;  %v2479_v40 = vmul.f32 %v5775_v47, %v5771_v6 }
0x19db   :  { %5358 = vmatprep.mubr.msk.bf16.mxu0 %vm5831_vm1, %v5830_v14  ;;  %5355 = vmatpush3.bf16.msra.mxu0 %v5678_v0 }
0x19dc   :  { %v2481_v28 = vpack.c.bf16 %v2479_v40, %v2479_v40  ;;  %5356 = vmatprep.subr.bf16.mxu0 %v5830_v14 }
0x19de   :  { %5351 = vmatmul.mubr.msk.bf16.vlgmr.msra.gmra.mxu1 %vm334_vm7, %v2481_v28 }
0x19df   :  { %5366 = vmatprep.mubr.msk.bf16.mxu1 %vm5831_vm1, %v5830_v14  ;;  %5363 = vmatpush3.bf16.msra.mxu1 %v5678_v0  ;;  %v4786_v0 = vld [vmem:[%s6865_s6 + $0x1] ss:$0 sm:$0xff] }
0x19e0   :  { %5364 = vmatprep.subr.bf16.mxu1 %v5830_v14  ;;  %5357 = vmatpush3.bf16.msra.mxu0 %v5679_v21 }
0x19e1   :  { %5370 = vmatprep.subr.bf16.mxu0 %v5830_v14 }
0x19e3   :  { %5365 = vmatpush3.bf16.msra.mxu1 %v5679_v21 }
0x19e4   :  { %5378 = vmatprep.subr.bf16.mxu1 %v5830_v14 }
0x1a9a   :  { %v2524_v1 = vpop.f32.mrf.mxu0 }
0x1a9c   :  { %v5346_v24 = vpop.f32.mrf.mxu0 }
0x1a9e   :  { %v2527_v25 = vpop.f32.mrf.mxu0  ;;  %v2572_v50 = vpop.f32.mrf.mxu1 }
0x1a9f   :  { %v5645_v51 = vpack.i.bf16 %v2572_v50, %v2524_v1  ;;  %v4787_v1 = vld [vmem:[%s6866_s7 + $0x1] ss:$0 sm:$0xff] }
0x1aa0   :  { %v5347_v52 = vpop.f32.mrf.mxu0  ;;  %v5352_v38 = vpop.f32.mrf.mxu1 }
0x1aa1   :  { %5646 = vrot.lane.b32.xlu1 %v5645_v51, %s6898_s29 }
0x1aa2   :  { %v2575_v53 = vpop.f32.mrf.mxu1 }
0x1aa4   :  { %v5353_v54 = vpop.f32.mrf.mxu1 }
0x1b13   :  { %v5647_v59 = vpop.permute.xlu1 %5646 }
0x1b14   :  { %v5649_v62 = vunpack.i.h.bf16 %v5647_v59  ;;  %v5648_v63 = vunpack.i.l.bf16 %v5647_v59 }
0x1b16   :  { %v2607_v8 = vsel %vm1128_vm9, %v2605_v5, %v5649_v62  ;;  %v2606_v9 = vsel %vm1128_vm9, %v2604_v4, %v5648_v63 }
0x1b17   :  { %v2609_v10 = vpack.c.bf16 %v2607_v8, %v2607_v8  ;;  %v2608_v11 = vpack.c.bf16 %v2606_v9, %v2606_v9 }
0x1b19   :  { %5359 = vmatmul.mubr.msk.bf16.vlgmr.msra.gmra.mxu0 %vm117_vm2, %v2608_v11  ;;  %5367 = vmatmul.mubr.msk.bf16.vlgmr.msra.gmra.mxu1 %vm117_vm2, %v2609_v10 }
0x1b1a   :  { %5374 = vmatprep.mubr.msk.bf16.mxu0 %vm5831_vm1, %v5830_v14  ;;  %5382 = vmatprep.mubr.msk.bf16.mxu1 %vm5831_vm1, %v5830_v14 }
0x1b1b   :  { %5371 = vmatpush3.bf16.msra.mxu0 %v5680_v41  ;;  %5379 = vmatpush3.bf16.msra.mxu1 %v5680_v41 }
0x1b1c   :  { %5372 = vmatprep.subr.bf16.mxu0 %v5830_v14  ;;  %5380 = vmatprep.subr.bf16.mxu1 %v5830_v14 }
0x1b1f   :  { %5373 = vmatpush3.bf16.msra.mxu0 %v5681_v42  ;;  %5381 = vmatpush3.bf16.msra.mxu1 %v5681_v42 }
0x1b20   :  { %5386 = vmatprep.subr.bf16.mxu0 %v5830_v14  ;;  %5398 = vmatprep.subr.bf16.mxu1 %v5830_v14 }
0x1bd9   :  { %v2672_v17 = vpop.f32.mrf.mxu0  ;;  %v2715_v12 = vpop.f32.mrf.mxu1 }
0x1bda   :  { %v2673_v15 = vadd.f32 %v4779_v13, %v2672_v17  ;;  %v2716_v16 = vadd.f32 %v4779_v13, %v2715_v12  ;;  %v5828_v17 = vld [vmem:[%s6858_s0] sm:$0x1f] }
0x1bdb   :  { %v5360_v18 = vpop.f32.mrf.mxu0  ;;  %v5368_v19 = vpop.f32.mrf.mxu1  ;;  %v3025_v12 = vpack.c.bf16 %v5828_v17, %v5828_v17 }
0x1bdc   :  { %v6459_v20 = vadd.f32 %v2673_v15, %v6234_v48  ;;  %v6462_v23 = vadd.f32 %v2716_v16, %v6239_v49 }
0x1bdd   :  { %v2675_v26 = vpop.f32.mrf.mxu0  ;;  %v2718_v27 = vpop.f32.mrf.mxu1 }
0x1bde   :  { %v2730_v29 = vsel %vm55_vm0, %v6462_v23, 0.0  ;;  %v2727_v31 = vsel %vm55_vm0, %v6459_v20, 0.0  ;;  %v3033_v26 = vand.u32 %v3025_v12, %v6000_v3 }
0x1bdf   :  { %2731 = vadd.xlane.f32.xlu1 %v2730_v29  ;;  %v5369_v34 = vpop.f32.mrf.mxu1  ;;  %2728 = vadd.xlane.f32.xlu0 %v2727_v31  ;;  %v5361_v30 = vpop.f32.mrf.mxu0 }
0x1c68   :  { %v2732_v32 = vpop.xlane.xlu1 %2731  ;;  %v2729_v33 = vpop.xlane.xlu0 %2728 }
0x1c69   :  { %v2734_v35 = vmul.f32 0.03125, %v2732_v32  ;;  %v2733_v48 = vmul.f32 0.03125, %v2729_v33  ;;  %v5829_v32 = vld [vmem:[%s6858_s0 + $0x8] sm:$0x1f] }
0x1c6a   :  { %v3026_v33 = vpack.c.bf16 %v5829_v32, %v5829_v32 }
0x1c6b   :  { %v2736_v22 = vsub.f32 %v6462_v23, %v2734_v35  ;;  %v2735_v49 = vsub.f32 %v6459_v20, %v2733_v48  ;;  %v3028_v35 = vld [vmem:[%s6870_s13] sm:$0x7] }
0x1c6c   :  { %v3076_v48 = vand.u32 %v3026_v33, %v6000_v3 }
0x1c6d   :  { %v2737_v2 = vmul.f32 %v2735_v49, %v2735_v49  ;;  %v2738_v7 = vmul.f32 %v2736_v22, %v2736_v22 }
0x1c6f   :  { %v2739_v6 = vsel %vm55_vm0, %v2737_v2, 0.0  ;;  %v2742_v37 = vsel %vm55_vm0, %v2738_v7, 0.0  ;;  %v4807_v2 = vld [vmem:[%s6869_s11 + $0x1] ss:$0 sm:$0xff] }
0x1c70   :  { %2740 = vadd.xlane.f32.xlu0 %v2739_v6 }
0x1c74   :  { %2743 = vadd.xlane.f32.xlu0 %v2742_v37 }
0x1cf9   :  { %v2741_v43 = vpop.xlane.xlu0 %2740 }
0x1cfa   :  { %v2745_v44 = vmul.f32 0.03125, %v2741_v43 }
0x1cfc   :  { %v2747_v45 = vadd.f32 1e-05, %v2745_v44 }
0x1cfd   :  { %v2744_v46 = vpop.xlane.xlu0 %2743 }
0x1cfe   :  { %5776 = vrsqrt.f32 %v2747_v45  ;;  %v2746_v47 = vmul.f32 0.03125, %v2744_v46 }
0x1d00   :  { %v2748_v40 = vadd.f32 1e-05, %v2746_v47 }
0x1d02   :  { %5778 = vrsqrt.f32 %v2748_v40 }
0x1d0b   :  { %v5777_v28 = vpop.eup %5776 }
0x1d0c   :  { %v2751_v21 = vmul.f32 %v5777_v28, %v2735_v49  ;;  %v3207_v49 = vld [vmem:[%s6871_s14] sm:$0x1f] }
0x1d0e   :  { %v2759_v24 = vmul.f32 %v4786_v0, %v2751_v21 }
0x1d0f   :  { %v5779_v25 = vpop.eup %5778 }
0x1d10   :  { %v2752_v50 = vmul.f32 %v5779_v25, %v2736_v22  ;;  %v2767_v51 = vadd.f32 %v4787_v1, %v2759_v24  ;;  %v5847_v22 = vmov 0  }
0x1d11   :  { %5650 = vset.pattern.permute.xlu0 %v5847_v22  ;;  %v4820_v22 = vld [vmem:[%s6860_s1 + $0x2] ss:$0 sm:$0xff]  ;;  %s6899_s1 = smov 56  }
0x1d12   :  { %v2769_v52 = vpack.c.bf16 %v2767_v51, %v2767_v51  ;;  %v2760_v38 = vmul.f32 %v4786_v0, %v2752_v50  ;;  %3210 = vperm.xlu0 %5650, %v3207_v49  }
0x1d14   :  { %5375 = vmatmul.mubr.msk.bf16.vlgmr.msra.gmra.mxu0 %vm117_vm2, %v2769_v52  ;;  %v2768_v53 = vadd.f32 %v4787_v1, %v2760_v38  ;;  %v3027_v1 = vld [vmem:[%s6872_s12] sm:$0x7] }
0x1d15   :  { %5394 = vmatprep.mubr.msk.bf16.mxu0 %vm5831_vm1, %v5830_v14  ;;  %5387 = vmatpush3.bf16.msra.mxu0 %v5682_v55 }
0x1d16   :  { %v2770_v54 = vpack.c.bf16 %v2768_v53, %v2768_v53  ;;  %5388 = vmatprep.subr.bf16.mxu0 %v5830_v14 }
0x1d18   :  { %5383 = vmatmul.mubr.msk.bf16.vlgmr.msra.gmra.mxu1 %vm117_vm2, %v2770_v54 }
0x1d19   :  { %5406 = vmatprep.mubr.msk.bf16.mxu1 %vm5831_vm1, %v5830_v14  ;;  %5399 = vmatpush3.bf16.msra.mxu1 %v5682_v55 }
0x1d1a   :  { %5400 = vmatprep.subr.bf16.mxu1 %v5830_v14  ;;  %5389 = vmatpush3.bf16.msra.mxu0 %v5683_v56 }
0x1d1b   :  { %5390 = vmatprep.subr.bf16.mxu0 %v5830_v14 }
0x1d1d   :  { %5401 = vmatpush3.bf16.msra.mxu1 %v5683_v56 }
0x1d1e   :  { %5402 = vmatprep.subr.bf16.mxu1 %v5830_v14  ;;  %5391 = vmatpush3.bf16.msra.mxu0 %v5684_v57 }
0x1d1f   :  { %5392 = vmatprep.subr.bf16.mxu0 %v5830_v14 }
0x1d21   :  { %5403 = vmatpush3.bf16.msra.mxu1 %v5684_v57 }
0x1d22   :  { %5404 = vmatprep.subr.bf16.mxu1 %v5830_v14  ;;  %5393 = vmatpush3.bf16.msra.mxu0 %v5685_v58 }
0x1d23   :  { %5410 = vmatprep.subr.bf16.mxu0 %v5830_v14 }
0x1d25   :  { %5405 = vmatpush3.bf16.msra.mxu1 %v5685_v58 }
0x1d26   :  { %5416 = vmatprep.subr.bf16.mxu1 %v5830_v14 }
0x1d8d   :  { %v3211_v56 = vpop.permute.xlu0 %3210 }
0x1dd4   :  { %v2833_v39 = vpop.f32.mrf.mxu0 }
0x1dd5   :  { %v2834_v59 = vadd.f32 %v4793_v36, %v2833_v39 }
0x1dd6   :  { %v5376_v60 = vpop.f32.mrf.mxu0 }
0x1dd7   :  { %v2884_v61 = vmul.f32 0.70710677, %v2834_v59  ;;  %v2882_v15 = vmul.f32 0.5, %v2834_v59 }
0x1dd8   :  { %v2836_v62 = vpop.f32.mrf.mxu0  ;;  %v2876_v63 = vpop.f32.mrf.mxu1 }
0x1dd9   :  { %5780 = verf.f32 %v2884_v61  ;;  %v2877_v4 = vadd.f32 %v4793_v36, %v2876_v63 }
0x1dda   :  { %v5377_v5 = vpop.f32.mrf.mxu0  ;;  %v5384_v8 = vpop.f32.mrf.mxu1 }
0x1ddb   :  { %v2885_v9 = vmul.f32 0.70710677, %v2877_v4  ;;  %v2883_v29 = vmul.f32 0.5, %v2877_v4 }
0x1ddc   :  { %v2879_v10 = vpop.f32.mrf.mxu1 }
0x1ddd   :  { %5782 = verf.f32 %v2885_v9 }
0x1dde   :  { %v5385_v11 = vpop.f32.mrf.mxu1 }
0x1de6   :  { %v5781_v13 = vpop.eup %5780 }
0x1de7   :  { %v2888_v16 = vadd.f32 1.0, %v5781_v13 }
0x1de9   :  { %v2890_v18 = vmul.f32 %v2888_v16, %v2882_v15 }
0x1dea   :  { %v5783_v19 = vpop.eup %5782 }
0x1deb   :  { %v2892_v27 = vpack.c.bf16 %v2890_v18, %v2890_v18  ;;  %v2889_v31 = vadd.f32 1.0, %v5783_v19 }
0x1ded   :  { %v2891_v34 = vmul.f32 %v2889_v31, %v2883_v29  ;;  %5395 = vmatmul.mubr.msk.bf16.vlgmr.msra.gmra.mxu0 %vm1450_vm10, %v2892_v27  ;;  %v5686_v27 = vld [vmem:[%s6859_s3 + $0x28] sm:$0xff]   ;;  %v5687_v29 = vld [vmem:[%s6859_s3 + $0x20] sm:$0xff]  }
0x1dee   :  { %5411 = vmatpush3.bf16.msra.mxu0 %v3033_v26  ;;  %5412 = vmatprep.mubr.msk.bf16.mxu0 %vm5831_vm1, %v5830_v14 }
0x1def   :  { %v2893_v30 = vpack.c.bf16 %v2891_v34, %v2891_v34  ;;  %5422 = vmatprep.subr.bf16.mxu0 %v5830_v14 }
0x1df1   :  { %5407 = vmatmul.mubr.msk.bf16.vlgmr.msra.gmra.mxu1 %vm1450_vm10, %v2893_v30 }
0x1df2   :  { %5418 = vmatprep.mubr.msk.bf16.mxu1 %vm5831_vm1, %v5830_v14  ;;  %5417 = vmatpush3.bf16.msra.mxu1 %v3076_v48 }
0x1df3   :  { %5428 = vmatprep.subr.bf16.mxu1 %v5830_v14 }
0x1df5   :  { %5413 = vmatmul.mubr.msk.bf16.vlgmr.msra.gmra.mxu0 %vm334_vm7, %v3028_v35 }
0x1df6   :  { %5424 = vmatprep.mubr.msk.bf16.mxu0 %vm5831_vm1, %v5830_v14 }
0x1df9   :  { %5419 = vmatmul.mubr.msk.bf16.vlgmr.msra.gmra.mxu1 %vm334_vm7, %v3028_v35 }
0x1dfa   :  { %5430 = vmatprep.mubr.msk.bf16.mxu1 %vm5831_vm1, %v5830_v14 }
0x1ead   :  { %v2972_v6 = vpop.f32.mrf.mxu0 }
0x1eae   :  { %v2973_v7 = vadd.f32 %v4807_v2, %v2972_v6 }
0x1eaf   :  { %v5396_v37 = vpop.f32.mrf.mxu0 }
0x1eb0   :  { %v3021_v41 = vadd.f32 %v2973_v7, %v6459_v20 }
0x1eb1   :  { %v2975_v42 = vpop.f32.mrf.mxu0  ;;  %v3015_v43 = vpop.f32.mrf.mxu1 }
0x1eb2   :  { %v3023_v44 = vpack.c.bf16 %v3021_v41, %v3021_v41  ;;  %v3016_v45 = vadd.f32 %v4807_v2, %v3015_v43  ;;  %v4821_v2 = vld [vmem:[%s6861_s2 + $0x2] ss:$0 sm:$0xff]  ;;  %s6900_s2 = smov 80  }
0x1eb3   :  { %v5397_v46 = vpop.f32.mrf.mxu0  ;;  %v5408_v47 = vpop.f32.mrf.mxu1 }
0x1eb4   :  { %v3122_v40 = vand.u32 %v3023_v44, %v6000_v3  ;;  %v3022_v28 = vadd.f32 %v3016_v45, %v6462_v23 }
0x1eb5   :  { %v3018_v0 = vpop.f32.mrf.mxu1  ;;  %v3069_v23 = vpop.f32.mrf.mxu0 }
0x1eb6   :  { %v3024_v21 = vpack.c.bf16 %v3022_v28, %v3022_v28  ;;  %5423 = vmatpush3.bf16.msra.mxu0 %v3122_v40 }
0x1eb7   :  { %v5409_v24 = vpop.f32.mrf.mxu1  ;;  %5434 = vmatprep.subr.bf16.mxu0 %v5830_v14  ;;  %v5414_v25 = vpop.f32.mrf.mxu0 }
0x1eb8   :  { %v3165_v20 = vand.u32 %v3024_v21, %v6000_v3 }
0x1eb9   :  { %5425 = vmatmul.mubr.msk.bf16.vlgmr.msra.gmra.mxu0 %vm334_vm7, %v3027_v1  ;;  %v3072_v50 = vpop.f32.mrf.mxu0  ;;  %v3112_v51 = vpop.f32.mrf.mxu1 }
0x1eba   :  { %5429 = vmatpush3.bf16.msra.mxu1 %v3165_v20  ;;  %5438 = vmatprep.mubr.msk.bf16.mxu0 %vm5831_vm1, %v5830_v14 }
0x1ebb   :  { %5442 = vmatprep.subr.bf16.mxu1 %v5830_v14  ;;  %v5415_v52 = vpop.f32.mrf.mxu0  ;;  %v5420_v38 = vpop.f32.mrf.mxu1  ;;  %5435 = vmatpush3.bf16.msra.mxu0 %v5686_v27 }
0x1ebc   :  { %5436 = vmatprep.subr.bf16.mxu0 %v5830_v14 }
0x1ebd   :  { %5431 = vmatmul.mubr.msk.bf16.vlgmr.msra.gmra.mxu1 %vm334_vm7, %v3027_v1  ;;  %v3115_v53 = vpop.f32.mrf.mxu1 }
0x1ebe   :  { %5446 = vmatprep.mubr.msk.bf16.mxu1 %vm5831_vm1, %v5830_v14  ;;  %5443 = vmatpush3.bf16.msra.mxu1 %v5686_v27 }
0x1ebf   :  { %v5421_v54 = vpop.f32.mrf.mxu1  ;;  %5444 = vmatprep.subr.bf16.mxu1 %v5830_v14  ;;  %5437 = vmatpush3.bf16.msra.mxu0 %v5687_v29 }
0x1ec0   :  { %5450 = vmatprep.subr.bf16.mxu0 %v5830_v14 }
0x1ec2   :  { %5445 = vmatpush3.bf16.msra.mxu1 %v5687_v29 }
0x1ec3   :  { %5456 = vmatprep.subr.bf16.mxu1 %v5830_v14 }
0x1f79   :  { %v3158_v55 = vpop.f32.mrf.mxu0 }
0x1f7a   :  { %v3159_v57 = vadd.f32 %v3158_v55, %v3069_v23 }
0x1f7b   :  { %v5426_v58 = vpop.f32.mrf.mxu0 }
0x1f7c   :  { %v6563_v36 = vadd.f32 %v3211_v56, %v3159_v57 }
0x1f7d   :  { %v3161_v39 = vpop.f32.mrf.mxu0  ;;  %v3201_v59 = vpop.f32.mrf.mxu1 }
0x1f7e   :  { %v3202_v60 = vadd.f32 %v3201_v59, %v3112_v51  ;;  %v3219_v61 = vsel %vm55_vm0, %v6563_v36, 0.0 }
0x1f7f   :  { %v5432_v62 = vpop.f32.mrf.mxu1  ;;  %3220 = vadd.xlane.f32.xlu1 %v3219_v61  ;;  %v5427_v63 = vpop.f32.mrf.mxu0 }
0x1f80   :  { %v6567_v4 = vadd.f32 %v3211_v56, %v3202_v60 }
0x1f81   :  { %v3204_v5 = vpop.f32.mrf.mxu1 }
0x1f82   :  { %v3222_v8 = vsel %vm55_vm0, %v6567_v4, 0.0 }
0x1f83   :  { %v5433_v9 = vpop.f32.mrf.mxu1  ;;  %3223 = vadd.xlane.f32.xlu1 %v3222_v8 }
0x2008   :  { %v3221_v10 = vpop.xlane.xlu1 %3220 }
0x2009   :  { %v3225_v11 = vmul.f32 0.03125, %v3221_v10 }
0x200b   :  { %v3227_v13 = vsub.f32 %v6563_v36, %v3225_v11 }
0x200c   :  { %v3224_v17 = vpop.xlane.xlu1 %3223 }
0x200d   :  { %v3226_v12 = vmul.f32 0.03125, %v3224_v17  ;;  %v3229_v15 = vmul.f32 %v3227_v13, %v3227_v13 }
0x200f   :  { %v3228_v16 = vsub.f32 %v6567_v4, %v3226_v12  ;;  %v3231_v18 = vsel %vm55_vm0, %v3229_v15, 0.0 }
0x2010   :  { %3232 = vadd.xlane.f32.xlu1 %v3231_v18 }
0x2011   :  { %v3230_v19 = vmul.f32 %v3228_v16, %v3228_v16 }
0x2013   :  { %v3234_v26 = vsel %vm55_vm0, %v3230_v19, 0.0 }
0x2014   :  { %3235 = vadd.xlane.f32.xlu1 %v3234_v26 }
0x2099   :  { %v3233_v31 = vpop.xlane.xlu1 %3232 }
0x209a   :  { %v3237_v34 = vmul.f32 0.03125, %v3233_v31 }
0x209c   :  { %v3239_v30 = vadd.f32 1e-05, %v3237_v34 }
0x209d   :  { %v3236_v32 = vpop.xlane.xlu1 %3235 }
0x209e   :  { %5784 = vrsqrt.f32 %v3239_v30  ;;  %v3238_v33 = vmul.f32 0.03125, %v3236_v32 }
0x20a0   :  { %v3240_v35 = vadd.f32 1e-05, %v3238_v33 }
0x20a2   :  { %5786 = vrsqrt.f32 %v3240_v35 }
0x20ab   :  { %v5785_v48 = vpop.eup %5784 }
0x20ac   :  { %v3243_v49 = vmul.f32 %v5785_v48, %v3227_v13 }
0x20ae   :  { %v3251_v6 = vmul.f32 %v4820_v22, %v3243_v49 }
0x20af   :  { %v5787_v7 = vpop.eup %5786 }
0x20b0   :  { %v3244_v37 = vmul.f32 %v5787_v7, %v3228_v16  ;;  %v3259_v41 = vadd.f32 %v4821_v2, %v3251_v6 }
0x20b2   :  { %v3261_v42 = vpack.c.bf16 %v3259_v41, %v3259_v41  ;;  %v3252_v43 = vmul.f32 %v4820_v22, %v3244_v37 }
0x20b4   :  { %5439 = vmatmul.mubr.msk.bf16.vlgmr.msra.gmra.mxu0 %vm117_vm2, %v3261_v42  ;;  %v3260_v44 = vadd.f32 %v4821_v2, %v3252_v43 }
0x20b5   :  { %5452 = vmatprep.mubr.msk.bf16.mxu0 %vm5831_vm1, %v5830_v14 }
0x20b6   :  { %v3262_v45 = vpack.c.bf16 %v3260_v44, %v3260_v44 }
0x20b8   :  { %5447 = vmatmul.mubr.msk.bf16.vlgmr.msra.gmra.mxu1 %vm117_vm2, %v3262_v45 }
0x20b9   :  { %5458 = vmatprep.mubr.msk.bf16.mxu1 %vm5831_vm1, %v5830_v14 }
0x2174   :  { %v3317_v46 = vpop.f32.mrf.mxu0 }
0x2175   :  { %v6597_v47 = vpack.c.bf16 %v3317_v46, %v3317_v46 }
0x2176   :  { %v5440_v40 = vpop.f32.mrf.mxu0 }
0x2177   :  { %3369 = vrot.lane.b32.xlu1 %v6597_v47, %s5832_s30 }
0x2178   :  { %v3320_v28 = vpop.f32.mrf.mxu0  ;;  %v3360_v0 = vpop.f32.mrf.mxu1 }
0x2179   :  { %v6601_v21 = vpack.c.bf16 %v3360_v0, %v3360_v0 }
0x217a   :  { %v5441_v1 = vpop.f32.mrf.mxu0  ;;  %v5448_v24 = vpop.f32.mrf.mxu1 }
0x217b   :  { %3418 = vrot.lane.b32.xlu1 %v6601_v21, %s5832_s30  ;;  %s6901_s30 = smov 112  }
0x217c   :  { %v3363_v20 = vpop.f32.mrf.mxu1 }
0x217e   :  { %v5449_v23 = vpop.f32.mrf.mxu1 }
0x21e9   :  { %v3370_v25 = vpop.permute.xlu1 %3369 }
0x21ea   :  { %v3375_v50 = vsel %vm209_vm3, %v3370_v25, 0 }
0x21eb   :  { %5451 = vmatpush3.bf16.xpose.msra.mxu0 %v3375_v50 }
0x21ec   :  { %5462 = vmatprep.subr.bf16.mxu0 %v5830_v14 }
0x21ed   :  { %v3419_v51 = vpop.permute.xlu1 %3418 }
0x21ee   :  { %v3424_v52 = vsel %vm209_vm3, %v3419_v51, 0 }
0x21ef   :  { %5457 = vmatpush3.bf16.xpose.msra.mxu1 %v3424_v52 }
0x21f0   :  { %5468 = vmatprep.subr.bf16.mxu1 %v5830_v14 }
0x21f2   :  { %5453 = vmatmul.mubr.msk.bf16.vlgmr.msra.gmra.mxu0 %vm209_vm3, %v6597_v47 }
0x21f3   :  { %5464 = vmatprep.mubr.msk.bf16.mxu0 %vm5831_vm1, %v5830_v14 }
0x21f6   :  { %5459 = vmatmul.mubr.msk.bf16.vlgmr.msra.gmra.mxu1 %vm209_vm3, %v6601_v21 }
0x21f7   :  { %5470 = vmatprep.mubr.msk.bf16.mxu1 %vm5831_vm1, %v5830_v14 }
0x22b2   :  { %v3411_v38 = vpop.f32.mrf.mxu0 }
0x22b3   :  { %v3466_v53 = vmul.f32 0.35355338, %v3411_v38 }
0x22b4   :  { %v5454_v54 = vpop.f32.mrf.mxu0 }
0x22b5   :  { %v3468_v55 = vsel %vm307_vm4, %v3466_v53, -inf }
0x22b6   :  { %v3460_v56 = vpop.f32.mrf.mxu1  ;;  %3469 = vmax.xlane.f32.xlu1 %v3468_v55  ;;  %v3414_v57 = vpop.f32.mrf.mxu0 }
0x22b7   :  { %v3467_v58 = vmul.f32 0.35355338, %v3460_v56 }
0x22b8   :  { %v5455_v39 = vpop.f32.mrf.mxu0  ;;  %v5460_v59 = vpop.f32.mrf.mxu1 }
0x22b9   :  { %v3471_v60 = vsel %vm307_vm4, %v3467_v58, -inf }
0x22ba   :  { %3472 = vmax.xlane.f32.xlu0 %v3471_v60  ;;  %v3463_v61 = vpop.f32.mrf.mxu1 }
0x22bc   :  { %v5461_v62 = vpop.f32.mrf.mxu1 }
0x22c7   :  { %3492 = vrot.lane.b32.xlu1 %v6597_v47, %s5833_s16 }
0x233f   :  { %v3470_v63 = vpop.xlane.xlu1 %3469 }
0x2340   :  { %v3474_v5 = vsub.f32 %v3466_v53, %v3470_v63 }
0x2342   :  { %v3476_v8 = vmul.f32 1.442695, %v3474_v5 }
0x2343   :  { %v3473_v9 = vpop.xlane.xlu0 %3472  ;;  %v3493_v10 = vpop.permute.xlu1 %3492 }
0x2344   :  { %5788 = vpow2.f32 %v3476_v8  ;;  %v3475_v11 = vsub.f32 %v3467_v58, %v3473_v9  ;;  %v3498_v13 = vand.u32 %v3493_v10, %v6000_v3 }
0x2346   :  { %v3478_v17 = vmul.f32 1.442695, %v3475_v11  ;;  %5463 = vmatpush3.bf16.msra.mxu0 %v3498_v13 }
0x2347   :  { %5474 = vmatprep.subr.bf16.mxu0 %v5830_v14 }
0x2348   :  { %5790 = vpow2.f32 %v3478_v17 }
0x2351   :  { %v5789_v12 = vpop.eup %5788 }
0x2352   :  { %v3480_v15 = vsel %vm307_vm4, %v5789_v12, 0.0 }
0x2353   :  { %3481 = vadd.xlane.f32.xlu1 %v3480_v15 }
0x2355   :  { %v5791_v16 = vpop.eup %5790 }
0x2356   :  { %v3483_v18 = vsel %vm307_vm4, %v5791_v16, 0.0 }
0x2357   :  { %3484 = vadd.xlane.f32.xlu0 %v3483_v18 }
0x2364   :  { %3590 = vrot.lane.b32.xlu1 %v6597_v47, %s5834_s17 }
0x2368   :  { %3640 = vrot.lane.b32.xlu1 %v6601_v21, %s5834_s17  ;;  %s6903_s17 = smov 72  }
0x236c   :  { %3638 = vrot.lane.b32.xlu1 %v6601_v21, %s5836_s18 }
0x236d   :  { %3540 = vrot.lane.b32.xlu0 %v6601_v21, %s5833_s16  ;;  %s6902_s16 = smov 48  }
0x2371   :  { %3588 = vrot.lane.b32.xlu0 %v6597_v47, %s5836_s18 }
0x23dc   :  { %v3482_v19 = vpop.xlane.xlu1 %3481 }
0x23dd   :  { %5792 = vrcp.f32 %v3482_v19 }
0x23e0   :  { %v3485_v26 = vpop.xlane.xlu0 %3484  ;;  %v3591_v34 = vpop.permute.xlu1 %3590 }
0x23e1   :  { %5794 = vrcp.f32 %v3485_v26  ;;  %v3596_v48 = vsel %vm209_vm3, %v3591_v34, 0 }
0x23e4   :  { %v3541_v27 = vpop.permute.xlu0 %3540  ;;  %v3641_v22 = vpop.permute.xlu1 %3640 }
0x23e5   :  { %v3546_v29 = vand.u32 %v3541_v27, %v6000_v3  ;;  %v3646_v2 = vsel %vm209_vm3, %v3641_v22, 0 }
0x23e7   :  { %5469 = vmatpush3.bf16.msra.mxu1 %v3546_v29 }
0x23e8   :  { %5480 = vmatprep.subr.bf16.mxu1 %v5830_v14  ;;  %v3589_v6 = vpop.permute.xlu0 %3588  ;;  %v3639_v7 = vpop.permute.xlu1 %3638 }
0x23ea   :  { %v5793_v31 = vpop.eup %5792 }
0x23eb   :  { %v3488_v30 = vmul.f32 %v5793_v31, %v5789_v12 }
0x23ed   :  { %v3490_v32 = vpack.c.bf16 %v3488_v30, %v3488_v30 }
0x23ee   :  { %v5795_v33 = vpop.eup %5794 }
0x23ef   :  { %v3489_v35 = vmul.f32 %v5795_v33, %v5791_v16  ;;  %5465 = vmatmul.mubr.msk.bf16.vlgmr.msra.gmra.mxu0 %vm334_vm7, %v3490_v32 }
0x23f0   :  { %5475 = vmatpush3.bf16.xpose.msra.mxu0 %v3596_v48  ;;  %5476 = vmatprep.mubr.msk.bf16.mxu0 %vm5831_vm1, %v5830_v14 }
0x23f1   :  { %v3491_v49 = vpack.c.bf16 %v3489_v35, %v3489_v35  ;;  %5486 = vmatprep.subr.bf16.mxu0 %v5830_v14 }
0x23f3   :  { %5471 = vmatmul.mubr.msk.bf16.vlgmr.msra.gmra.mxu1 %vm334_vm7, %v3491_v49 }
0x23f4   :  { %5481 = vmatpush3.bf16.xpose.msra.mxu1 %v3646_v2  ;;  %5482 = vmatprep.mubr.msk.bf16.mxu1 %vm5831_vm1, %v5830_v14 }
0x23f5   :  { %5492 = vmatprep.subr.bf16.mxu1 %v5830_v14 }
0x23f7   :  { %5477 = vmatmul.mubr.msk.bf16.vlgmr.msra.gmra.mxu0 %vm209_vm3, %v3589_v6 }
0x23f8   :  { %5488 = vmatprep.mubr.msk.bf16.mxu0 %vm5831_vm1, %v5830_v14 }
0x23fb   :  { %5483 = vmatmul.mubr.msk.bf16.vlgmr.msra.gmra.mxu1 %vm209_vm3, %v3639_v7 }
0x23fc   :  { %5494 = vmatprep.mubr.msk.bf16.mxu1 %vm5831_vm1, %v5830_v14 }
0x24af   :  { %v6653_v37 = vpop.f32.mrf.mxu0 }
0x24b1   :  { %v5466_v41 = vpop.f32.mrf.mxu0 }
0x24b3   :  { %v3537_v42 = vpop.f32.mrf.mxu0  ;;  %v6655_v43 = vpop.f32.mrf.mxu1 }
0x24b5   :  { %v5467_v44 = vpop.f32.mrf.mxu0  ;;  %v5472_v45 = vpop.f32.mrf.mxu1 }
0x24b7   :  { %v3585_v46 = vpop.f32.mrf.mxu1  ;;  %v3632_v40 = vpop.f32.mrf.mxu0 }
0x24b8   :  { %v3688_v28 = vmul.f32 0.35355338, %v3632_v40 }
0x24b9   :  { %v5473_v0 = vpop.f32.mrf.mxu1  ;;  %v5478_v1 = vpop.f32.mrf.mxu0 }
0x24ba   :  { %v3690_v24 = vsel %vm307_vm4, %v3688_v28, -inf }
0x24bb   :  { %v3682_v20 = vpop.f32.mrf.mxu1  ;;  %3691 = vmax.xlane.f32.xlu0 %v3690_v24  ;;  %v3635_v23 = vpop.f32.mrf.mxu0 }
0x24bc   :  { %v3689_v25 = vmul.f32 0.35355338, %v3682_v20 }
0x24bd   :  { %v5479_v50 = vpop.f32.mrf.mxu0  ;;  %v5484_v51 = vpop.f32.mrf.mxu1 }
0x24be   :  { %v3693_v52 = vsel %vm307_vm4, %v3689_v25, -inf }
0x24bf   :  { %3694 = vmax.xlane.f32.xlu1 %v3693_v52  ;;  %v3685_v38 = vpop.f32.mrf.mxu1 }
0x24c1   :  { %v5485_v53 = vpop.f32.mrf.mxu1 }
0x24d0   :  { %3714 = vrot.lane.b32.xlu1 %v6597_v47, %s6899_s1 }
0x24d4   :  { %3812 = vrot.lane.b32.xlu1 %v6597_v47, %s6900_s2 }
0x24d8   :  { %3862 = vrot.lane.b32.xlu1 %v6601_v21, %s6900_s2 }
0x24dc   :  { %3860 = vrot.lane.b32.xlu1 %v6601_v21, %s6901_s30 }
0x2544   :  { %v3692_v54 = vpop.xlane.xlu0 %3691 }
0x2545   :  { %v3696_v55 = vsub.f32 %v3688_v28, %v3692_v54 }
0x2547   :  { %v3698_v56 = vmul.f32 1.442695, %v3696_v55 }
0x2548   :  { %v3695_v57 = vpop.xlane.xlu1 %3694 }
0x2549   :  { %5796 = vpow2.f32 %v3698_v56  ;;  %v3697_v58 = vsub.f32 %v3689_v25, %v3695_v57 }
0x254b   :  { %v3700_v39 = vmul.f32 1.442695, %v3697_v58 }
0x254c   :  { %v3715_v59 = vpop.permute.xlu1 %3714 }
0x254d   :  { %5798 = vpow2.f32 %v3700_v39  ;;  %v3720_v60 = vand.u32 %v3715_v59, %v6000_v3 }
0x254f   :  { %5487 = vmatpush3.bf16.msra.mxu0 %v3720_v60 }
0x2550   :  { %5498 = vmatprep.subr.bf16.mxu0 %v5830_v14  ;;  %v3813_v17 = vpop.permute.xlu1 %3812 }
0x2551   :  { %v3818_v18 = vsel %vm209_vm3, %v3813_v17, 0 }
0x2554   :  { %v3863_v26 = vpop.permute.xlu1 %3862 }
0x2555   :  { %v3868_v29 = vsel %vm209_vm3, %v3863_v26, 0 }
0x2556   :  { %v5797_v61 = vpop.eup %5796 }
0x2557   :  { %v3702_v62 = vsel %vm307_vm4, %v5797_v61, 0.0 }
0x2558   :  { %3703 = vadd.xlane.f32.xlu0 %v3702_v62  ;;  %v3861_v34 = vpop.permute.xlu1 %3860 }
0x255a   :  { %v5799_v63 = vpop.eup %5798 }
0x255b   :  { %v3705_v5 = vsel %vm307_vm4, %v5799_v63, 0.0 }
0x255c   :  { %3706 = vadd.xlane.f32.xlu0 %v3705_v5 }
0x2572   :  { %3762 = vrot.lane.b32.xlu0 %v6601_v21, %s6899_s1 }
0x2576   :  { %3810 = vrot.lane.b32.xlu0 %v6597_v47, %s6901_s30 }
0x25e1   :  { %v3704_v8 = vpop.xlane.xlu0 %3703 }
0x25e2   :  { %5800 = vrcp.f32 %v3704_v8 }
0x25e5   :  { %v3707_v9 = vpop.xlane.xlu0 %3706 }
0x25e6   :  { %5802 = vrcp.f32 %v3707_v9 }
0x25e9   :  { %v3763_v10 = vpop.permute.xlu0 %3762 }
0x25ea   :  { %v3768_v11 = vand.u32 %v3763_v10, %v6000_v3 }
0x25ec   :  { %5493 = vmatpush3.bf16.msra.mxu1 %v3768_v11 }
0x25ed   :  { %5504 = vmatprep.subr.bf16.mxu1 %v5830_v14  ;;  %v3811_v31 = vpop.permute.xlu0 %3810 }
0x25ef   :  { %v5801_v13 = vpop.eup %5800 }
0x25f0   :  { %v3710_v12 = vmul.f32 %v5801_v13, %v5797_v61 }
0x25f2   :  { %v3712_v15 = vpack.c.bf16 %v3710_v12, %v3710_v12 }
0x25f3   :  { %v5803_v16 = vpop.eup %5802 }
0x25f4   :  { %v3711_v19 = vmul.f32 %v5803_v16, %v5799_v63  ;;  %5489 = vmatmul.mubr.msk.bf16.vlgmr.msra.gmra.mxu0 %vm334_vm7, %v3712_v15 }
0x25f5   :  { %5499 = vmatpush3.bf16.xpose.msra.mxu0 %v3818_v18  ;;  %5500 = vmatprep.mubr.msk.bf16.mxu0 %vm5831_vm1, %v5830_v14 }
0x25f6   :  { %v3713_v27 = vpack.c.bf16 %v3711_v19, %v3711_v19  ;;  %5510 = vmatprep.subr.bf16.mxu0 %v5830_v14 }
0x25f8   :  { %5495 = vmatmul.mubr.msk.bf16.vlgmr.msra.gmra.mxu1 %vm334_vm7, %v3713_v27 }
0x25f9   :  { %5505 = vmatpush3.bf16.xpose.msra.mxu1 %v3868_v29  ;;  %5506 = vmatprep.mubr.msk.bf16.mxu1 %vm5831_vm1, %v5830_v14 }
0x25fa   :  { %5516 = vmatprep.subr.bf16.mxu1 %v5830_v14 }
0x25fc   :  { %5501 = vmatmul.mubr.msk.bf16.vlgmr.msra.gmra.mxu0 %vm209_vm3, %v3811_v31 }
0x25fd   :  { %5512 = vmatprep.mubr.msk.bf16.mxu0 %vm5831_vm1, %v5830_v14 }
0x2600   :  { %5507 = vmatmul.mubr.msk.bf16.vlgmr.msra.gmra.mxu1 %vm209_vm3, %v3861_v34 }
0x2601   :  { %5518 = vmatprep.mubr.msk.bf16.mxu1 %vm5831_vm1, %v5830_v14 }
0x26b4   :  { %v6693_v30 = vpop.f32.mrf.mxu0 }
0x26b6   :  { %v5490_v32 = vpop.f32.mrf.mxu0 }
0x26b8   :  { %v3759_v33 = vpop.f32.mrf.mxu0  ;;  %v6695_v35 = vpop.f32.mrf.mxu1 }
0x26b9   :  { %v5651_v48 = vpack.i.bf16 %v6695_v35, %v6693_v30 }
0x26ba   :  { %v5491_v22 = vpop.f32.mrf.mxu0  ;;  %v5496_v49 = vpop.f32.mrf.mxu1 }
0x26bc   :  { %v3807_v2 = vpop.f32.mrf.mxu1  ;;  %v3854_v6 = vpop.f32.mrf.mxu0 }
0x26bd   :  { %v3910_v7 = vmul.f32 0.35355338, %v3854_v6 }
0x26be   :  { %v5497_v41 = vpop.f32.mrf.mxu1  ;;  %v5502_v42 = vpop.f32.mrf.mxu0 }
0x26bf   :  { %v3912_v44 = vsel %vm307_vm4, %v3910_v7, -inf }
0x26c0   :  { %v3904_v45 = vpop.f32.mrf.mxu1  ;;  %3913 = vmax.xlane.f32.xlu0 %v3912_v44  ;;  %v3857_v46 = vpop.f32.mrf.mxu0 }
0x26c1   :  { %v3911_v40 = vmul.f32 0.35355338, %v3904_v45 }
0x26c2   :  { %v5503_v28 = vpop.f32.mrf.mxu0  ;;  %v5508_v0 = vpop.f32.mrf.mxu1 }
0x26c3   :  { %v3915_v1 = vsel %vm307_vm4, %v3911_v40, -inf }
0x26c4   :  { %3916 = vmax.xlane.f32.xlu1 %v3915_v1  ;;  %v3907_v24 = vpop.f32.mrf.mxu1 }
0x26c6   :  { %v5509_v20 = vpop.f32.mrf.mxu1 }
0x26d5   :  { %3936 = vrot.lane.b32.xlu1 %v6597_v47, %s6902_s16 }
0x26d9   :  { %4034 = vrot.lane.b32.xlu1 %v6597_v47, %s6903_s17 }
0x26dd   :  { %4084 = vrot.lane.b32.xlu1 %v6601_v21, %s6903_s17 }
0x26e1   :  { %4082 = vrot.lane.b32.xlu1 %v6601_v21, %s6894_s28 }
0x2749   :  { %v3914_v23 = vpop.xlane.xlu0 %3913 }
0x274a   :  { %v3918_v25 = vsub.f32 %v3910_v7, %v3914_v23 }
0x274c   :  { %v3920_v50 = vmul.f32 1.442695, %v3918_v25 }
0x274d   :  { %v3917_v51 = vpop.xlane.xlu1 %3916 }
0x274e   :  { %5804 = vpow2.f32 %v3920_v50  ;;  %v3919_v52 = vsub.f32 %v3911_v40, %v3917_v51 }
0x2750   :  { %v3922_v38 = vmul.f32 1.442695, %v3919_v52 }
0x2751   :  { %v3937_v53 = vpop.permute.xlu1 %3936 }
0x2752   :  { %5806 = vpow2.f32 %v3922_v38  ;;  %v3942_v54 = vand.u32 %v3937_v53, %v6000_v3 }
0x2754   :  { %5511 = vmatpush3.bf16.msra.mxu0 %v3942_v54 }
0x2755   :  { %5522 = vmatprep.subr.bf16.mxu0 %v5830_v14  ;;  %v4035_v63 = vpop.permute.xlu1 %4034 }
0x2756   :  { %v4040_v10 = vsel %vm209_vm3, %v4035_v63, 0 }
0x2759   :  { %v4085_v13 = vpop.permute.xlu1 %4084 }
0x275a   :  { %v4090_v12 = vsel %vm209_vm3, %v4085_v13, 0 }
0x275b   :  { %v5805_v55 = vpop.eup %5804 }
0x275c   :  { %v3924_v56 = vsel %vm307_vm4, %v5805_v55, 0.0 }
0x275d   :  { %3925 = vadd.xlane.f32.xlu0 %v3924_v56  ;;  %v4083_v16 = vpop.permute.xlu1 %4082 }
0x275f   :  { %v5807_v57 = vpop.eup %5806 }
0x2760   :  { %v3927_v58 = vsel %vm307_vm4, %v5807_v57, 0.0 }
0x2761   :  { %3928 = vadd.xlane.f32.xlu0 %v3927_v58 }
0x2777   :  { %3984 = vrot.lane.b32.xlu0 %v6601_v21, %s6902_s16 }
0x277b   :  { %4032 = vrot.lane.b32.xlu0 %v6597_v47, %s6894_s28 }
0x27e6   :  { %v3926_v39 = vpop.xlane.xlu0 %3925 }
0x27e7   :  { %5808 = vrcp.f32 %v3926_v39 }
0x27ea   :  { %v3929_v59 = vpop.xlane.xlu0 %3928 }
0x27eb   :  { %5810 = vrcp.f32 %v3929_v59  ;;  %v5689_v59 = vld [vmem:[%s6862_s4 + $0x20] sm:$0xff]  }
0x27ee   :  { %v3985_v60 = vpop.permute.xlu0 %3984 }
0x27ef   :  { %v3990_v61 = vand.u32 %v3985_v60, %v6000_v3 }
0x27f1   :  { %5517 = vmatpush3.bf16.msra.mxu1 %v3990_v61 }
0x27f2   :  { %5528 = vmatprep.subr.bf16.mxu1 %v5830_v14  ;;  %v4033_v15 = vpop.permute.xlu0 %4032 }
0x27f4   :  { %v5809_v62 = vpop.eup %5808 }
0x27f5   :  { %v3932_v5 = vmul.f32 %v5809_v62, %v5805_v55 }
0x27f7   :  { %v3934_v8 = vpack.c.bf16 %v3932_v5, %v3932_v5 }
0x27f8   :  { %v5811_v9 = vpop.eup %5810 }
0x27f9   :  { %v3933_v11 = vmul.f32 %v5811_v9, %v5807_v57  ;;  %5513 = vmatmul.mubr.msk.bf16.vlgmr.msra.gmra.mxu0 %vm334_vm7, %v3934_v8 }
0x27fa   :  { %5523 = vmatpush3.bf16.xpose.msra.mxu0 %v4040_v10  ;;  %5524 = vmatprep.mubr.msk.bf16.mxu0 %vm5831_vm1, %v5830_v14 }
0x27fb   :  { %v3935_v17 = vpack.c.bf16 %v3933_v11, %v3933_v11  ;;  %5534 = vmatprep.subr.bf16.mxu0 %v5830_v14 }
0x27fd   :  { %5519 = vmatmul.mubr.msk.bf16.vlgmr.msra.gmra.mxu1 %vm334_vm7, %v3935_v17 }
0x27fe   :  { %5529 = vmatpush3.bf16.xpose.msra.mxu1 %v4090_v12  ;;  %5530 = vmatprep.mubr.msk.bf16.mxu1 %vm5831_vm1, %v5830_v14 }
0x27ff   :  { %5540 = vmatprep.subr.bf16.mxu1 %v5830_v14 }
0x2801   :  { %5525 = vmatmul.mubr.msk.bf16.vlgmr.msra.gmra.mxu0 %vm209_vm3, %v4033_v15 }
0x2802   :  { %5536 = vmatprep.mubr.msk.bf16.mxu0 %vm5831_vm1, %v5830_v14 }
0x2805   :  { %5531 = vmatmul.mubr.msk.bf16.vlgmr.msra.gmra.mxu1 %vm209_vm3, %v4083_v16 }
0x2806   :  { %5542 = vmatprep.mubr.msk.bf16.mxu1 %vm5831_vm1, %v5830_v14 }
0x28b9   :  { %v3978_v18 = vpop.f32.mrf.mxu0 }
0x28bb   :  { %v5514_v19 = vpop.f32.mrf.mxu0 }
0x28bd   :  { %v3981_v26 = vpop.f32.mrf.mxu0  ;;  %v4026_v27 = vpop.f32.mrf.mxu1 }
0x28be   :  { %v5656_v28 = vpack.i.bf16 %v4026_v27, %v3978_v18 }
0x28bf   :  { %v5515_v29 = vpop.f32.mrf.mxu0  ;;  %v5520_v31 = vpop.f32.mrf.mxu1 }
0x28c1   :  { %v4029_v34 = vpop.f32.mrf.mxu1  ;;  %v4076_v32 = vpop.f32.mrf.mxu0 }
0x28c2   :  { %v4132_v33 = vmul.f32 0.35355338, %v4076_v32 }
0x28c3   :  { %v5521_v22 = vpop.f32.mrf.mxu1  ;;  %v5526_v49 = vpop.f32.mrf.mxu0 }
0x28c4   :  { %v4134_v2 = vsel %vm307_vm4, %v4132_v33, -inf }
0x28c5   :  { %v4126_v6 = vpop.f32.mrf.mxu1  ;;  %4135 = vmax.xlane.f32.xlu0 %v4134_v2  ;;  %v4079_v7 = vpop.f32.mrf.mxu0 }
0x28c6   :  { %v4133_v41 = vmul.f32 0.35355338, %v4126_v6 }
0x28c7   :  { %v5527_v42 = vpop.f32.mrf.mxu0  ;;  %v5532_v44 = vpop.f32.mrf.mxu1 }
0x28c8   :  { %v4137_v45 = vsel %vm307_vm4, %v4133_v41, -inf }
0x28c9   :  { %4138 = vmax.xlane.f32.xlu1 %v4137_v45  ;;  %v4129_v46 = vpop.f32.mrf.mxu1 }
0x28cb   :  { %v5533_v40 = vpop.f32.mrf.mxu1 }
0x28da   :  { %4158 = vrot.lane.b32.xlu1 %v6597_v47, %s6895_s27 }
0x28de   :  { %5652 = vrot.lane.b32.xlu1 %v5651_v48, %s6896_s24 }
0x28e2   :  { %5657 = vrot.lane.b32.xlu1 %v5656_v28, %s6897_s25 }
0x294e   :  { %v4136_v0 = vpop.xlane.xlu0 %4135 }
0x294f   :  { %v4140_v1 = vsub.f32 %v4132_v33, %v4136_v0 }
0x2951   :  { %v4142_v24 = vmul.f32 1.442695, %v4140_v1 }
0x2952   :  { %v4139_v20 = vpop.xlane.xlu1 %4138 }
0x2953   :  { %5812 = vpow2.f32 %v4142_v24  ;;  %v4141_v23 = vsub.f32 %v4133_v41, %v4139_v20 }
0x2955   :  { %v4144_v25 = vmul.f32 1.442695, %v4141_v23 }
0x2956   :  { %v4159_v50 = vpop.permute.xlu1 %4158 }
0x2957   :  { %5814 = vpow2.f32 %v4144_v25  ;;  %v4164_v51 = vand.u32 %v4159_v50, %v6000_v3 }
0x2959   :  { %5535 = vmatpush3.bf16.msra.mxu0 %v4164_v51 }
0x295a   :  { %5546 = vmatprep.subr.bf16.mxu0 %v5830_v14  ;;  %v5653_v13 = vpop.permute.xlu1 %5652 }
0x295b   :  { %v5655_v12 = vunpack.i.h.bf16 %v5653_v13  ;;  %v5654_v15 = vunpack.i.l.bf16 %v5653_v13  ;;  %v5693_v13 = vld [vmem:[%s6867_s10 + $0x50] sm:$0xff]  }
0x295d   :  { %v4279_v26 = vsel %vm209_vm3, %v6655_v43, %v5655_v12  ;;  %v4278_v27 = vsel %vm209_vm3, %v6653_v37, %v5654_v15  ;;  %v4851_v37 = vld [vmem:[%s6863_s5 + $0x2] ss:$0 sm:$0xff] }
0x295e   :  { %v5658_v17 = vpop.permute.xlu1 %5657  ;;  %v5695_v12 = vld [vmem:[%s6867_s10 + $0x40] sm:$0xff]  }
0x295f   :  { %v5660_v16 = vunpack.i.h.bf16 %v5658_v17  ;;  %v5659_v18 = vunpack.i.l.bf16 %v5658_v17  ;;  %v5694_v17 = vld [vmem:[%s6867_s10 + $0x48] sm:$0xff]   ;;  %v4865_v15 = vld [vmem:[%s6868_s9 + $0x2] ss:$0 sm:$0xff] }
0x2960   :  { %v5813_v47 = vpop.eup %5812 }
0x2961   :  { %v4146_v30 = vsel %vm307_vm4, %v5813_v47, 0.0  ;;  %v4281_v34 = vsel %vm1125_vm8, %v4279_v26, %v5660_v16  ;;  %v4280_v32 = vsel %vm1125_vm8, %v4278_v27, %v5659_v18 }
0x2962   :  { %4147 = vadd.xlane.f32.xlu0 %v4146_v30 }
0x2964   :  { %v5815_v35 = vpop.eup %5814 }
0x2965   :  { %v4149_v48 = vsel %vm307_vm4, %v5815_v35, 0.0 }
0x2966   :  { %4150 = vadd.xlane.f32.xlu0 %v4149_v48 }
0x297c   :  { %4206 = vrot.lane.b32.xlu0 %v6601_v21, %s6895_s27 }
0x29eb   :  { %v4148_v52 = vpop.xlane.xlu0 %4147 }
0x29ec   :  { %5816 = vrcp.f32 %v4148_v52  ;;  %v5690_v52 = vld [vmem:[%s6864_s8 + $0x28] sm:$0xff]  }
0x29ef   :  { %v4151_v38 = vpop.xlane.xlu0 %4150 }
0x29f0   :  { %5818 = vrcp.f32 %v4151_v38  ;;  %v5691_v38 = vld [vmem:[%s6864_s8 + $0x20] sm:$0xff]  }
0x29f3   :  { %v4207_v53 = vpop.permute.xlu0 %4206 }
0x29f4   :  { %v4212_v54 = vand.u32 %v4207_v53, %v6000_v3  ;;  %v5688_v3 = vld [vmem:[%s6862_s4 + $0x28] sm:$0xff]  }
0x29f6   :  { %5541 = vmatpush3.bf16.msra.mxu1 %v4212_v54 }
0x29f7   :  { %5554 = vmatprep.subr.bf16.mxu1 %v5830_v14 }
0x29f9   :  { %v5817_v55 = vpop.eup %5816 }
0x29fa   :  { %v4154_v56 = vmul.f32 %v5817_v55, %v5813_v47 }
0x29fc   :  { %v4156_v57 = vpack.c.bf16 %v4154_v56, %v4154_v56 }
0x29fd   :  { %v5819_v58 = vpop.eup %5818 }
0x29fe   :  { %v4155_v39 = vmul.f32 %v5819_v58, %v5815_v35  ;;  %5537 = vmatmul.mubr.msk.bf16.vlgmr.msra.gmra.mxu0 %vm334_vm7, %v4156_v57 }
0x29ff   :  { %5550 = vmatprep.mubr.msk.bf16.mxu0 %vm5831_vm1, %v5830_v14  ;;  %5547 = vmatpush3.bf16.msra.mxu0 %v5688_v3 }
0x2a00   :  { %v4157_v21 = vpack.c.bf16 %v4155_v39, %v4155_v39  ;;  %5548 = vmatprep.subr.bf16.mxu0 %v5830_v14 }
0x2a02   :  { %5543 = vmatmul.mubr.msk.bf16.vlgmr.msra.gmra.mxu1 %vm334_vm7, %v4157_v21  ;;  %v4858_v21 = vld [vmem:[%s6865_s6 + $0x2] ss:$0 sm:$0xff] }
0x2a03   :  { %5558 = vmatprep.mubr.msk.bf16.mxu1 %vm5831_vm1, %v5830_v14  ;;  %5555 = vmatpush3.bf16.msra.mxu1 %v5688_v3 }
0x2a04   :  { %5556 = vmatprep.subr.bf16.mxu1 %v5830_v14  ;;  %5549 = vmatpush3.bf16.msra.mxu0 %v5689_v59 }
0x2a05   :  { %5562 = vmatprep.subr.bf16.mxu0 %v5830_v14 }
0x2a07   :  { %5557 = vmatpush3.bf16.msra.mxu1 %v5689_v59 }
0x2a08   :  { %5570 = vmatprep.subr.bf16.mxu1 %v5830_v14 }
0x2abe   :  { %v4200_v60 = vpop.f32.mrf.mxu0 }
0x2ac0   :  { %v5538_v61 = vpop.f32.mrf.mxu0 }
0x2ac2   :  { %v4203_v62 = vpop.f32.mrf.mxu0  ;;  %v4248_v63 = vpop.f32.mrf.mxu1 }
0x2ac3   :  { %v5661_v5 = vpack.i.bf16 %v4248_v63, %v4200_v60  ;;  %v4859_v60 = vld [vmem:[%s6866_s7 + $0x2] ss:$0 sm:$0xff] }
0x2ac4   :  { %v5539_v8 = vpop.f32.mrf.mxu0  ;;  %v5544_v9 = vpop.f32.mrf.mxu1 }
0x2ac5   :  { %5662 = vrot.lane.b32.xlu0 %v5661_v5, %s6898_s29 }
0x2ac6   :  { %v4251_v10 = vpop.f32.mrf.mxu1 }
0x2ac8   :  { %v5545_v11 = vpop.f32.mrf.mxu1 }
0x2ac9   :  { %v5692_v11 = vld [vmem:[%s6867_s10 + $0x58] sm:$0xff]  }
0x2b37   :  { %v5663_v19 = vpop.permute.xlu0 %5662 }
0x2b38   :  { %v5665_v29 = vunpack.i.h.bf16 %v5663_v19  ;;  %v5664_v31 = vunpack.i.l.bf16 %v5663_v19 }
0x2b3a   :  { %v4283_v33 = vsel %vm1128_vm9, %v4281_v34, %v5665_v29  ;;  %v4282_v22 = vsel %vm1128_vm9, %v4280_v32, %v5664_v31 }
0x2b3b   :  { %v4285_v49 = vpack.c.bf16 %v4283_v33, %v4283_v33  ;;  %v4284_v2 = vpack.c.bf16 %v4282_v22, %v4282_v22 }
0x2b3d   :  { %5551 = vmatmul.mubr.msk.bf16.vlgmr.msra.gmra.mxu0 %vm117_vm2, %v4284_v2  ;;  %5559 = vmatmul.mubr.msk.bf16.vlgmr.msra.gmra.mxu1 %vm117_vm2, %v4285_v49 }
0x2b3e   :  { %5566 = vmatprep.mubr.msk.bf16.mxu0 %vm5831_vm1, %v5830_v14  ;;  %5574 = vmatprep.mubr.msk.bf16.mxu1 %vm5831_vm1, %v5830_v14 }
0x2b3f   :  { %5563 = vmatpush3.bf16.msra.mxu0 %v5690_v52  ;;  %5571 = vmatpush3.bf16.msra.mxu1 %v5690_v52 }
0x2b40   :  { %5564 = vmatprep.subr.bf16.mxu0 %v5830_v14  ;;  %5572 = vmatprep.subr.bf16.mxu1 %v5830_v14 }
0x2b43   :  { %5565 = vmatpush3.bf16.msra.mxu0 %v5691_v38  ;;  %5573 = vmatpush3.bf16.msra.mxu1 %v5691_v38 }
0x2b44   :  { %5578 = vmatprep.subr.bf16.mxu0 %v5830_v14  ;;  %5590 = vmatprep.subr.bf16.mxu1 %v5830_v14 }
0x2bfd   :  { %v4348_v43 = vpop.f32.mrf.mxu0  ;;  %v4391_v6 = vpop.f32.mrf.mxu1 }
0x2bfe   :  { %v4349_v7 = vadd.f32 %v4851_v37, %v4348_v43  ;;  %v4392_v41 = vadd.f32 %v4851_v37, %v4391_v6 }
0x2bff   :  { %v5552_v42 = vpop.f32.mrf.mxu0  ;;  %v5560_v44 = vpop.f32.mrf.mxu1 }
0x2c00   :  { %v6787_v45 = vadd.f32 %v4349_v7, %v6563_v36  ;;  %v6790_v46 = vadd.f32 %v4392_v41, %v6567_v4 }
0x2c01   :  { %v4351_v40 = vpop.f32.mrf.mxu0  ;;  %v4394_v28 = vpop.f32.mrf.mxu1 }
0x2c02   :  { %v4406_v0 = vsel %vm55_vm0, %v6790_v46, 0.0  ;;  %v4403_v1 = vsel %vm55_vm0, %v6787_v45, 0.0  ;;  %v4879_v28 = vld [vmem:[%s6869_s11 + $0x2] ss:$0 sm:$0xff] }
0x2c03   :  { %4407 = vadd.xlane.f32.xlu0 %v4406_v0  ;;  %v5561_v24 = vpop.f32.mrf.mxu1  ;;  %4404 = vadd.xlane.f32.xlu1 %v4403_v1  ;;  %v5553_v20 = vpop.f32.mrf.mxu0 }
0x2c8c   :  { %v4408_v23 = vpop.xlane.xlu0 %4407  ;;  %v4405_v25 = vpop.xlane.xlu1 %4404 }
0x2c8d   :  { %v4410_v50 = vmul.f32 0.03125, %v4408_v23  ;;  %v4409_v36 = vmul.f32 0.03125, %v4405_v25 }
0x2c8f   :  { %v4412_v51 = vsub.f32 %v6790_v46, %v4410_v50  ;;  %v4411_v4 = vsub.f32 %v6787_v45, %v4409_v36 }
0x2c91   :  { %v4414_v47 = vmul.f32 %v4412_v51, %v4412_v51  ;;  %v4413_v30 = vmul.f32 %v4411_v4, %v4411_v4 }
0x2c93   :  { %v4418_v35 = vsel %vm55_vm0, %v4414_v47, 0.0  ;;  %v4415_v48 = vsel %vm55_vm0, %v4413_v30, 0.0 }
0x2c94   :  { %4419 = vadd.xlane.f32.xlu1 %v4418_v35  ;;  %4416 = vadd.xlane.f32.xlu0 %v4415_v48 }
0x2d1d   :  { %v4417_v53 = vpop.xlane.xlu0 %4416  ;;  %v4420_v54 = vpop.xlane.xlu1 %4419 }
0x2d1e   :  { %v4421_v55 = vmul.f32 0.03125, %v4417_v53  ;;  %v4422_v56 = vmul.f32 0.03125, %v4420_v54 }
0x2d20   :  { %v4423_v57 = vadd.f32 1e-05, %v4421_v55  ;;  %v4424_v58 = vadd.f32 1e-05, %v4422_v56 }
0x2d22   :  { %5820 = vrsqrt.f32 %v4423_v57 }
0x2d23   :  { %5822 = vrsqrt.f32 %v4424_v58 }
0x2d2f   :  { %v5821_v39 = vpop.eup %5820 }
0x2d30   :  { %v5823_v3 = vpop.eup %5822  ;;  %v4427_v59 = vmul.f32 %v5821_v39, %v4411_v4 }
0x2d31   :  { %v4428_v61 = vmul.f32 %v5823_v3, %v4412_v51 }
0x2d32   :  { %v4435_v62 = vmul.f32 %v4858_v21, %v4427_v59 }
0x2d33   :  { %v4436_v63 = vmul.f32 %v4858_v21, %v4428_v61 }
0x2d34   :  { %v4443_v5 = vadd.f32 %v4859_v60, %v4435_v62 }
0x2d35   :  { %v4444_v8 = vadd.f32 %v4859_v60, %v4436_v63 }
0x2d36   :  { %v4445_v9 = vpack.c.bf16 %v4443_v5, %v4443_v5 }
0x2d37   :  { %v4446_v10 = vpack.c.bf16 %v4444_v8, %v4444_v8 }
0x2d38   :  { %5567 = vmatmul.mubr.msk.bf16.vlgmr.msra.gmra.mxu0 %vm117_vm2, %v4445_v9 }
0x2d39   :  { %5575 = vmatmul.mubr.msk.bf16.vlgmr.msra.gmra.mxu1 %vm117_vm2, %v4446_v10  ;;  %5586 = vmatprep.mubr.msk.bf16.mxu0 %vm5831_vm1, %v5830_v14 }
0x2d3a   :  { %5598 = vmatprep.mubr.msk.bf16.mxu1 %vm5831_vm1, %v5830_v14  ;;  %5579 = vmatpush3.bf16.msra.mxu0 %v5692_v11 }
0x2d3b   :  { %5591 = vmatpush3.bf16.msra.mxu1 %v5692_v11  ;;  %5580 = vmatprep.subr.bf16.mxu0 %v5830_v14 }
0x2d3c   :  { %5592 = vmatprep.subr.bf16.mxu1 %v5830_v14 }
0x2d3e   :  { %5581 = vmatpush3.bf16.msra.mxu0 %v5693_v13 }
0x2d3f   :  { %5593 = vmatpush3.bf16.msra.mxu1 %v5693_v13  ;;  %5582 = vmatprep.subr.bf16.mxu0 %v5830_v14 }
0x2d40   :  { %5594 = vmatprep.subr.bf16.mxu1 %v5830_v14 }
0x2d42   :  { %5583 = vmatpush3.bf16.msra.mxu0 %v5694_v17 }
0x2d43   :  { %5595 = vmatpush3.bf16.msra.mxu1 %v5694_v17  ;;  %5584 = vmatprep.subr.bf16.mxu0 %v5830_v14 }
0x2d44   :  { %5596 = vmatprep.subr.bf16.mxu1 %v5830_v14 }
0x2d46   :  { %5585 = vmatpush3.bf16.msra.mxu0 %v5695_v12 }
0x2d47   :  { %5597 = vmatpush3.bf16.msra.mxu1 %v5695_v12 }
0x2df8   :  { %v4509_v16 = vpop.f32.mrf.mxu0 }
0x2df9   :  { %v4510_v18 = vadd.f32 %v4865_v15, %v4509_v16  ;;  %v4552_v19 = vpop.f32.mrf.mxu1 }
0x2dfa   :  { %v4553_v26 = vadd.f32 %v4865_v15, %v4552_v19  ;;  %v5568_v27 = vpop.f32.mrf.mxu0 }
0x2dfb   :  { %v4560_v29 = vmul.f32 0.70710677, %v4510_v18  ;;  %v5576_v31 = vpop.f32.mrf.mxu1  ;;  %v4558_v37 = vmul.f32 0.5, %v4510_v18 }
0x2dfc   :  { %v4561_v34 = vmul.f32 0.70710677, %v4553_v26  ;;  %v4512_v32 = vpop.f32.mrf.mxu0  ;;  %v4559_v6 = vmul.f32 0.5, %v4553_v26 }
0x2dfd   :  { %5824 = verf.f32 %v4560_v29  ;;  %v4555_v14 = vpop.f32.mrf.mxu1 }
0x2dfe   :  { %5826 = verf.f32 %v4561_v34  ;;  %v5569_v33 = vpop.f32.mrf.mxu0 }
0x2dff   :  { %v5577_v22 = vpop.f32.mrf.mxu1 }
0x2e0a   :  { %v5825_v49 = vpop.eup %5824 }
0x2e0b   :  { %v5827_v2 = vpop.eup %5826  ;;  %v4564_v43 = vadd.f32 1.0, %v5825_v49 }
0x2e0c   :  { %v4565_v7 = vadd.f32 1.0, %v5827_v2 }
0x2e0d   :  { %v4566_v41 = vmul.f32 %v4564_v43, %v4558_v37 }
0x2e0e   :  { %v4567_v42 = vmul.f32 %v4565_v7, %v4559_v6 }
0x2e0f   :  { %v4568_v44 = vpack.c.bf16 %v4566_v41, %v4566_v41 }
0x2e10   :  { %v4569_v40 = vpack.c.bf16 %v4567_v42, %v4567_v42 }
0x2e11   :  { %5587 = vmatmul.mubr.msk.bf16.vlgmr.msra.gmra.mxu0 %vm1450_vm10, %v4568_v44 }
0x2e12   :  { %5599 = vmatmul.mubr.msk.bf16.vlgmr.msra.gmra.mxu1 %vm1450_vm10, %v4569_v40 }
0x2ed1   :  { %v4648_v0 = vpop.f32.mrf.mxu0 }
0x2ed2   :  { %v4649_v1 = vadd.f32 %v4879_v28, %v4648_v0  ;;  %v4691_v24 = vpop.f32.mrf.mxu1 }
0x2ed3   :  { %v4692_v20 = vadd.f32 %v4879_v28, %v4691_v24  ;;  %v5588_v23 = vpop.f32.mrf.mxu0 }
0x2ed4   :  { %v4697_v25 = vadd.f32 %v4649_v1, %v6787_v45  ;;  %v5600_v50 = vpop.f32.mrf.mxu1 }
0x2ed5   :  { %v4698_v36 = vadd.f32 %v4692_v20, %v6790_v46  ;;  %v4651_v51 = vpop.f32.mrf.mxu0 }
0x2ed6   :  { %4699 = vst.msk [vmem:[%s6873_s15] sm:$0x1f] %vm55_vm0, %v4697_v25  ;;  %v4694_v4 = vpop.f32.mrf.mxu1 }
0x2ed7   :  { %4700 = vst.msk [vmem:[%s6873_s15 + $0x8] sm:$0x1f] %vm55_vm0, %v4698_v36  ;;  %v5589_v47 = vpop.f32.mrf.mxu0 }
0x2ed8   :  { %v5601_v30 = vpop.f32.mrf.mxu1 }

</bundles_post_ra>
